<compile_context>
chip_gen: v5e
topology: v5e:2x2
jax: 0.10.0
libtpu: 0.0.40
codegen_flags: <defaults>
</compile_context>

<pallas_src>
import functools

import jax
import jax.numpy as jnp
from jax.experimental import pallas as pl
from jax.experimental.pallas import tpu as pltpu

NEG_SLOPE = 0.1      # get_nonlinearity_layer('LeakyReLU') -> nn.LeakyReLU(0.1)
LANES = 128
PAD_BASE = 8         # anchor row of the im2col scratch (must be >= 2)
NO_SPECT = ('attn2.query', 'conv_class', 'conv_final')   # convs without SpectralNorm


def _leaky(x):
    return jnp.where(x >= 0, x, NEG_SLOPE * x)


# --------------------------------------------------------------- static module layout
def module_structure(cfg):
    """Ordered conv list: (name, cin, cout, kernel_size)."""
    input_nc, ndf, img_f = cfg['input_nc'], cfg['ndf'], cfg['img_f']
    layers, num_classes, use_attn = cfg['layers'], cfg['num_classes'], cfg['use_attn']
    convs = [('block0.conv1', input_nc, ndf, 3),
             ('block0.conv2', ndf, ndf, 3),
             ('block0.bypass', input_nc, ndf, 1)]
    mult = 1
    for i in range(layers - 1):
        mult_prev, mult = mult, min(2 ** (i + 1), img_f // ndf)
        cin, cout = ndf * mult_prev, ndf * mult
        if i == 2 and use_attn:
            convs.append(('attn2.query', cin, max(cin // 4, 1), 1))
        convs += [('encoder%d.conv1' % i, cin, cin, 3),     # hidden_nc = ndf*mult_prev
                  ('encoder%d.conv2' % i, cin, cout, 3),
                  ('encoder%d.bypass' % i, cin, cout, 1)]
    C = ndf * mult
    for blk in ('block1_dis', 'block1_class'):
        convs += [('%s.conv1' % blk, C, C, 3),
                  ('%s.conv2' % blk, C, C, 3),
                  ('%s.bypass' % blk, C, C, 1)]
    convs += [('conv_dis', C, 1, 3),
              ('conv_class', C, C, 3),
              ('conv_final', C, num_classes, 1)]
    return convs


# --------------------------------------------------------------------------- params
def spectral_normalize(w, key, eps=1e-12):
    """One power iteration of the custom SpectralNorm (deterministic u init)."""
    cout = w.shape[0]
    w_mat = w.reshape(cout, -1)
    u = jax.random.normal(key, (cout,), jnp.float32)
    u = u / (jnp.linalg.norm(u) + eps)
    v = w_mat.T @ u
    v = v / (jnp.linalg.norm(v) + eps)
    u = w_mat @ v
    u = u / (jnp.linalg.norm(u) + eps)
    sigma = jnp.dot(u, w_mat @ v)
    return w / sigma


def init_conv(key, cin, cout, k, spect):
    kw, kb, ku = jax.random.split(key, 3)
    w = 0.1 * jax.random.normal(kw, (cout, cin, k), jnp.float32)    # PyTorch Conv1d layout
    b = 0.02 * jax.random.normal(kb, (cout,), jnp.float32)
    if spect:
        w = spectral_normalize(w, ku)
    return {'w': jnp.transpose(w, (2, 1, 0)), 'b': b}               # (K, Cin, Cout), (Cout,)


def build_params(key, convs, cfg):
    keys = jax.random.split(key, len(convs))
    params = {name: init_conv(kk, cin, cout, ksz, name not in NO_SPECT)
              for (name, cin, cout, ksz), kk in zip(convs, keys)}
    if cfg['use_attn']:
        params['attn2.gamma'] = jnp.zeros((), jnp.float32)          # gamma init = 0
    return params


def pack_params(params, convs, cfg, L0):
    """Pack all conv weights (+ avg-pool matrices) into one bf16 buffer and all
    biases (+ Auto_Attn gamma) into one f32 buffer.
    meta[name] = (row_offset, rows, cout, bias_row); pool matrices under 'pool<L>'."""
    layers, use_attn = cfg['layers'], cfg['use_attn']
    w_blocks, b_rows, meta = [], [], {}
    w_off = [0]

    def add_w(mat):                                   # mat: (rows, cols<=LANES) f32
        rows, cols = mat.shape
        assert cols <= LANES
        pad_r = (-rows) % 16                          # keep blocks 16-row aligned
        w_blocks.append(jnp.pad(mat.astype(jnp.float32),
                                ((0, pad_r), (0, LANES - cols))))
        off = w_off[0]
        w_off[0] += rows + pad_r
        return off, rows, cols

    for name, cin, cout, k in convs:
        off, rows, _ = add_w(params[name]['w'].reshape(k * cin, cout))
        meta[name] = (off, rows, cout, len(b_rows))
        b_rows.append(jnp.pad(params[name]['b'], (0, LANES - cout)))

    L = L0
    for _ in range(layers):                           # block0 + (layers-1) down encoders
        r = jnp.arange(L // 2)[:, None]
        c = jnp.arange(L)[None, :]
        P = jnp.where((c == 2 * r) | (c == 2 * r + 1), 0.5, 0.0).astype(jnp.float32)
        off, rows, _ = add_w(P)                       # (L//2, L) AvgPool1d(2,2) matrix
        meta['pool%d' % L] = (off, rows, L, -1)
        L //= 2

    if use_attn:
        meta['attn2.gamma'] = len(b_rows)
        b_rows.append(jnp.zeros((LANES,), jnp.float32).at[0].set(params['attn2.gamma']))

    max_cin3 = max(ci for _, ci, _, k in convs if k == 3)
    meta['_scratch_lanes'] = -(-3 * max_cin3 // LANES) * LANES

    wbuf = jnp.concatenate(w_blocks, axis=0).astype(jnp.bfloat16)
    bbuf = jnp.stack(b_rows, axis=0)
    return wbuf, bbuf, meta


# --------------------------------------------------------------------------- kernel
def make_kernel(cfg, meta):
    layers, use_attn = cfg['layers'], cfg['use_attn']
    num_classes = cfg['num_classes']
    bf16, f32 = jnp.bfloat16, jnp.float32

    def kernel(x_ref, w_ref, b_ref, out_ref, pad_ref):

        def conv(x, name, k, pad, pre_act):
            """Conv1d (channels-last) as a single fused bf16 MXU dot.
            K=3 taps are gathered by storing x at three (row, lane) offsets of the
            im2col scratch and reading back one (Lout, 3*C) tile (shifts off the MXU)."""
            off, rows, cout, brow = meta[name]
            if pre_act:                               # LeakyReLU(0)=0 -> act/pad commute
                x = _leaky(x)
            L, C = x.shape
            b0 = PAD_BASE
            if k == 1:
                xc, Lout = x, L
            elif pad:                                 # padding=1: taps x[i-1], x[i], x[i+1]
                pad_ref[b0 + 1:b0 + 1 + L, 0:C] = x
                pad_ref[b0:b0 + 1, 0:C] = jnp.zeros((1, C), f32)
                pad_ref[b0:b0 + L, C:2 * C] = x
                pad_ref[b0 - 1:b0 - 1 + L, 2 * C:3 * C] = x
                pad_ref[b0 + L - 1:b0 + L, 2 * C:3 * C] = jnp.zeros((1, C), f32)
                Lout = L
                xc = pad_ref[b0:b0 + Lout, 0:3 * C]
            else:                                     # valid: taps x[i], x[i+1], x[i+2]
                pad_ref[b0:b0 + L, 0:C] = x
                pad_ref[b0 - 1:b0 - 1 + L, C:2 * C] = x
                pad_ref[b0 - 2:b0 - 2 + L, 2 * C:3 * C] = x
                Lout = L - 2
                xc = pad_ref[b0:b0 + Lout, 0:3 * C]
            y = jnp.dot(xc.astype(bf16), w_ref[off:off + rows, 0:cout],
                        preferred_element_type=f32)
            return y + b_ref[brow:brow + 1, 0:cout]

        def avgpool(z):                               # nn.AvgPool1d(2, 2) via 0.5-matrix
            off, rows, L, _ = meta['pool%d' % z.shape[0]]
            return jnp.dot(w_ref[off:off + rows, 0:L], z.astype(bf16),
                           preferred_element_type=f32)

        def res_down(x, name, optimized):
            # ResBlockEncoderOptimized (optimized=True) / ResBlock 'down'.
            # AvgPool is linear, so main + bypass are summed first and pooled once
            # (equal to pooling each branch as in the reference implementation).
            h = conv(x, name + '.conv1', 3, True, pre_act=not optimized)
            h = conv(h, name + '.conv2', 3, True, pre_act=True)
            s = conv(x, name + '.bypass', 1, False, pre_act=False)
            return avgpool(h + s)

        def res_none(x, name):                        # ResBlock 'none'
            h = conv(x, name + '.conv1', 3, True, pre_act=True)
            h = conv(h, name + '.conv2', 3, True, pre_act=True)
            return h + conv(x, name + '.bypass', 1, False, pre_act=False)

        def auto_attn(x):                             # Auto_Attn (pre=None branch)
            q = conv(x, 'attn2.query', 1, False, pre_act=False)           # (L, C//4)
            qb = q.astype(bf16)
            energy = jax.lax.dot_general(qb, qb, (((1,), (1,)), ((), ())),
                                         preferred_element_type=f32)      # (L, L)
            p = jnp.exp(energy - jnp.max(energy, axis=-1, keepdims=True))
            attn = p / jnp.sum(p, axis=-1, keepdims=True)                  # exact softmax
            out = jnp.dot(attn.astype(bf16), x.astype(bf16),
                          preferred_element_type=f32)                      # attn @ value
            grow = meta['attn2.gamma']
            gamma = b_ref[grow:grow + 1, 0:1]
            return gamma * out + x

        x = x_ref[0].astype(f32)                                           # (L0, Cin)
        out = res_down(x, 'block0', optimized=True)
        for i in range(layers - 1):
            if i == 2 and use_attn:
                out = auto_attn(out)
            out = res_down(out, 'encoder%d' % i, optimized=False)

        score = conv(res_none(out, 'block1_dis'), 'conv_dis', 3, False, pre_act=True)
        cls = conv(res_none(out, 'block1_class'), 'conv_class', 3, False, pre_act=True)
        cls = conv(cls, 'conv_final', 1, False, pre_act=False)

        # lane-dense merged writeback: lane 0 = score, lanes 1..num_classes = classes
        Lh = score.shape[0]
        out_ref[0] = jnp.zeros((Lh, LANES), f32)
        out_ref[0, :, 0:1] = score
        out_ref[0, :, 1:1 + num_classes] = cls

    return kernel


# --------------------------------------------------------------------------- forward
def forward(x_ncl, wbuf, bbuf, cfg, meta):
    x = jnp.transpose(x_ncl, (0, 2, 1)).astype(jnp.float32)                # NCL -> NLC
    B, L0, Cin = x.shape
    layers, num_classes = cfg['layers'], cfg['num_classes']
    assert L0 % (2 ** layers) == 0
    L_head = L0 // (2 ** layers) - 2                                       # after k=3 head conv

    kernel = make_kernel(cfg, meta)
    out = pl.pallas_call(
        kernel,
        out_shape=jax.ShapeDtypeStruct((B, L_head, LANES), jnp.float32),
        grid=(B,),
        in_specs=[pl.BlockSpec((1, L0, Cin), lambda i: (i, 0, 0)),
                  pl.BlockSpec(wbuf.shape, lambda i: (0, 0)),
                  pl.BlockSpec(bbuf.shape, lambda i: (0, 0))],
        out_specs=pl.BlockSpec((1, L_head, LANES), lambda i: (i, 0, 0)),
        scratch_shapes=[pltpu.VMEM((PAD_BASE + L0 + 8, meta['_scratch_lanes']),
                                   jnp.float32)],
        compiler_params=pltpu.CompilerParams(dimension_semantics=("parallel",)),
    )(x, wbuf, bbuf)

    score = jnp.transpose(out[:, :, 0:1], (0, 2, 1))                       # (B, 1, L_head)
    class_pred = jnp.transpose(out[:, :, 1:1 + num_classes], (0, 2, 1))    # (B, nc, L_head)
    return score, class_pred


if __name__ == "__main__":
    # TODO(synk): SpectralNorm's persistent u/v power-iteration buffers and Auto_Attn's
    # `pre is not None` long-distance-attention branch are not exercised by this forward
    # and are not reproduced.
    cfg = dict(input_nc=3, ndf=16, img_f=64, layers=4, num_classes=5, use_attn=True)
    convs = module_structure(cfg)

    key = jax.random.PRNGKey(0)
    k_param, k_x = jax.random.split(key)
    params = build_params(k_param, convs, cfg)

    B, L0 = 2, 64
    wbuf, bbuf, meta = pack_params(params, convs, cfg, L0)
    x = jax.random.normal(k_x, (B, cfg['input_nc'], L0), jnp.float32)      # (B, C, L)

    fwd = jax.jit(functools.partial(forward, cfg=cfg, meta=meta))
    score, class_pred = fwd(x, wbuf, bbuf)
    jax.block_until_ready((score, class_pred))

    L_head = L0 // (2 ** cfg['layers']) - 2
    assert score.shape == (B, 1, L_head)
    assert class_pred.shape == (B, cfg['num_classes'], L_head)
    assert bool(jnp.all(jnp.isfinite(score))) and bool(jnp.all(jnp.isfinite(class_pred)))
    print("KERNEL_OK")
</pallas_src>

<mosaic_0001>
module attributes {stable_mosaic.version = 11 : i64} {
  func.func @kernel(%arg0: i32, %arg1: memref<1x64x3xf32, #tpu.memory_space<vmem>>, %arg2: memref<2352x128xbf16, #tpu.memory_space<vmem>>, %arg3: memref<23x128xf32, #tpu.memory_space<vmem>>, %arg4: memref<1x2x128xf32, #tpu.memory_space<vmem>>, %arg5: memref<80x256xf32, #tpu.memory_space<vmem>>) attributes {dimension_semantics = [#tpu.dimension_semantics<parallel>], iteration_bounds = array<i64: 2>, scalar_prefetch = 0 : i64, scratch_operands = 1 : i64, tpu.core_type = #tpu.core_type<tc>, window_params = [{transform_indices = @transform_0, window_bounds = array<i64: 1, 64, 3>}, {pipeline_mode = #tpu.pipeline_mode<synchronous>, transform_indices = @transform_1, window_bounds = array<i64: 2352, 128>}, {pipeline_mode = #tpu.pipeline_mode<synchronous>, transform_indices = @transform_2, window_bounds = array<i64: 23, 128>}, {transform_indices = @transform_3, window_bounds = array<i64: 1, 2, 128>}]} {
    %c0 = arith.constant 0 : index
    %c0_0 = arith.constant 0 : index
    %c0_1 = arith.constant 0 : index
    %0 = vector.load %arg1[%c0, %c0_0, %c0_1] : memref<1x64x3xf32, #tpu.memory_space<vmem>>, vector<1x64x3xf32>
    %1 = vector.shape_cast %0 : vector<1x64x3xf32> to vector<64x3xf32>
    %c9 = arith.constant 9 : index
    %c0_2 = arith.constant 0 : index
    %2 = vector.load %arg5[%c9, %c0_2] : memref<80x256xf32, #tpu.memory_space<vmem>>, vector<64x3xf32>
    tpu.vector_store %arg5[%c9, %c0_2], %1 {strides = array<i32>} : memref<80x256xf32, #tpu.memory_space<vmem>>, vector<64x3xf32>,
    %cst = arith.constant 0.000000e+00 : f32
    %3 = vector.broadcast %cst : f32 to vector<1x3xf32>
    %c8 = arith.constant 8 : index
    %c0_3 = arith.constant 0 : index
    %4 = vector.load %arg5[%c8, %c0_3] : memref<80x256xf32, #tpu.memory_space<vmem>>, vector<1x3xf32>
    tpu.vector_store %arg5[%c8, %c0_3], %3 {strides = array<i32>} : memref<80x256xf32, #tpu.memory_space<vmem>>, vector<1x3xf32>,
    %c8_4 = arith.constant 8 : index
    %c3 = arith.constant 3 : index
    %5 = vector.load %arg5[%c8_4, %c3] : memref<80x256xf32, #tpu.memory_space<vmem>>, vector<64x3xf32>
    tpu.vector_store %arg5[%c8_4, %c3], %1 {strides = array<i32>} : memref<80x256xf32, #tpu.memory_space<vmem>>, vector<64x3xf32>,
    %c7 = arith.constant 7 : index
    %c6 = arith.constant 6 : index
    %6 = vector.load %arg5[%c7, %c6] : memref<80x256xf32, #tpu.memory_space<vmem>>, vector<64x3xf32>
    tpu.vector_store %arg5[%c7, %c6], %1 {strides = array<i32>} : memref<80x256xf32, #tpu.memory_space<vmem>>, vector<64x3xf32>,
    %cst_5 = arith.constant 0.000000e+00 : f32
    %7 = vector.broadcast %cst_5 : f32 to vector<1x3xf32>
    %c71 = arith.constant 71 : index
    %c6_6 = arith.constant 6 : index
    %8 = vector.load %arg5[%c71, %c6_6] : memref<80x256xf32, #tpu.memory_space<vmem>>, vector<1x3xf32>
    tpu.vector_store %arg5[%c71, %c6_6], %7 {strides = array<i32>} : memref<80x256xf32, #tpu.memory_space<vmem>>, vector<1x3xf32>,
    %c8_7 = arith.constant 8 : index
    %c0_8 = arith.constant 0 : index
    %9 = vector.load %arg5[%c8_7, %c0_8] : memref<80x256xf32, #tpu.memory_space<vmem>>, vector<64x9xf32>
    %10 = arith.truncf %9 : vector<64x9xf32> to vector<64x9xbf16>
    %c0_9 = arith.constant 0 : index
    %c0_10 = arith.constant 0 : index
    %11 = vector.load %arg2[%c0_9, %c0_10] : memref<2352x128xbf16, #tpu.memory_space<vmem>>, vector<9x16xbf16>
    %cst_11 = arith.constant dense<0.000000e+00> : vector<64x16xf32>
    %12 = tpu.matmul %10, %11, %cst_11 {dimension_numbers = #tpu.dot_dimension_numbers<[1], [0], [0], [1], [0, 0, 1, 1], [], []>} : vector<64x9xbf16>, vector<9x16xbf16>, vector<64x16xf32> -> vector<64x16xf32>
    %c0_12 = arith.constant 0 : index
    %c0_13 = arith.constant 0 : index
    %13 = vector.load %arg3[%c0_12, %c0_13] : memref<23x128xf32, #tpu.memory_space<vmem>>, vector<1x16xf32>
    %14 = vector.broadcast %13 : vector<1x16xf32> to vector<64x16xf32>
    %15 = arith.addf %12, %14 : vector<64x16xf32>
    %cst_14 = arith.constant 0.000000e+00 : f32
    %16 = vector.broadcast %cst_14 : f32 to vector<64x16xf32>
    %17 = arith.cmpf oge, %15, %16 : vector<64x16xf32>
    %cst_15 = arith.constant 1.000000e-01 : f32
    %18 = vector.broadcast %cst_15 : f32 to vector<64x16xf32>
    %19 = arith.mulf %18, %15 : vector<64x16xf32>
    %20 = arith.select %17, %15, %19 : vector<64x16xi1>, vector<64x16xf32>
    %c9_16 = arith.constant 9 : index
    %c0_17 = arith.constant 0 : index
    %21 = vector.load %arg5[%c9_16, %c0_17] : memref<80x256xf32, #tpu.memory_space<vmem>>, vector<64x16xf32>
    tpu.vector_store %arg5[%c9_16, %c0_17], %20 {strides = array<i32>} : memref<80x256xf32, #tpu.memory_space<vmem>>, vector<64x16xf32>,
    %cst_18 = arith.constant 0.000000e+00 : f32
    %22 = vector.broadcast %cst_18 : f32 to vector<1x16xf32>
    %c8_19 = arith.constant 8 : index
    %c0_20 = arith.constant 0 : index
    %23 = vector.load %arg5[%c8_19, %c0_20] : memref<80x256xf32, #tpu.memory_space<vmem>>, vector<1x16xf32>
    tpu.vector_store %arg5[%c8_19, %c0_20], %22 {strides = array<i32>} : memref<80x256xf32, #tpu.memory_space<vmem>>, vector<1x16xf32>,
    %c8_21 = arith.constant 8 : index
    %c16 = arith.constant 16 : index
    %24 = vector.load %arg5[%c8_21, %c16] : memref<80x256xf32, #tpu.memory_space<vmem>>, vector<64x16xf32>
    tpu.vector_store %arg5[%c8_21, %c16], %20 {strides = array<i32>} : memref<80x256xf32, #tpu.memory_space<vmem>>, vector<64x16xf32>,
    %c7_22 = arith.constant 7 : index
    %c32 = arith.constant 32 : index
    %25 = vector.load %arg5[%c7_22, %c32] : memref<80x256xf32, #tpu.memory_space<vmem>>, vector<64x16xf32>
    tpu.vector_store %arg5[%c7_22, %c32], %20 {strides = array<i32>} : memref<80x256xf32, #tpu.memory_space<vmem>>, vector<64x16xf32>,
    %cst_23 = arith.constant 0.000000e+00 : f32
    %26 = vector.broadcast %cst_23 : f32 to vector<1x16xf32>
    %c71_24 = arith.constant 71 : index
    %c32_25 = arith.constant 32 : index
    %27 = vector.load %arg5[%c71_24, %c32_25] : memref<80x256xf32, #tpu.memory_space<vmem>>, vector<1x16xf32>
    tpu.vector_store %arg5[%c71_24, %c32_25], %26 {strides = array<i32>} : memref<80x256xf32, #tpu.memory_space<vmem>>, vector<1x16xf32>,
    %c8_26 = arith.constant 8 : index
    %c0_27 = arith.constant 0 : index
    %28 = vector.load %arg5[%c8_26, %c0_27] : memref<80x256xf32, #tpu.memory_space<vmem>>, vector<64x48xf32>
    %29 = arith.truncf %28 : vector<64x48xf32> to vector<64x48xbf16>
    %c16_28 = arith.constant 16 : index
    %c0_29 = arith.constant 0 : index
    %30 = vector.load %arg2[%c16_28, %c0_29] : memref<2352x128xbf16, #tpu.memory_space<vmem>>, vector<48x16xbf16>
    %cst_30 = arith.constant dense<0.000000e+00> : vector<64x16xf32>
    %31 = tpu.matmul %29, %30, %cst_30 {dimension_numbers = #tpu.dot_dimension_numbers<[1], [0], [0], [1], [0, 0, 1, 1], [], []>} : vector<64x48xbf16>, vector<48x16xbf16>, vector<64x16xf32> -> vector<64x16xf32>
    %c1 = arith.constant 1 : index
    %c0_31 = arith.constant 0 : index
    %32 = vector.load %arg3[%c1, %c0_31] : memref<23x128xf32, #tpu.memory_space<vmem>>, vector<1x16xf32>
    %33 = vector.broadcast %32 : vector<1x16xf32> to vector<64x16xf32>
    %34 = arith.addf %31, %33 : vector<64x16xf32>
    %35 = arith.truncf %1 : vector<64x3xf32> to vector<64x3xbf16>
    %c64 = arith.constant 64 : index
    %c0_32 = arith.constant 0 : index
    %36 = vector.load %arg2[%c64, %c0_32] : memref<2352x128xbf16, #tpu.memory_space<vmem>>, vector<3x16xbf16>
    %cst_33 = arith.constant dense<0.000000e+00> : vector<64x16xf32>
    %37 = tpu.matmul %35, %36, %cst_33 {dimension_numbers = #tpu.dot_dimension_numbers<[1], [0], [0], [1], [0, 0, 1, 1], [], []>} : vector<64x3xbf16>, vector<3x16xbf16>, vector<64x16xf32> -> vector<64x16xf32>
    %c2 = arith.constant 2 : index
    %c0_34 = arith.constant 0 : index
    %38 = vector.load %arg3[%c2, %c0_34] : memref<23x128xf32, #tpu.memory_space<vmem>>, vector<1x16xf32>
    %39 = vector.broadcast %38 : vector<1x16xf32> to vector<64x16xf32>
    %40 = arith.addf %37, %39 : vector<64x16xf32>
    %41 = arith.addf %34, %40 : vector<64x16xf32>
    %c2272 = arith.constant 2272 : index
    %c0_35 = arith.constant 0 : index
    %42 = vector.load %arg2[%c2272, %c0_35] : memref<2352x128xbf16, #tpu.memory_space<vmem>>, vector<32x64xbf16>
    %43 = arith.truncf %41 : vector<64x16xf32> to vector<64x16xbf16>
    %cst_36 = arith.constant dense<0.000000e+00> : vector<32x16xf32>
    %44 = tpu.matmul %42, %43, %cst_36 {dimension_numbers = #tpu.dot_dimension_numbers<[1], [0], [0], [1], [0, 0, 1, 1], [], []>} : vector<32x64xbf16>, vector<64x16xbf16>, vector<32x16xf32> -> vector<32x16xf32>
    %cst_37 = arith.constant 0.000000e+00 : f32
    %45 = vector.broadcast %cst_37 : f32 to vector<32x16xf32>
    %46 = arith.cmpf oge, %44, %45 : vector<32x16xf32>
    %cst_38 = arith.constant 1.000000e-01 : f32
    %47 = vector.broadcast %cst_38 : f32 to vector<32x16xf32>
    %48 = arith.mulf %47, %44 : vector<32x16xf32>
    %49 = arith.select %46, %44, %48 : vector<32x16xi1>, vector<32x16xf32>
    %c9_39 = arith.constant 9 : index
    %c0_40 = arith.constant 0 : index
    %50 = vector.load %arg5[%c9_39, %c0_40] : memref<80x256xf32, #tpu.memory_space<vmem>>, vector<32x16xf32>
    tpu.vector_store %arg5[%c9_39, %c0_40], %49 {strides = array<i32>} : memref<80x256xf32, #tpu.memory_space<vmem>>, vector<32x16xf32>,
    %cst_41 = arith.constant 0.000000e+00 : f32
    %51 = vector.broadcast %cst_41 : f32 to vector<1x16xf32>
    %c8_42 = arith.constant 8 : index
    %c0_43 = arith.constant 0 : index
    %52 = vector.load %arg5[%c8_42, %c0_43] : memref<80x256xf32, #tpu.memory_space<vmem>>, vector<1x16xf32>
    tpu.vector_store %arg5[%c8_42, %c0_43], %51 {strides = array<i32>} : memref<80x256xf32, #tpu.memory_space<vmem>>, vector<1x16xf32>,
    %c8_44 = arith.constant 8 : index
    %c16_45 = arith.constant 16 : index
    %53 = vector.load %arg5[%c8_44, %c16_45] : memref<80x256xf32, #tpu.memory_space<vmem>>, vector<32x16xf32>
    tpu.vector_store %arg5[%c8_44, %c16_45], %49 {strides = array<i32>} : memref<80x256xf32, #tpu.memory_space<vmem>>, vector<32x16xf32>,
    %c7_46 = arith.constant 7 : index
    %c32_47 = arith.constant 32 : index
    %54 = vector.load %arg5[%c7_46, %c32_47] : memref<80x256xf32, #tpu.memory_space<vmem>>, vector<32x16xf32>
    tpu.vector_store %arg5[%c7_46, %c32_47], %49 {strides = array<i32>} : memref<80x256xf32, #tpu.memory_space<vmem>>, vector<32x16xf32>,
    %cst_48 = arith.constant 0.000000e+00 : f32
    %55 = vector.broadcast %cst_48 : f32 to vector<1x16xf32>
    %c39 = arith.constant 39 : index
    %c32_49 = arith.constant 32 : index
    %56 = vector.load %arg5[%c39, %c32_49] : memref<80x256xf32, #tpu.memory_space<vmem>>, vector<1x16xf32>
    tpu.vector_store %arg5[%c39, %c32_49], %55 {strides = array<i32>} : memref<80x256xf32, #tpu.memory_space<vmem>>, vector<1x16xf32>,
    %c8_50 = arith.constant 8 : index
    %c0_51 = arith.constant 0 : index
    %57 = vector.load %arg5[%c8_50, %c0_51] : memref<80x256xf32, #tpu.memory_space<vmem>>, vector<32x48xf32>
    %58 = arith.truncf %57 : vector<32x48xf32> to vector<32x48xbf16>
    %c80 = arith.constant 80 : index
    %c0_52 = arith.constant 0 : index
    %59 = vector.load %arg2[%c80, %c0_52] : memref<2352x128xbf16, #tpu.memory_space<vmem>>, vector<48x16xbf16>
    %cst_53 = arith.constant dense<0.000000e+00> : vector<32x16xf32>
    %60 = tpu.matmul %58, %59, %cst_53 {dimension_numbers = #tpu.dot_dimension_numbers<[1], [0], [0], [1], [0, 0, 1, 1], [], []>} : vector<32x48xbf16>, vector<48x16xbf16>, vector<32x16xf32> -> vector<32x16xf32>
    %c3_54 = arith.constant 3 : index
    %c0_55 = arith.constant 0 : index
    %61 = vector.load %arg3[%c3_54, %c0_55] : memref<23x128xf32, #tpu.memory_space<vmem>>, vector<1x16xf32>
    %62 = vector.broadcast %61 : vector<1x16xf32> to vector<32x16xf32>
    %63 = arith.addf %60, %62 : vector<32x16xf32>
    %cst_56 = arith.constant 0.000000e+00 : f32
    %64 = vector.broadcast %cst_56 : f32 to vector<32x16xf32>
    %65 = arith.cmpf oge, %63, %64 : vector<32x16xf32>
    %cst_57 = arith.constant 1.000000e-01 : f32
    %66 = vector.broadcast %cst_57 : f32 to vector<32x16xf32>
    %67 = arith.mulf %66, %63 : vector<32x16xf32>
    %68 = arith.select %65, %63, %67 : vector<32x16xi1>, vector<32x16xf32>
    %c9_58 = arith.constant 9 : index
    %c0_59 = arith.constant 0 : index
    %69 = vector.load %arg5[%c9_58, %c0_59] : memref<80x256xf32, #tpu.memory_space<vmem>>, vector<32x16xf32>
    tpu.vector_store %arg5[%c9_58, %c0_59], %68 {strides = array<i32>} : memref<80x256xf32, #tpu.memory_space<vmem>>, vector<32x16xf32>,
    %cst_60 = arith.constant 0.000000e+00 : f32
    %70 = vector.broadcast %cst_60 : f32 to vector<1x16xf32>
    %c8_61 = arith.constant 8 : index
    %c0_62 = arith.constant 0 : index
    %71 = vector.load %arg5[%c8_61, %c0_62] : memref<80x256xf32, #tpu.memory_space<vmem>>, vector<1x16xf32>
    tpu.vector_store %arg5[%c8_61, %c0_62], %70 {strides = array<i32>} : memref<80x256xf32, #tpu.memory_space<vmem>>, vector<1x16xf32>,
    %c8_63 = arith.constant 8 : index
    %c16_64 = arith.constant 16 : index
    %72 = vector.load %arg5[%c8_63, %c16_64] : memref<80x256xf32, #tpu.memory_space<vmem>>, vector<32x16xf32>
    tpu.vector_store %arg5[%c8_63, %c16_64], %68 {strides = array<i32>} : memref<80x256xf32, #tpu.memory_space<vmem>>, vector<32x16xf32>,
    %c7_65 = arith.constant 7 : index
    %c32_66 = arith.constant 32 : index
    %73 = vector.load %arg5[%c7_65, %c32_66] : memref<80x256xf32, #tpu.memory_space<vmem>>, vector<32x16xf32>
    tpu.vector_store %arg5[%c7_65, %c32_66], %68 {strides = array<i32>} : memref<80x256xf32, #tpu.memory_space<vmem>>, vector<32x16xf32>,
    %cst_67 = arith.constant 0.000000e+00 : f32
    %74 = vector.broadcast %cst_67 : f32 to vector<1x16xf32>
    %c39_68 = arith.constant 39 : index
    %c32_69 = arith.constant 32 : index
    %75 = vector.load %arg5[%c39_68, %c32_69] : memref<80x256xf32, #tpu.memory_space<vmem>>, vector<1x16xf32>
    tpu.vector_store %arg5[%c39_68, %c32_69], %74 {strides = array<i32>} : memref<80x256xf32, #tpu.memory_space<vmem>>, vector<1x16xf32>,
    %c8_70 = arith.constant 8 : index
    %c0_71 = arith.constant 0 : index
    %76 = vector.load %arg5[%c8_70, %c0_71] : memref<80x256xf32, #tpu.memory_space<vmem>>, vector<32x48xf32>
    %77 = arith.truncf %76 : vector<32x48xf32> to vector<32x48xbf16>
    %c128 = arith.constant 128 : index
    %c0_72 = arith.constant 0 : index
    %78 = vector.load %arg2[%c128, %c0_72] : memref<2352x128xbf16, #tpu.memory_space<vmem>>, vector<48x32xbf16>
    %cst_73 = arith.constant dense<0.000000e+00> : vector<32x32xf32>
    %79 = tpu.matmul %77, %78, %cst_73 {dimension_numbers = #tpu.dot_dimension_numbers<[1], [0], [0], [1], [0, 0, 1, 1], [], []>} : vector<32x48xbf16>, vector<48x32xbf16>, vector<32x32xf32> -> vector<32x32xf32>
    %c4 = arith.constant 4 : index
    %c0_74 = arith.constant 0 : index
    %80 = vector.load %arg3[%c4, %c0_74] : memref<23x128xf32, #tpu.memory_space<vmem>>, vector<1x32xf32>
    %81 = vector.broadcast %80 : vector<1x32xf32> to vector<32x32xf32>
    %82 = arith.addf %79, %81 : vector<32x32xf32>
    %83 = arith.truncf %44 : vector<32x16xf32> to vector<32x16xbf16>
    %c176 = arith.constant 176 : index
    %c0_75 = arith.constant 0 : index
    %84 = vector.load %arg2[%c176, %c0_75] : memref<2352x128xbf16, #tpu.memory_space<vmem>>, vector<16x32xbf16>
    %cst_76 = arith.constant dense<0.000000e+00> : vector<32x32xf32>
    %85 = tpu.matmul %83, %84, %cst_76 {dimension_numbers = #tpu.dot_dimension_numbers<[1], [0], [0], [1], [0, 0, 1, 1], [], []>} : vector<32x16xbf16>, vector<16x32xbf16>, vector<32x32xf32> -> vector<32x32xf32>
    %c5 = arith.constant 5 : index
    %c0_77 = arith.constant 0 : index
    %86 = vector.load %arg3[%c5, %c0_77] : memref<23x128xf32, #tpu.memory_space<vmem>>, vector<1x32xf32>
    %87 = vector.broadcast %86 : vector<1x32xf32> to vector<32x32xf32>
    %88 = arith.addf %85, %87 : vector<32x32xf32>
    %89 = arith.addf %82, %88 : vector<32x32xf32>
    %c2304 = arith.constant 2304 : index
    %c0_78 = arith.constant 0 : index
    %90 = vector.load %arg2[%c2304, %c0_78] : memref<2352x128xbf16, #tpu.memory_space<vmem>>, vector<16x32xbf16>
    %91 = arith.truncf %89 : vector<32x32xf32> to vector<32x32xbf16>
    %cst_79 = arith.constant dense<0.000000e+00> : vector<16x32xf32>
    %92 = tpu.matmul %90, %91, %cst_79 {dimension_numbers = #tpu.dot_dimension_numbers<[1], [0], [0], [1], [0, 0, 1, 1], [], []>} : vector<16x32xbf16>, vector<32x32xbf16>, vector<16x32xf32> -> vector<16x32xf32>
    %cst_80 = arith.constant 0.000000e+00 : f32
    %93 = vector.broadcast %cst_80 : f32 to vector<16x32xf32>
    %94 = arith.cmpf oge, %92, %93 : vector<16x32xf32>
    %cst_81 = arith.constant 1.000000e-01 : f32
    %95 = vector.broadcast %cst_81 : f32 to vector<16x32xf32>
    %96 = arith.mulf %95, %92 : vector<16x32xf32>
    %97 = arith.select %94, %92, %96 : vector<16x32xi1>, vector<16x32xf32>
    %c9_82 = arith.constant 9 : index
    %c0_83 = arith.constant 0 : index
    %98 = vector.load %arg5[%c9_82, %c0_83] : memref<80x256xf32, #tpu.memory_space<vmem>>, vector<16x32xf32>
    tpu.vector_store %arg5[%c9_82, %c0_83], %97 {strides = array<i32>} : memref<80x256xf32, #tpu.memory_space<vmem>>, vector<16x32xf32>,
    %cst_84 = arith.constant 0.000000e+00 : f32
    %99 = vector.broadcast %cst_84 : f32 to vector<1x32xf32>
    %c8_85 = arith.constant 8 : index
    %c0_86 = arith.constant 0 : index
    %100 = vector.load %arg5[%c8_85, %c0_86] : memref<80x256xf32, #tpu.memory_space<vmem>>, vector<1x32xf32>
    tpu.vector_store %arg5[%c8_85, %c0_86], %99 {strides = array<i32>} : memref<80x256xf32, #tpu.memory_space<vmem>>, vector<1x32xf32>,
    %c8_87 = arith.constant 8 : index
    %c32_88 = arith.constant 32 : index
    %101 = vector.load %arg5[%c8_87, %c32_88] : memref<80x256xf32, #tpu.memory_space<vmem>>, vector<16x32xf32>
    tpu.vector_store %arg5[%c8_87, %c32_88], %97 {strides = array<i32>} : memref<80x256xf32, #tpu.memory_space<vmem>>, vector<16x32xf32>,
    %c7_89 = arith.constant 7 : index
    %c64_90 = arith.constant 64 : index
    %102 = vector.load %arg5[%c7_89, %c64_90] : memref<80x256xf32, #tpu.memory_space<vmem>>, vector<16x32xf32>
    tpu.vector_store %arg5[%c7_89, %c64_90], %97 {strides = array<i32>} : memref<80x256xf32, #tpu.memory_space<vmem>>, vector<16x32xf32>,
    %cst_91 = arith.constant 0.000000e+00 : f32
    %103 = vector.broadcast %cst_91 : f32 to vector<1x32xf32>
    %c23 = arith.constant 23 : index
    %c64_92 = arith.constant 64 : index
    %104 = vector.load %arg5[%c23, %c64_92] : memref<80x256xf32, #tpu.memory_space<vmem>>, vector<1x32xf32>
    tpu.vector_store %arg5[%c23, %c64_92], %103 {strides = array<i32>} : memref<80x256xf32, #tpu.memory_space<vmem>>, vector<1x32xf32>,
    %c8_93 = arith.constant 8 : index
    %c0_94 = arith.constant 0 : index
    %105 = vector.load %arg5[%c8_93, %c0_94] : memref<80x256xf32, #tpu.memory_space<vmem>>, vector<16x96xf32>
    %106 = arith.truncf %105 : vector<16x96xf32> to vector<16x96xbf16>
    %c192 = arith.constant 192 : index
    %c0_95 = arith.constant 0 : index
    %107 = vector.load %arg2[%c192, %c0_95] : memref<2352x128xbf16, #tpu.memory_space<vmem>>, vector<96x32xbf16>
    %cst_96 = arith.constant dense<0.000000e+00> : vector<16x32xf32>
    %108 = tpu.matmul %106, %107, %cst_96 {dimension_numbers = #tpu.dot_dimension_numbers<[1], [0], [0], [1], [0, 0, 1, 1], [], []>} : vector<16x96xbf16>, vector<96x32xbf16>, vector<16x32xf32> -> vector<16x32xf32>
    %c6_97 = arith.constant 6 : index
    %c0_98 = arith.constant 0 : index
    %109 = vector.load %arg3[%c6_97, %c0_98] : memref<23x128xf32, #tpu.memory_space<vmem>>, vector<1x32xf32>
    %110 = vector.broadcast %109 : vector<1x32xf32> to vector<16x32xf32>
    %111 = arith.addf %108, %110 : vector<16x32xf32>
    %cst_99 = arith.constant 0.000000e+00 : f32
    %112 = vector.broadcast %cst_99 : f32 to vector<16x32xf32>
    %113 = arith.cmpf oge, %111, %112 : vector<16x32xf32>
    %cst_100 = arith.constant 1.000000e-01 : f32
    %114 = vector.broadcast %cst_100 : f32 to vector<16x32xf32>
    %115 = arith.mulf %114, %111 : vector<16x32xf32>
    %116 = arith.select %113, %111, %115 : vector<16x32xi1>, vector<16x32xf32>
    %c9_101 = arith.constant 9 : index
    %c0_102 = arith.constant 0 : index
    %117 = vector.load %arg5[%c9_101, %c0_102] : memref<80x256xf32, #tpu.memory_space<vmem>>, vector<16x32xf32>
    tpu.vector_store %arg5[%c9_101, %c0_102], %116 {strides = array<i32>} : memref<80x256xf32, #tpu.memory_space<vmem>>, vector<16x32xf32>,
    %cst_103 = arith.constant 0.000000e+00 : f32
    %118 = vector.broadcast %cst_103 : f32 to vector<1x32xf32>
    %c8_104 = arith.constant 8 : index
    %c0_105 = arith.constant 0 : index
    %119 = vector.load %arg5[%c8_104, %c0_105] : memref<80x256xf32, #tpu.memory_space<vmem>>, vector<1x32xf32>
    tpu.vector_store %arg5[%c8_104, %c0_105], %118 {strides = array<i32>} : memref<80x256xf32, #tpu.memory_space<vmem>>, vector<1x32xf32>,
    %c8_106 = arith.constant 8 : index
    %c32_107 = arith.constant 32 : index
    %120 = vector.load %arg5[%c8_106, %c32_107] : memref<80x256xf32, #tpu.memory_space<vmem>>, vector<16x32xf32>
    tpu.vector_store %arg5[%c8_106, %c32_107], %116 {strides = array<i32>} : memref<80x256xf32, #tpu.memory_space<vmem>>, vector<16x32xf32>,
    %c7_108 = arith.constant 7 : index
    %c64_109 = arith.constant 64 : index
    %121 = vector.load %arg5[%c7_108, %c64_109] : memref<80x256xf32, #tpu.memory_space<vmem>>, vector<16x32xf32>
    tpu.vector_store %arg5[%c7_108, %c64_109], %116 {strides = array<i32>} : memref<80x256xf32, #tpu.memory_space<vmem>>, vector<16x32xf32>,
    %cst_110 = arith.constant 0.000000e+00 : f32
    %122 = vector.broadcast %cst_110 : f32 to vector<1x32xf32>
    %c23_111 = arith.constant 23 : index
    %c64_112 = arith.constant 64 : index
    %123 = vector.load %arg5[%c23_111, %c64_112] : memref<80x256xf32, #tpu.memory_space<vmem>>, vector<1x32xf32>
    tpu.vector_store %arg5[%c23_111, %c64_112], %122 {strides = array<i32>} : memref<80x256xf32, #tpu.memory_space<vmem>>, vector<1x32xf32>,
    %c8_113 = arith.constant 8 : index
    %c0_114 = arith.constant 0 : index
    %124 = vector.load %arg5[%c8_113, %c0_114] : memref<80x256xf32, #tpu.memory_space<vmem>>, vector<16x96xf32>
    %125 = arith.truncf %124 : vector<16x96xf32> to vector<16x96xbf16>
    %c288 = arith.constant 288 : index
    %c0_115 = arith.constant 0 : index
    %126 = vector.load %arg2[%c288, %c0_115] : memref<2352x128xbf16, #tpu.memory_space<vmem>>, vector<96x64xbf16>
    %cst_116 = arith.constant dense<0.000000e+00> : vector<16x64xf32>
    %127 = tpu.matmul %125, %126, %cst_116 {dimension_numbers = #tpu.dot_dimension_numbers<[1], [0], [0], [1], [0, 0, 1, 1], [], []>} : vector<16x96xbf16>, vector<96x64xbf16>, vector<16x64xf32> -> vector<16x64xf32>
    %c7_117 = arith.constant 7 : index
    %c0_118 = arith.constant 0 : index
    %128 = vector.load %arg3[%c7_117, %c0_118] : memref<23x128xf32, #tpu.memory_space<vmem>>, vector<1x64xf32>
    %129 = vector.broadcast %128 : vector<1x64xf32> to vector<16x64xf32>
    %130 = arith.addf %127, %129 : vector<16x64xf32>
    %131 = arith.truncf %92 : vector<16x32xf32> to vector<16x32xbf16>
    %c384 = arith.constant 384 : index
    %c0_119 = arith.constant 0 : index
    %132 = vector.load %arg2[%c384, %c0_119] : memref<2352x128xbf16, #tpu.memory_space<vmem>>, vector<32x64xbf16>
    %cst_120 = arith.constant dense<0.000000e+00> : vector<16x64xf32>
    %133 = tpu.matmul %131, %132, %cst_120 {dimension_numbers = #tpu.dot_dimension_numbers<[1], [0], [0], [1], [0, 0, 1, 1], [], []>} : vector<16x32xbf16>, vector<32x64xbf16>, vector<16x64xf32> -> vector<16x64xf32>
    %c8_121 = arith.constant 8 : index
    %c0_122 = arith.constant 0 : index
    %134 = vector.load %arg3[%c8_121, %c0_122] : memref<23x128xf32, #tpu.memory_space<vmem>>, vector<1x64xf32>
    %135 = vector.broadcast %134 : vector<1x64xf32> to vector<16x64xf32>
    %136 = arith.addf %133, %135 : vector<16x64xf32>
    %137 = arith.addf %130, %136 : vector<16x64xf32>
    %c2320 = arith.constant 2320 : index
    %c0_123 = arith.constant 0 : index
    %138 = vector.load %arg2[%c2320, %c0_123] : memref<2352x128xbf16, #tpu.memory_space<vmem>>, vector<8x16xbf16>
    %139 = arith.truncf %137 : vector<16x64xf32> to vector<16x64xbf16>
    %cst_124 = arith.constant dense<0.000000e+00> : vector<8x64xf32>
    %140 = tpu.matmul %138, %139, %cst_124 {dimension_numbers = #tpu.dot_dimension_numbers<[1], [0], [0], [1], [0, 0, 1, 1], [], []>} : vector<8x16xbf16>, vector<16x64xbf16>, vector<8x64xf32> -> vector<8x64xf32>
    %141 = arith.truncf %140 : vector<8x64xf32> to vector<8x64xbf16>
    %c416 = arith.constant 416 : index
    %c0_125 = arith.constant 0 : index
    %142 = vector.load %arg2[%c416, %c0_125] : memref<2352x128xbf16, #tpu.memory_space<vmem>>, vector<64x16xbf16>
    %cst_126 = arith.constant dense<0.000000e+00> : vector<8x16xf32>
    %143 = tpu.matmul %141, %142, %cst_126 {dimension_numbers = #tpu.dot_dimension_numbers<[1], [0], [0], [1], [0, 0, 1, 1], [], []>} : vector<8x64xbf16>, vector<64x16xbf16>, vector<8x16xf32> -> vector<8x16xf32>
    %c9_127 = arith.constant 9 : index
    %c0_128 = arith.constant 0 : index
    %144 = vector.load %arg3[%c9_127, %c0_128] : memref<23x128xf32, #tpu.memory_space<vmem>>, vector<1x16xf32>
    %145 = vector.broadcast %144 : vector<1x16xf32> to vector<8x16xf32>
    %146 = arith.addf %143, %145 : vector<8x16xf32>
    %147 = arith.truncf %146 : vector<8x16xf32> to vector<8x16xbf16>
    %cst_129 = arith.constant dense<0.000000e+00> : vector<8x8xf32>
    %148 = tpu.matmul %147, %147, %cst_129 {dimension_numbers = #tpu.dot_dimension_numbers<[1], [1], [0], [0], [0, 0, 1, 0], [], []>} : vector<8x16xbf16>, vector<8x16xbf16>, vector<8x8xf32> -> vector<8x8xf32>
    %cst_130 = arith.constant dense<0xFF800000> : vector<8xf32>
    %149 = vector.multi_reduction <maximumf>, %148, %cst_130 [1] : vector<8x8xf32> to vector<8xf32>
    %150 = vector.shape_cast %149 : vector<8xf32> to vector<8x1xf32>
    %151 = vector.broadcast %150 : vector<8x1xf32> to vector<8x8xf32>
    %152 = arith.subf %148, %151 : vector<8x8xf32>
    %153 = math.exp %152 : vector<8x8xf32>
    %cst_131 = arith.constant dense<0.000000e+00> : vector<8xf32>
    %154 = vector.multi_reduction <add>, %153, %cst_131 [1] : vector<8x8xf32> to vector<8xf32>
    %155 = vector.shape_cast %154 : vector<8xf32> to vector<8x1xf32>
    %156 = vector.broadcast %155 : vector<8x1xf32> to vector<8x8xf32>
    %157 = arith.divf %153, %156 : vector<8x8xf32>
    %158 = arith.truncf %157 : vector<8x8xf32> to vector<8x8xbf16>
    %159 = arith.truncf %140 : vector<8x64xf32> to vector<8x64xbf16>
    %cst_132 = arith.constant dense<0.000000e+00> : vector<8x64xf32>
    %160 = tpu.matmul %158, %159, %cst_132 {dimension_numbers = #tpu.dot_dimension_numbers<[1], [0], [0], [1], [0, 0, 1, 1], [], []>} : vector<8x8xbf16>, vector<8x64xbf16>, vector<8x64xf32> -> vector<8x64xf32>
    %c22 = arith.constant 22 : index
    %c0_133 = arith.constant 0 : index
    %161 = vector.load %arg3[%c22, %c0_133] : memref<23x128xf32, #tpu.memory_space<vmem>>, vector<1x1xf32>
    %162 = vector.broadcast %161 : vector<1x1xf32> to vector<8x64xf32>
    %163 = arith.mulf %162, %160 : vector<8x64xf32>
    %164 = arith.addf %163, %140 : vector<8x64xf32>
    %cst_134 = arith.constant 0.000000e+00 : f32
    %165 = vector.broadcast %cst_134 : f32 to vector<8x64xf32>
    %166 = arith.cmpf oge, %164, %165 : vector<8x64xf32>
    %cst_135 = arith.constant 1.000000e-01 : f32
    %167 = vector.broadcast %cst_135 : f32 to vector<8x64xf32>
    %168 = arith.mulf %167, %164 : vector<8x64xf32>
    %169 = arith.select %166, %164, %168 : vector<8x64xi1>, vector<8x64xf32>
    %c9_136 = arith.constant 9 : index
    %c0_137 = arith.constant 0 : index
    %170 = vector.load %arg5[%c9_136, %c0_137] : memref<80x256xf32, #tpu.memory_space<vmem>>, vector<8x64xf32>
    tpu.vector_store %arg5[%c9_136, %c0_137], %169 {strides = array<i32>} : memref<80x256xf32, #tpu.memory_space<vmem>>, vector<8x64xf32>,
    %cst_138 = arith.constant 0.000000e+00 : f32
    %171 = vector.broadcast %cst_138 : f32 to vector<1x64xf32>
    %c8_139 = arith.constant 8 : index
    %c0_140 = arith.constant 0 : index
    %172 = vector.load %arg5[%c8_139, %c0_140] : memref<80x256xf32, #tpu.memory_space<vmem>>, vector<1x64xf32>
    tpu.vector_store %arg5[%c8_139, %c0_140], %171 {strides = array<i32>} : memref<80x256xf32, #tpu.memory_space<vmem>>, vector<1x64xf32>,
    %c8_141 = arith.constant 8 : index
    %c64_142 = arith.constant 64 : index
    %173 = vector.load %arg5[%c8_141, %c64_142] : memref<80x256xf32, #tpu.memory_space<vmem>>, vector<8x64xf32>
    tpu.vector_store %arg5[%c8_141, %c64_142], %169 {strides = array<i32>} : memref<80x256xf32, #tpu.memory_space<vmem>>, vector<8x64xf32>,
    %c7_143 = arith.constant 7 : index
    %c128_144 = arith.constant 128 : index
    %174 = vector.load %arg5[%c7_143, %c128_144] : memref<80x256xf32, #tpu.memory_space<vmem>>, vector<8x64xf32>
    tpu.vector_store %arg5[%c7_143, %c128_144], %169 {strides = array<i32>} : memref<80x256xf32, #tpu.memory_space<vmem>>, vector<8x64xf32>,
    %cst_145 = arith.constant 0.000000e+00 : f32
    %175 = vector.broadcast %cst_145 : f32 to vector<1x64xf32>
    %c15 = arith.constant 15 : index
    %c128_146 = arith.constant 128 : index
    %176 = vector.load %arg5[%c15, %c128_146] : memref<80x256xf32, #tpu.memory_space<vmem>>, vector<1x64xf32>
    tpu.vector_store %arg5[%c15, %c128_146], %175 {strides = array<i32>} : memref<80x256xf32, #tpu.memory_space<vmem>>, vector<1x64xf32>,
    %c8_147 = arith.constant 8 : index
    %c0_148 = arith.constant 0 : index
    %177 = vector.load %arg5[%c8_147, %c0_148] : memref<80x256xf32, #tpu.memory_space<vmem>>, vector<8x192xf32>
    %178 = arith.truncf %177 : vector<8x192xf32> to vector<8x192xbf16>
    %c480 = arith.constant 480 : index
    %c0_149 = arith.constant 0 : index
    %179 = vector.load %arg2[%c480, %c0_149] : memref<2352x128xbf16, #tpu.memory_space<vmem>>, vector<192x64xbf16>
    %cst_150 = arith.constant dense<0.000000e+00> : vector<8x64xf32>
    %180 = tpu.matmul %178, %179, %cst_150 {dimension_numbers = #tpu.dot_dimension_numbers<[1], [0], [0], [1], [0, 0, 1, 1], [], []>} : vector<8x192xbf16>, vector<192x64xbf16>, vector<8x64xf32> -> vector<8x64xf32>
    %c10 = arith.constant 10 : index
    %c0_151 = arith.constant 0 : index
    %181 = vector.load %arg3[%c10, %c0_151] : memref<23x128xf32, #tpu.memory_space<vmem>>, vector<1x64xf32>
    %182 = vector.broadcast %181 : vector<1x64xf32> to vector<8x64xf32>
    %183 = arith.addf %180, %182 : vector<8x64xf32>
    %cst_152 = arith.constant 0.000000e+00 : f32
    %184 = vector.broadcast %cst_152 : f32 to vector<8x64xf32>
    %185 = arith.cmpf oge, %183, %184 : vector<8x64xf32>
    %cst_153 = arith.constant 1.000000e-01 : f32
    %186 = vector.broadcast %cst_153 : f32 to vector<8x64xf32>
    %187 = arith.mulf %186, %183 : vector<8x64xf32>
    %188 = arith.select %185, %183, %187 : vector<8x64xi1>, vector<8x64xf32>
    %c9_154 = arith.constant 9 : index
    %c0_155 = arith.constant 0 : index
    %189 = vector.load %arg5[%c9_154, %c0_155] : memref<80x256xf32, #tpu.memory_space<vmem>>, vector<8x64xf32>
    tpu.vector_store %arg5[%c9_154, %c0_155], %188 {strides = array<i32>} : memref<80x256xf32, #tpu.memory_space<vmem>>, vector<8x64xf32>,
    %cst_156 = arith.constant 0.000000e+00 : f32
    %190 = vector.broadcast %cst_156 : f32 to vector<1x64xf32>
    %c8_157 = arith.constant 8 : index
    %c0_158 = arith.constant 0 : index
    %191 = vector.load %arg5[%c8_157, %c0_158] : memref<80x256xf32, #tpu.memory_space<vmem>>, vector<1x64xf32>
    tpu.vector_store %arg5[%c8_157, %c0_158], %190 {strides = array<i32>} : memref<80x256xf32, #tpu.memory_space<vmem>>, vector<1x64xf32>,
    %c8_159 = arith.constant 8 : index
    %c64_160 = arith.constant 64 : index
    %192 = vector.load %arg5[%c8_159, %c64_160] : memref<80x256xf32, #tpu.memory_space<vmem>>, vector<8x64xf32>
    tpu.vector_store %arg5[%c8_159, %c64_160], %188 {strides = array<i32>} : memref<80x256xf32, #tpu.memory_space<vmem>>, vector<8x64xf32>,
    %c7_161 = arith.constant 7 : index
    %c128_162 = arith.constant 128 : index
    %193 = vector.load %arg5[%c7_161, %c128_162] : memref<80x256xf32, #tpu.memory_space<vmem>>, vector<8x64xf32>
    tpu.vector_store %arg5[%c7_161, %c128_162], %188 {strides = array<i32>} : memref<80x256xf32, #tpu.memory_space<vmem>>, vector<8x64xf32>,
    %cst_163 = arith.constant 0.000000e+00 : f32
    %194 = vector.broadcast %cst_163 : f32 to vector<1x64xf32>
    %c15_164 = arith.constant 15 : index
    %c128_165 = arith.constant 128 : index
    %195 = vector.load %arg5[%c15_164, %c128_165] : memref<80x256xf32, #tpu.memory_space<vmem>>, vector<1x64xf32>
    tpu.vector_store %arg5[%c15_164, %c128_165], %194 {strides = array<i32>} : memref<80x256xf32, #tpu.memory_space<vmem>>, vector<1x64xf32>,
    %c8_166 = arith.constant 8 : index
    %c0_167 = arith.constant 0 : index
    %196 = vector.load %arg5[%c8_166, %c0_167] : memref<80x256xf32, #tpu.memory_space<vmem>>, vector<8x192xf32>
    %197 = arith.truncf %196 : vector<8x192xf32> to vector<8x192xbf16>
    %c672 = arith.constant 672 : index
    %c0_168 = arith.constant 0 : index
    %198 = vector.load %arg2[%c672, %c0_168] : memref<2352x128xbf16, #tpu.memory_space<vmem>>, vector<192x64xbf16>
    %cst_169 = arith.constant dense<0.000000e+00> : vector<8x64xf32>
    %199 = tpu.matmul %197, %198, %cst_169 {dimension_numbers = #tpu.dot_dimension_numbers<[1], [0], [0], [1], [0, 0, 1, 1], [], []>} : vector<8x192xbf16>, vector<192x64xbf16>, vector<8x64xf32> -> vector<8x64xf32>
    %c11 = arith.constant 11 : index
    %c0_170 = arith.constant 0 : index
    %200 = vector.load %arg3[%c11, %c0_170] : memref<23x128xf32, #tpu.memory_space<vmem>>, vector<1x64xf32>
    %201 = vector.broadcast %200 : vector<1x64xf32> to vector<8x64xf32>
    %202 = arith.addf %199, %201 : vector<8x64xf32>
    %203 = arith.truncf %164 : vector<8x64xf32> to vector<8x64xbf16>
    %c864 = arith.constant 864 : index
    %c0_171 = arith.constant 0 : index
    %204 = vector.load %arg2[%c864, %c0_171] : memref<2352x128xbf16, #tpu.memory_space<vmem>>, vector<64x64xbf16>
    %cst_172 = arith.constant dense<0.000000e+00> : vector<8x64xf32>
    %205 = tpu.matmul %203, %204, %cst_172 {dimension_numbers = #tpu.dot_dimension_numbers<[1], [0], [0], [1], [0, 0, 1, 1], [], []>} : vector<8x64xbf16>, vector<64x64xbf16>, vector<8x64xf32> -> vector<8x64xf32>
    %c12 = arith.constant 12 : index
    %c0_173 = arith.constant 0 : index
    %206 = vector.load %arg3[%c12, %c0_173] : memref<23x128xf32, #tpu.memory_space<vmem>>, vector<1x64xf32>
    %207 = vector.broadcast %206 : vector<1x64xf32> to vector<8x64xf32>
    %208 = arith.addf %205, %207 : vector<8x64xf32>
    %209 = arith.addf %202, %208 : vector<8x64xf32>
    %c2336 = arith.constant 2336 : index
    %c0_174 = arith.constant 0 : index
    %210 = vector.load %arg2[%c2336, %c0_174] : memref<2352x128xbf16, #tpu.memory_space<vmem>>, vector<4x8xbf16>
    %211 = arith.truncf %209 : vector<8x64xf32> to vector<8x64xbf16>
    %cst_175 = arith.constant dense<0.000000e+00> : vector<4x64xf32>
    %212 = tpu.matmul %210, %211, %cst_175 {dimension_numbers = #tpu.dot_dimension_numbers<[1], [0], [0], [1], [0, 0, 1, 1], [], []>} : vector<4x8xbf16>, vector<8x64xbf16>, vector<4x64xf32> -> vector<4x64xf32>
    %cst_176 = arith.constant 0.000000e+00 : f32
    %213 = vector.broadcast %cst_176 : f32 to vector<4x64xf32>
    %214 = arith.cmpf oge, %212, %213 : vector<4x64xf32>
    %cst_177 = arith.constant 1.000000e-01 : f32
    %215 = vector.broadcast %cst_177 : f32 to vector<4x64xf32>
    %216 = arith.mulf %215, %212 : vector<4x64xf32>
    %217 = arith.select %214, %212, %216 : vector<4x64xi1>, vector<4x64xf32>
    %c9_178 = arith.constant 9 : index
    %c0_179 = arith.constant 0 : index
    %218 = vector.load %arg5[%c9_178, %c0_179] : memref<80x256xf32, #tpu.memory_space<vmem>>, vector<4x64xf32>
    tpu.vector_store %arg5[%c9_178, %c0_179], %217 {strides = array<i32>} : memref<80x256xf32, #tpu.memory_space<vmem>>, vector<4x64xf32>,
    %cst_180 = arith.constant 0.000000e+00 : f32
    %219 = vector.broadcast %cst_180 : f32 to vector<1x64xf32>
    %c8_181 = arith.constant 8 : index
    %c0_182 = arith.constant 0 : index
    %220 = vector.load %arg5[%c8_181, %c0_182] : memref<80x256xf32, #tpu.memory_space<vmem>>, vector<1x64xf32>
    tpu.vector_store %arg5[%c8_181, %c0_182], %219 {strides = array<i32>} : memref<80x256xf32, #tpu.memory_space<vmem>>, vector<1x64xf32>,
    %c8_183 = arith.constant 8 : index
    %c64_184 = arith.constant 64 : index
    %221 = vector.load %arg5[%c8_183, %c64_184] : memref<80x256xf32, #tpu.memory_space<vmem>>, vector<4x64xf32>
    tpu.vector_store %arg5[%c8_183, %c64_184], %217 {strides = array<i32>} : memref<80x256xf32, #tpu.memory_space<vmem>>, vector<4x64xf32>,
    %c7_185 = arith.constant 7 : index
    %c128_186 = arith.constant 128 : index
    %222 = vector.load %arg5[%c7_185, %c128_186] : memref<80x256xf32, #tpu.memory_space<vmem>>, vector<4x64xf32>
    tpu.vector_store %arg5[%c7_185, %c128_186], %217 {strides = array<i32>} : memref<80x256xf32, #tpu.memory_space<vmem>>, vector<4x64xf32>,
    %cst_187 = arith.constant 0.000000e+00 : f32
    %223 = vector.broadcast %cst_187 : f32 to vector<1x64xf32>
    %c11_188 = arith.constant 11 : index
    %c128_189 = arith.constant 128 : index
    %224 = vector.load %arg5[%c11_188, %c128_189] : memref<80x256xf32, #tpu.memory_space<vmem>>, vector<1x64xf32>
    tpu.vector_store %arg5[%c11_188, %c128_189], %223 {strides = array<i32>} : memref<80x256xf32, #tpu.memory_space<vmem>>, vector<1x64xf32>,
    %c8_190 = arith.constant 8 : index
    %c0_191 = arith.constant 0 : index
    %225 = vector.load %arg5[%c8_190, %c0_191] : memref<80x256xf32, #tpu.memory_space<vmem>>, vector<4x192xf32>
    %226 = arith.truncf %225 : vector<4x192xf32> to vector<4x192xbf16>
    %c928 = arith.constant 928 : index
    %c0_192 = arith.constant 0 : index
    %227 = vector.load %arg2[%c928, %c0_192] : memref<2352x128xbf16, #tpu.memory_space<vmem>>, vector<192x64xbf16>
    %cst_193 = arith.constant dense<0.000000e+00> : vector<4x64xf32>
    %228 = tpu.matmul %226, %227, %cst_193 {dimension_numbers = #tpu.dot_dimension_numbers<[1], [0], [0], [1], [0, 0, 1, 1], [], []>} : vector<4x192xbf16>, vector<192x64xbf16>, vector<4x64xf32> -> vector<4x64xf32>
    %c13 = arith.constant 13 : index
    %c0_194 = arith.constant 0 : index
    %229 = vector.load %arg3[%c13, %c0_194] : memref<23x128xf32, #tpu.memory_space<vmem>>, vector<1x64xf32>
    %230 = vector.broadcast %229 : vector<1x64xf32> to vector<4x64xf32>
    %231 = arith.addf %228, %230 : vector<4x64xf32>
    %cst_195 = arith.constant 0.000000e+00 : f32
    %232 = vector.broadcast %cst_195 : f32 to vector<4x64xf32>
    %233 = arith.cmpf oge, %231, %232 : vector<4x64xf32>
    %cst_196 = arith.constant 1.000000e-01 : f32
    %234 = vector.broadcast %cst_196 : f32 to vector<4x64xf32>
    %235 = arith.mulf %234, %231 : vector<4x64xf32>
    %236 = arith.select %233, %231, %235 : vector<4x64xi1>, vector<4x64xf32>
    %c9_197 = arith.constant 9 : index
    %c0_198 = arith.constant 0 : index
    %237 = vector.load %arg5[%c9_197, %c0_198] : memref<80x256xf32, #tpu.memory_space<vmem>>, vector<4x64xf32>
    tpu.vector_store %arg5[%c9_197, %c0_198], %236 {strides = array<i32>} : memref<80x256xf32, #tpu.memory_space<vmem>>, vector<4x64xf32>,
    %cst_199 = arith.constant 0.000000e+00 : f32
    %238 = vector.broadcast %cst_199 : f32 to vector<1x64xf32>
    %c8_200 = arith.constant 8 : index
    %c0_201 = arith.constant 0 : index
    %239 = vector.load %arg5[%c8_200, %c0_201] : memref<80x256xf32, #tpu.memory_space<vmem>>, vector<1x64xf32>
    tpu.vector_store %arg5[%c8_200, %c0_201], %238 {strides = array<i32>} : memref<80x256xf32, #tpu.memory_space<vmem>>, vector<1x64xf32>,
    %c8_202 = arith.constant 8 : index
    %c64_203 = arith.constant 64 : index
    %240 = vector.load %arg5[%c8_202, %c64_203] : memref<80x256xf32, #tpu.memory_space<vmem>>, vector<4x64xf32>
    tpu.vector_store %arg5[%c8_202, %c64_203], %236 {strides = array<i32>} : memref<80x256xf32, #tpu.memory_space<vmem>>, vector<4x64xf32>,
    %c7_204 = arith.constant 7 : index
    %c128_205 = arith.constant 128 : index
    %241 = vector.load %arg5[%c7_204, %c128_205] : memref<80x256xf32, #tpu.memory_space<vmem>>, vector<4x64xf32>
    tpu.vector_store %arg5[%c7_204, %c128_205], %236 {strides = array<i32>} : memref<80x256xf32, #tpu.memory_space<vmem>>, vector<4x64xf32>,
    %cst_206 = arith.constant 0.000000e+00 : f32
    %242 = vector.broadcast %cst_206 : f32 to vector<1x64xf32>
    %c11_207 = arith.constant 11 : index
    %c128_208 = arith.constant 128 : index
    %243 = vector.load %arg5[%c11_207, %c128_208] : memref<80x256xf32, #tpu.memory_space<vmem>>, vector<1x64xf32>
    tpu.vector_store %arg5[%c11_207, %c128_208], %242 {strides = array<i32>} : memref<80x256xf32, #tpu.memory_space<vmem>>, vector<1x64xf32>,
    %c8_209 = arith.constant 8 : index
    %c0_210 = arith.constant 0 : index
    %244 = vector.load %arg5[%c8_209, %c0_210] : memref<80x256xf32, #tpu.memory_space<vmem>>, vector<4x192xf32>
    %245 = arith.truncf %244 : vector<4x192xf32> to vector<4x192xbf16>
    %c1120 = arith.constant 1120 : index
    %c0_211 = arith.constant 0 : index
    %246 = vector.load %arg2[%c1120, %c0_211] : memref<2352x128xbf16, #tpu.memory_space<vmem>>, vector<192x64xbf16>
    %cst_212 = arith.constant dense<0.000000e+00> : vector<4x64xf32>
    %247 = tpu.matmul %245, %246, %cst_212 {dimension_numbers = #tpu.dot_dimension_numbers<[1], [0], [0], [1], [0, 0, 1, 1], [], []>} : vector<4x192xbf16>, vector<192x64xbf16>, vector<4x64xf32> -> vector<4x64xf32>
    %c14 = arith.constant 14 : index
    %c0_213 = arith.constant 0 : index
    %248 = vector.load %arg3[%c14, %c0_213] : memref<23x128xf32, #tpu.memory_space<vmem>>, vector<1x64xf32>
    %249 = vector.broadcast %248 : vector<1x64xf32> to vector<4x64xf32>
    %250 = arith.addf %247, %249 : vector<4x64xf32>
    %251 = arith.truncf %212 : vector<4x64xf32> to vector<4x64xbf16>
    %c1312 = arith.constant 1312 : index
    %c0_214 = arith.constant 0 : index
    %252 = vector.load %arg2[%c1312, %c0_214] : memref<2352x128xbf16, #tpu.memory_space<vmem>>, vector<64x64xbf16>
    %cst_215 = arith.constant dense<0.000000e+00> : vector<4x64xf32>
    %253 = tpu.matmul %251, %252, %cst_215 {dimension_numbers = #tpu.dot_dimension_numbers<[1], [0], [0], [1], [0, 0, 1, 1], [], []>} : vector<4x64xbf16>, vector<64x64xbf16>, vector<4x64xf32> -> vector<4x64xf32>
    %c15_216 = arith.constant 15 : index
    %c0_217 = arith.constant 0 : index
    %254 = vector.load %arg3[%c15_216, %c0_217] : memref<23x128xf32, #tpu.memory_space<vmem>>, vector<1x64xf32>
    %255 = vector.broadcast %254 : vector<1x64xf32> to vector<4x64xf32>
    %256 = arith.addf %253, %255 : vector<4x64xf32>
    %257 = arith.addf %250, %256 : vector<4x64xf32>
    %cst_218 = arith.constant 0.000000e+00 : f32
    %258 = vector.broadcast %cst_218 : f32 to vector<4x64xf32>
    %259 = arith.cmpf oge, %257, %258 : vector<4x64xf32>
    %cst_219 = arith.constant 1.000000e-01 : f32
    %260 = vector.broadcast %cst_219 : f32 to vector<4x64xf32>
    %261 = arith.mulf %260, %257 : vector<4x64xf32>
    %262 = arith.select %259, %257, %261 : vector<4x64xi1>, vector<4x64xf32>
    %c8_220 = arith.constant 8 : index
    %c0_221 = arith.constant 0 : index
    %263 = vector.load %arg5[%c8_220, %c0_221] : memref<80x256xf32, #tpu.memory_space<vmem>>, vector<4x64xf32>
    tpu.vector_store %arg5[%c8_220, %c0_221], %262 {strides = array<i32>} : memref<80x256xf32, #tpu.memory_space<vmem>>, vector<4x64xf32>,
    %c7_222 = arith.constant 7 : index
    %c64_223 = arith.constant 64 : index
    %264 = vector.load %arg5[%c7_222, %c64_223] : memref<80x256xf32, #tpu.memory_space<vmem>>, vector<4x64xf32>
    tpu.vector_store %arg5[%c7_222, %c64_223], %262 {strides = array<i32>} : memref<80x256xf32, #tpu.memory_space<vmem>>, vector<4x64xf32>,
    %c6_224 = arith.constant 6 : index
    %c128_225 = arith.constant 128 : index
    %265 = vector.load %arg5[%c6_224, %c128_225] : memref<80x256xf32, #tpu.memory_space<vmem>>, vector<4x64xf32>
    tpu.vector_store %arg5[%c6_224, %c128_225], %262 {strides = array<i32>} : memref<80x256xf32, #tpu.memory_space<vmem>>, vector<4x64xf32>,
    %c8_226 = arith.constant 8 : index
    %c0_227 = arith.constant 0 : index
    %266 = vector.load %arg5[%c8_226, %c0_227] : memref<80x256xf32, #tpu.memory_space<vmem>>, vector<2x192xf32>
    %267 = arith.truncf %266 : vector<2x192xf32> to vector<2x192xbf16>
    %c1824 = arith.constant 1824 : index
    %c0_228 = arith.constant 0 : index
    %268 = vector.load %arg2[%c1824, %c0_228] : memref<2352x128xbf16, #tpu.memory_space<vmem>>, vector<192x1xbf16>
    %cst_229 = arith.constant dense<0.000000e+00> : vector<2x1xf32>
    %269 = tpu.matmul %267, %268, %cst_229 {dimension_numbers = #tpu.dot_dimension_numbers<[1], [0], [0], [1], [0, 0, 1, 1], [], []>} : vector<2x192xbf16>, vector<192x1xbf16>, vector<2x1xf32> -> vector<2x1xf32>
    %c19 = arith.constant 19 : index
    %c0_230 = arith.constant 0 : index
    %270 = vector.load %arg3[%c19, %c0_230] : memref<23x128xf32, #tpu.memory_space<vmem>>, vector<1x1xf32>
    %271 = vector.broadcast %270 : vector<1x1xf32> to vector<2x1xf32>
    %272 = arith.addf %269, %271 : vector<2x1xf32>
    %cst_231 = arith.constant 0.000000e+00 : f32
    %273 = vector.broadcast %cst_231 : f32 to vector<4x64xf32>
    %274 = arith.cmpf oge, %212, %273 : vector<4x64xf32>
    %cst_232 = arith.constant 1.000000e-01 : f32
    %275 = vector.broadcast %cst_232 : f32 to vector<4x64xf32>
    %276 = arith.mulf %275, %212 : vector<4x64xf32>
    %277 = arith.select %274, %212, %276 : vector<4x64xi1>, vector<4x64xf32>
    %c9_233 = arith.constant 9 : index
    %c0_234 = arith.constant 0 : index
    %278 = vector.load %arg5[%c9_233, %c0_234] : memref<80x256xf32, #tpu.memory_space<vmem>>, vector<4x64xf32>
    tpu.vector_store %arg5[%c9_233, %c0_234], %277 {strides = array<i32>} : memref<80x256xf32, #tpu.memory_space<vmem>>, vector<4x64xf32>,
    %cst_235 = arith.constant 0.000000e+00 : f32
    %279 = vector.broadcast %cst_235 : f32 to vector<1x64xf32>
    %c8_236 = arith.constant 8 : index
    %c0_237 = arith.constant 0 : index
    %280 = vector.load %arg5[%c8_236, %c0_237] : memref<80x256xf32, #tpu.memory_space<vmem>>, vector<1x64xf32>
    tpu.vector_store %arg5[%c8_236, %c0_237], %279 {strides = array<i32>} : memref<80x256xf32, #tpu.memory_space<vmem>>, vector<1x64xf32>,
    %c8_238 = arith.constant 8 : index
    %c64_239 = arith.constant 64 : index
    %281 = vector.load %arg5[%c8_238, %c64_239] : memref<80x256xf32, #tpu.memory_space<vmem>>, vector<4x64xf32>
    tpu.vector_store %arg5[%c8_238, %c64_239], %277 {strides = array<i32>} : memref<80x256xf32, #tpu.memory_space<vmem>>, vector<4x64xf32>,
    %c7_240 = arith.constant 7 : index
    %c128_241 = arith.constant 128 : index
    %282 = vector.load %arg5[%c7_240, %c128_241] : memref<80x256xf32, #tpu.memory_space<vmem>>, vector<4x64xf32>
    tpu.vector_store %arg5[%c7_240, %c128_241], %277 {strides = array<i32>} : memref<80x256xf32, #tpu.memory_space<vmem>>, vector<4x64xf32>,
    %cst_242 = arith.constant 0.000000e+00 : f32
    %283 = vector.broadcast %cst_242 : f32 to vector<1x64xf32>
    %c11_243 = arith.constant 11 : index
    %c128_244 = arith.constant 128 : index
    %284 = vector.load %arg5[%c11_243, %c128_244] : memref<80x256xf32, #tpu.memory_space<vmem>>, vector<1x64xf32>
    tpu.vector_store %arg5[%c11_243, %c128_244], %283 {strides = array<i32>} : memref<80x256xf32, #tpu.memory_space<vmem>>, vector<1x64xf32>,
    %c8_245 = arith.constant 8 : index
    %c0_246 = arith.constant 0 : index
    %285 = vector.load %arg5[%c8_245, %c0_246] : memref<80x256xf32, #tpu.memory_space<vmem>>, vector<4x192xf32>
    %286 = arith.truncf %285 : vector<4x192xf32> to vector<4x192xbf16>
    %c1376 = arith.constant 1376 : index
    %c0_247 = arith.constant 0 : index
    %287 = vector.load %arg2[%c1376, %c0_247] : memref<2352x128xbf16, #tpu.memory_space<vmem>>, vector<192x64xbf16>
    %cst_248 = arith.constant dense<0.000000e+00> : vector<4x64xf32>
    %288 = tpu.matmul %286, %287, %cst_248 {dimension_numbers = #tpu.dot_dimension_numbers<[1], [0], [0], [1], [0, 0, 1, 1], [], []>} : vector<4x192xbf16>, vector<192x64xbf16>, vector<4x64xf32> -> vector<4x64xf32>
    %c16_249 = arith.constant 16 : index
    %c0_250 = arith.constant 0 : index
    %289 = vector.load %arg3[%c16_249, %c0_250] : memref<23x128xf32, #tpu.memory_space<vmem>>, vector<1x64xf32>
    %290 = vector.broadcast %289 : vector<1x64xf32> to vector<4x64xf32>
    %291 = arith.addf %288, %290 : vector<4x64xf32>
    %cst_251 = arith.constant 0.000000e+00 : f32
    %292 = vector.broadcast %cst_251 : f32 to vector<4x64xf32>
    %293 = arith.cmpf oge, %291, %292 : vector<4x64xf32>
    %cst_252 = arith.constant 1.000000e-01 : f32
    %294 = vector.broadcast %cst_252 : f32 to vector<4x64xf32>
    %295 = arith.mulf %294, %291 : vector<4x64xf32>
    %296 = arith.select %293, %291, %295 : vector<4x64xi1>, vector<4x64xf32>
    %c9_253 = arith.constant 9 : index
    %c0_254 = arith.constant 0 : index
    %297 = vector.load %arg5[%c9_253, %c0_254] : memref<80x256xf32, #tpu.memory_space<vmem>>, vector<4x64xf32>
    tpu.vector_store %arg5[%c9_253, %c0_254], %296 {strides = array<i32>} : memref<80x256xf32, #tpu.memory_space<vmem>>, vector<4x64xf32>,
    %cst_255 = arith.constant 0.000000e+00 : f32
    %298 = vector.broadcast %cst_255 : f32 to vector<1x64xf32>
    %c8_256 = arith.constant 8 : index
    %c0_257 = arith.constant 0 : index
    %299 = vector.load %arg5[%c8_256, %c0_257] : memref<80x256xf32, #tpu.memory_space<vmem>>, vector<1x64xf32>
    tpu.vector_store %arg5[%c8_256, %c0_257], %298 {strides = array<i32>} : memref<80x256xf32, #tpu.memory_space<vmem>>, vector<1x64xf32>,
    %c8_258 = arith.constant 8 : index
    %c64_259 = arith.constant 64 : index
    %300 = vector.load %arg5[%c8_258, %c64_259] : memref<80x256xf32, #tpu.memory_space<vmem>>, vector<4x64xf32>
    tpu.vector_store %arg5[%c8_258, %c64_259], %296 {strides = array<i32>} : memref<80x256xf32, #tpu.memory_space<vmem>>, vector<4x64xf32>,
    %c7_260 = arith.constant 7 : index
    %c128_261 = arith.constant 128 : index
    %301 = vector.load %arg5[%c7_260, %c128_261] : memref<80x256xf32, #tpu.memory_space<vmem>>, vector<4x64xf32>
    tpu.vector_store %arg5[%c7_260, %c128_261], %296 {strides = array<i32>} : memref<80x256xf32, #tpu.memory_space<vmem>>, vector<4x64xf32>,
    %cst_262 = arith.constant 0.000000e+00 : f32
    %302 = vector.broadcast %cst_262 : f32 to vector<1x64xf32>
    %c11_263 = arith.constant 11 : index
    %c128_264 = arith.constant 128 : index
    %303 = vector.load %arg5[%c11_263, %c128_264] : memref<80x256xf32, #tpu.memory_space<vmem>>, vector<1x64xf32>
    tpu.vector_store %arg5[%c11_263, %c128_264], %302 {strides = array<i32>} : memref<80x256xf32, #tpu.memory_space<vmem>>, vector<1x64xf32>,
    %c8_265 = arith.constant 8 : index
    %c0_266 = arith.constant 0 : index
    %304 = vector.load %arg5[%c8_265, %c0_266] : memref<80x256xf32, #tpu.memory_space<vmem>>, vector<4x192xf32>
    %305 = arith.truncf %304 : vector<4x192xf32> to vector<4x192xbf16>
    %c1568 = arith.constant 1568 : index
    %c0_267 = arith.constant 0 : index
    %306 = vector.load %arg2[%c1568, %c0_267] : memref<2352x128xbf16, #tpu.memory_space<vmem>>, vector<192x64xbf16>
    %cst_268 = arith.constant dense<0.000000e+00> : vector<4x64xf32>
    %307 = tpu.matmul %305, %306, %cst_268 {dimension_numbers = #tpu.dot_dimension_numbers<[1], [0], [0], [1], [0, 0, 1, 1], [], []>} : vector<4x192xbf16>, vector<192x64xbf16>, vector<4x64xf32> -> vector<4x64xf32>
    %c17 = arith.constant 17 : index
    %c0_269 = arith.constant 0 : index
    %308 = vector.load %arg3[%c17, %c0_269] : memref<23x128xf32, #tpu.memory_space<vmem>>, vector<1x64xf32>
    %309 = vector.broadcast %308 : vector<1x64xf32> to vector<4x64xf32>
    %310 = arith.addf %307, %309 : vector<4x64xf32>
    %311 = arith.truncf %212 : vector<4x64xf32> to vector<4x64xbf16>
    %c1760 = arith.constant 1760 : index
    %c0_270 = arith.constant 0 : index
    %312 = vector.load %arg2[%c1760, %c0_270] : memref<2352x128xbf16, #tpu.memory_space<vmem>>, vector<64x64xbf16>
    %cst_271 = arith.constant dense<0.000000e+00> : vector<4x64xf32>
    %313 = tpu.matmul %311, %312, %cst_271 {dimension_numbers = #tpu.dot_dimension_numbers<[1], [0], [0], [1], [0, 0, 1, 1], [], []>} : vector<4x64xbf16>, vector<64x64xbf16>, vector<4x64xf32> -> vector<4x64xf32>
    %c18 = arith.constant 18 : index
    %c0_272 = arith.constant 0 : index
    %314 = vector.load %arg3[%c18, %c0_272] : memref<23x128xf32, #tpu.memory_space<vmem>>, vector<1x64xf32>
    %315 = vector.broadcast %314 : vector<1x64xf32> to vector<4x64xf32>
    %316 = arith.addf %313, %315 : vector<4x64xf32>
    %317 = arith.addf %310, %316 : vector<4x64xf32>
    %cst_273 = arith.constant 0.000000e+00 : f32
    %318 = vector.broadcast %cst_273 : f32 to vector<4x64xf32>
    %319 = arith.cmpf oge, %317, %318 : vector<4x64xf32>
    %cst_274 = arith.constant 1.000000e-01 : f32
    %320 = vector.broadcast %cst_274 : f32 to vector<4x64xf32>
    %321 = arith.mulf %320, %317 : vector<4x64xf32>
    %322 = arith.select %319, %317, %321 : vector<4x64xi1>, vector<4x64xf32>
    %c8_275 = arith.constant 8 : index
    %c0_276 = arith.constant 0 : index
    %323 = vector.load %arg5[%c8_275, %c0_276] : memref<80x256xf32, #tpu.memory_space<vmem>>, vector<4x64xf32>
    tpu.vector_store %arg5[%c8_275, %c0_276], %322 {strides = array<i32>} : memref<80x256xf32, #tpu.memory_space<vmem>>, vector<4x64xf32>,
    %c7_277 = arith.constant 7 : index
    %c64_278 = arith.constant 64 : index
    %324 = vector.load %arg5[%c7_277, %c64_278] : memref<80x256xf32, #tpu.memory_space<vmem>>, vector<4x64xf32>
    tpu.vector_store %arg5[%c7_277, %c64_278], %322 {strides = array<i32>} : memref<80x256xf32, #tpu.memory_space<vmem>>, vector<4x64xf32>,
    %c6_279 = arith.constant 6 : index
    %c128_280 = arith.constant 128 : index
    %325 = vector.load %arg5[%c6_279, %c128_280] : memref<80x256xf32, #tpu.memory_space<vmem>>, vector<4x64xf32>
    tpu.vector_store %arg5[%c6_279, %c128_280], %322 {strides = array<i32>} : memref<80x256xf32, #tpu.memory_space<vmem>>, vector<4x64xf32>,
    %c8_281 = arith.constant 8 : index
    %c0_282 = arith.constant 0 : index
    %326 = vector.load %arg5[%c8_281, %c0_282] : memref<80x256xf32, #tpu.memory_space<vmem>>, vector<2x192xf32>
    %327 = arith.truncf %326 : vector<2x192xf32> to vector<2x192xbf16>
    %c2016 = arith.constant 2016 : index
    %c0_283 = arith.constant 0 : index
    %328 = vector.load %arg2[%c2016, %c0_283] : memref<2352x128xbf16, #tpu.memory_space<vmem>>, vector<192x64xbf16>
    %cst_284 = arith.constant dense<0.000000e+00> : vector<2x64xf32>
    %329 = tpu.matmul %327, %328, %cst_284 {dimension_numbers = #tpu.dot_dimension_numbers<[1], [0], [0], [1], [0, 0, 1, 1], [], []>} : vector<2x192xbf16>, vector<192x64xbf16>, vector<2x64xf32> -> vector<2x64xf32>
    %c20 = arith.constant 20 : index
    %c0_285 = arith.constant 0 : index
    %330 = vector.load %arg3[%c20, %c0_285] : memref<23x128xf32, #tpu.memory_space<vmem>>, vector<1x64xf32>
    %331 = vector.broadcast %330 : vector<1x64xf32> to vector<2x64xf32>
    %332 = arith.addf %329, %331 : vector<2x64xf32>
    %333 = arith.truncf %332 : vector<2x64xf32> to vector<2x64xbf16>
    %c2208 = arith.constant 2208 : index
    %c0_286 = arith.constant 0 : index
    %334 = vector.load %arg2[%c2208, %c0_286] : memref<2352x128xbf16, #tpu.memory_space<vmem>>, vector<64x5xbf16>
    %cst_287 = arith.constant dense<0.000000e+00> : vector<2x5xf32>
    %335 = tpu.matmul %333, %334, %cst_287 {dimension_numbers = #tpu.dot_dimension_numbers<[1], [0], [0], [1], [0, 0, 1, 1], [], []>} : vector<2x64xbf16>, vector<64x5xbf16>, vector<2x5xf32> -> vector<2x5xf32>
    %c21 = arith.constant 21 : index
    %c0_288 = arith.constant 0 : index
    %336 = vector.load %arg3[%c21, %c0_288] : memref<23x128xf32, #tpu.memory_space<vmem>>, vector<1x5xf32>
    %337 = vector.broadcast %336 : vector<1x5xf32> to vector<2x5xf32>
    %338 = arith.addf %335, %337 : vector<2x5xf32>
    %cst_289 = arith.constant 0.000000e+00 : f32
    %339 = vector.broadcast %cst_289 : f32 to vector<2x128xf32>
    %c0_290 = arith.constant 0 : index
    %c0_291 = arith.constant 0 : index
    %c0_292 = arith.constant 0 : index
    %340 = vector.load %arg4[%c0_290, %c0_291, %c0_292] : memref<1x2x128xf32, #tpu.memory_space<vmem>>, vector<1x2x128xf32>
    %341 = vector.shape_cast %340 : vector<1x2x128xf32> to vector<2x128xf32>
    %342 = vector.shape_cast %339 : vector<2x128xf32> to vector<1x2x128xf32>
    tpu.vector_store %arg4[%c0_290, %c0_291, %c0_292], %342 {strides = array<i32>} : memref<1x2x128xf32, #tpu.memory_space<vmem>>, vector<1x2x128xf32>,
    %c0_293 = arith.constant 0 : index
    %c0_294 = arith.constant 0 : index
    %c0_295 = arith.constant 0 : index
    %343 = vector.load %arg4[%c0_293, %c0_294, %c0_295] : memref<1x2x128xf32, #tpu.memory_space<vmem>>, vector<1x2x1xf32>
    %344 = vector.shape_cast %343 : vector<1x2x1xf32> to vector<2x1xf32>
    %345 = vector.shape_cast %272 : vector<2x1xf32> to vector<1x2x1xf32>
    tpu.vector_store %arg4[%c0_293, %c0_294, %c0_295], %345 {strides = array<i32>} : memref<1x2x128xf32, #tpu.memory_space<vmem>>, vector<1x2x1xf32>,
    %c0_296 = arith.constant 0 : index
    %c0_297 = arith.constant 0 : index
    %c1_298 = arith.constant 1 : index
    %346 = vector.load %arg4[%c0_296, %c0_297, %c1_298] : memref<1x2x128xf32, #tpu.memory_space<vmem>>, vector<1x2x5xf32>
    %347 = vector.shape_cast %346 : vector<1x2x5xf32> to vector<2x5xf32>
    %348 = vector.shape_cast %338 : vector<2x5xf32> to vector<1x2x5xf32>
    tpu.vector_store %arg4[%c0_296, %c0_297, %c1_298], %348 {strides = array<i32>} : memref<1x2x128xf32, #tpu.memory_space<vmem>>, vector<1x2x5xf32>,
    return
  }
  func.func @transform_0(%arg0: i32) -> (i32, i32, i32) {
    %c0_i32 = arith.constant 0 : i32
    %c0_i32_0 = arith.constant 0 : i32
    %c0_i32_1 = arith.constant 0 : i32
    return %arg0, %c0_i32, %c0_i32_0 : i32, i32, i32
  }
  func.func @transform_1(%arg0: i32) -> (i32, i32) {
    %c0_i32 = arith.constant 0 : i32
    %c0_i32_0 = arith.constant 0 : i32
    %c0_i32_1 = arith.constant 0 : i32
    return %c0_i32, %c0_i32_0 : i32, i32
  }
  func.func @transform_2(%arg0: i32) -> (i32, i32) {
    %c0_i32 = arith.constant 0 : i32
    %c0_i32_0 = arith.constant 0 : i32
    %c0_i32_1 = arith.constant 0 : i32
    return %c0_i32, %c0_i32_0 : i32, i32
  }
  func.func @transform_3(%arg0: i32) -> (i32, i32, i32) {
    %c0_i32 = arith.constant 0 : i32
    %c0_i32_0 = arith.constant 0 : i32
    %c0_i32_1 = arith.constant 0 : i32
    return %arg0, %c0_i32, %c0_i32_0 : i32, i32, i32
  }
}

</mosaic_0001>

<bundles_post_ra>
// kernel: forward.1
= control target key start
LH: loop header
LB: loop body
LE: loop exit
PB: predicated region body
PF: predicated region fallthrough
CT: control target
= control target key end

     0   :  { %8 = vsyncpa [#allocation4], 0  ;;  %s3876_s12 = smov 0   ;;  %s4444_s0 = inlined_call_operand.vmem [shape: f32[2,64,3], index: 0, kind: input, shape index: {}]   ;;  %s4445_s1 = inlined_call_operand.hbm [shape: bf16[2352,128], index: 1, kind: input, shape index: {}]   ;;  %s4446_s2 = inlined_call_operand.vmem [shape: f32[23,128], index: 2, kind: input, shape index: {}]   ;;  %s4447_s3 = inlined_call_operand.vmem [shape: f32[2,2,128], index: 3, kind: output, shape index: {}]  }
   0x1 LB: > { %s124_s15 = sshll.u32 %s4445_s1, 4  ;;  %s2972_s16 = sadd.s32 4294967295, %s3843_s12   ;;  %s3843_s12 = sphi %s3876_s12, %s14_s12   ;;  %s125_s15 = int_to_ptr.hbm [resolvable:$true] %s124_s15 }
   0x2   : > { %p2974_p0 = scmp.ge.s32.totalorder %s3843_s12, 1  ;;  %p113_p1 = scmp.lt.s32.totalorder %s3843_s12, 3 }
   0x3   : > { %p3756_p2 = scmp.eq.s32.totalorder %s2972_s16, 0  ;;  %s3845_s17 = smov [#allocation3]  }
   0x4   : > { %p114_p3 = pnand %p2974_p0, %p113_p1  ;;  %s126_s18 = sshll.u32 %s3845_s17, 4  ;;  %s127_s18 = int_to_ptr.vmem [resolvable:$true] %s126_s18 }
   0x5   : > { %s3846_s19 = smov 64   ;;  %s3847_s20 = smov 4  }
   0x6   : > { %p3752_p4 = pneg %p114_p3  ;;  %153 = sbr.rel (%p114_p3) target bundleno = 5014 (0x1396), region = 32 }
   0x8   : > { %p3753_p5 = pnand %p3756_p2, %p3752_p4 }
   0xa   : > { %3755 = dma.hbm_to_vmem [thread:$0]  (!%p3753_p5), %s125_s15, 18816, %s127_s18, [#allocation4], %s3846_s19, %s3846_s19, %s3847_s20  }
   0xb   : > { %3838 = dma.done.wait (%p3756_p2), [#allocation4], 18816  }
   0xc   : > { %3840 = vsyncadd (%p3756_p2), [#allocation4], 4294948480  ;;  %p177_p6 = scmp.lt.s32.totalorder %s2972_s16, 1  ;;  %vm274_vm0 = vcmask 1046528   ;;  %s3848_s25 = smov 3   ;;  %vm238_vm1 = vcmask 16384  }
   0xd   : > { %s3849_s26 = smov 6   ;;  %vm228_vm2 = vcmask 23553   ;;  %v3850_v14 = vmov 0.0   ;;  %vm203_vm3 = vcmask 1040384   ;;  %vm230_vm4 = vcmask 23552   ;;  %s3852_s29 = smov 16  }
   0xe   : > { %s4449_s16 = smov (!%p177_p6, %s2972_s16), 1  ;;  %240 = vst.msk [vmem:[#allocation2 + $0x10] sm:$0x1] %vm238_vm1, %v3850_v14  ;;  %v2984_v30 = vld [vmem:[#allocation3] sm:$0xf]  ;;  %vm365_vm5 = vcmask 1043456  }
   0xf   : > { %s3601_s21 = sshll.u32 %s4449_s16, 6  ;;  %v3602_v31 = vld [vmem:[#allocation3] sm:$0x10]  ;;  %vm366_vm6 = vcmask 1044480   ;;  %v3851_v34 = vmov 65535   ;;  %vm265_vm7 = vcmask 48152  }
  0x10   : > { %s3893_s24 = scalar_lea.vmem %s4444_s0, %s3601_s21  ;;  %v2985_v32 = vor.u32 %v3602_v31, %v2984_v30  ;;  %v367_v35 = vsel %vm365_vm5, 4294967295, %v3851_v34  ;;  %vm319_vm8 = vcmask 72752   ;;  %vm467_vm9 = vcmask 122880   ;;  %s3853_s30 = smov 32  }
  0x11   : > { %v3896_v0 = vld [vmem:[%s3893_s24] sm:$0xff]  ;;  %v3899_v1 = vld [vmem:[%s3893_s24 + $0x8] sm:$0xff]  ;;  %v3902_v2 = vld [vmem:[%s3893_s24 + $0x10] sm:$0xff]  ;;  %v368_v36 = vsel %vm366_vm6, %v367_v35, 0  ;;  %vm352_vm10 = vcmask 72704   ;;  %vm329_vm11 = vcmask 65584  }
  0x12   : > { %241 = vrot.lane.b32.xlu0 %v3896_v0, %s3848_s25  ;;  %v275_v3 = vrot.slane %v3896_v0, 1  ;;  %v276_v4 = vrot.slane %v3899_v1, 1  ;;  %245 = vrot.lane.b32.xlu2 %v3902_v2, %s3848_s25  ;;  %v204_v5 = vrot.slane %v3896_v0, 7  ;;  %v3915_v7 = vld [vmem:[%s3893_s24 + $0x38] sm:$0xff]  ;;  %v278_v10 = vrot.slane %v3902_v2, 1  ;;  %v3928_v13 = vld [vmem:[%s3893_s24 + $0x20] sm:$0xff] }
  0x13   : > { %v3919_v8 = vld [vmem:[%s3893_s24 + $0x18] sm:$0xff]  ;;  %v217_v9 = vrot.slane %v3915_v7, 7  ;;  %v282_v15 = vrot.slane %v3928_v13, 1  ;;  %v3939_v18 = vld [vmem:[%s3893_s24 + $0x28] sm:$0xff]  ;;  %v3942_v19 = vld [vmem:[%s3893_s24 + $0x30] sm:$0xff]  ;;  %v288_v24 = vrot.slane %v3915_v7, 1  ;;  %v370_v37 = vand.u32 %v2985_v32, %v368_v36 }
  0x14   : > { %v277_v6 = vsel %vm274_vm0, %v275_v3, %v276_v4  ;;  %v279_v11 = vsel %vm274_vm0, %v276_v4, %v278_v10  ;;  %v280_v12 = vrot.slane %v3919_v8, 1  ;;  %229 = vst.msk [vmem:[#allocation2 + $0x10] sm:$0xfe] %vm228_vm2, %v204_v5  ;;  %v286_v20 = vrot.slane %v3942_v19, 1  ;;  %s3854_s15 = smov 64   ;;  %s2981_s17 = sshll.u32 %s4449_s16, 1 }
  0x15   : > { %292 = vrot.lane.b32.xlu1 %v277_v6, %s3849_s26  ;;  %v284_v21 = vrot.slane %v3939_v18, 1  ;;  %v205_v26 = vrot.slane %v3899_v1, 7  ;;  %v207_v29 = vrot.slane %v3902_v2, 7  ;;  %379 = vmatpush.bf16.msra.mxu0 %v370_v37  ;;  %v209_v38 = vrot.slane %v3919_v8, 7  ;;  %s4392_s20 = scalar_lea.vmem %s4447_s3, %s2981_s17  ;;  %s3855_s4 = smov 1  }
  0x16   : > { %v281_v16 = vsel %vm274_vm0, %v278_v10, %v280_v12  ;;  %v283_v17 = vsel %vm274_vm0, %v280_v12, %v282_v15  ;;  %v289_v25 = vsel %vm274_vm0, %v286_v20, %v288_v24  ;;  %v211_v40 = vrot.slane %v3928_v13, 7  ;;  %2898 = vst [vmem:[%s4392_s20] sm:$0x3] %v3850_v14 }
  0x17   : > { %v287_v22 = vsel %vm274_vm0, %v284_v21, %v286_v20  ;;  %v285_v23 = vsel %vm274_vm0, %v282_v15, %v284_v21  ;;  %v206_v27 = vsel %vm203_vm3, %v204_v5, %v205_v26  ;;  %v208_v33 = vsel %vm203_vm3, %v205_v26, %v207_v29  ;;  %v4012_v20 = vld [vmem:[%s4446_s2] ss:$0 sm:$0xff] }
  0x18   : > { %231 = vst.msk [vmem:[#allocation2 + $0x20] sm:$0xff] %vm230_vm4, %v206_v27  ;;  %v210_v41 = vsel %vm203_vm3, %v207_v29, %v209_v38  ;;  %v212_v42 = vsel %vm203_vm3, %v209_v38, %v211_v40  ;;  %v213_v45 = vrot.slane %v3939_v18, 7  ;;  %v215_v46 = vrot.slane %v3942_v19, 7 }
  0x19   : > { %232 = vst.msk [vmem:[#allocation2 + $0x30] sm:$0xff] %vm230_vm4, %v208_v33  ;;  %vm327_vm12 = vcmask 71728   ;;  %vm457_vm14 = vcmask 130049   ;;  %vm459_vm1 = vcmask 130048  }
  0x1a   : > { %243 = vrot.lane.b32.xlu0 %v3899_v1, %s3848_s25  ;;  %247 = vrot.lane.b32.xlu2 %v3919_v8, %s3848_s25  ;;  %233 = vst.msk [vmem:[#allocation2 + $0x40] sm:$0xff] %vm230_vm4, %v210_v41  ;;  %v214_v48 = vsel %vm203_vm3, %v211_v40, %v213_v45  ;;  %v216_v49 = vsel %vm203_vm3, %v213_v45, %v215_v46 }
  0x1b   : > { %234 = vst.msk [vmem:[#allocation2 + $0x50] sm:$0xff] %vm230_vm4, %v212_v42  ;;  %v218_v57 = vsel %vm203_vm3, %v215_v46, %v217_v9 }
  0x1c   : > { %235 = vst.msk [vmem:[#allocation2 + $0x60] sm:$0xff] %vm230_vm4, %v214_v48 }
  0x1d   : > { %294 = vrot.lane.b32.xlu1 %v279_v11, %s3849_s26  ;;  %236 = vst.msk [vmem:[#allocation2 + $0x70] sm:$0xff] %vm230_vm4, %v216_v49 }
  0x1e   : > { %237 = vst.msk [vmem:[#allocation2 + $0x80] sm:$0xff] %vm230_vm4, %v218_v57 }
  0x22   : > { %296 = vrot.lane.b32.xlu0 %v281_v16, %s3849_s26  ;;  %249 = vrot.lane.b32.xlu2 %v3928_v13, %s3848_s25 }
  0x25   : > { %298 = vrot.lane.b32.xlu1 %v283_v17, %s3849_s26 }
  0x2a   : > { %251 = vrot.lane.b32.xlu0 %v3939_v18, %s3848_s25  ;;  %302 = vrot.lane.b32.xlu2 %v287_v22, %s3849_s26 }
  0x2d   : > { %300 = vrot.lane.b32.xlu1 %v285_v23, %s3849_s26 }
  0x32   : > { %253 = vrot.lane.b32.xlu0 %v3942_v19, %s3848_s25  ;;  %304 = vrot.lane.b32.xlu2 %v289_v25, %s3849_s26 }
  0x35   : > { %255 = vrot.lane.b32.xlu1 %v3915_v7, %s3848_s25 }
  0x3a   : > { %306 = vrot.lane.b32.xlu0 %v288_v24, %s3849_s26 }
  0x6c   : > { %v246_v28 = vpop.permute.xlu2 %245 }
  0x6d   : > { %268 = vst.msk [vmem:[#allocation2 + $0x30] sm:$0xff] %vm265_vm7, %v246_v28 }
  0x74   : > { %v248_v39 = vpop.permute.xlu2 %247 }
  0x75   : > { %269 = vst.msk [vmem:[#allocation2 + $0x40] sm:$0xff] %vm265_vm7, %v248_v39 }
  0x7c   : > { %v250_v43 = vpop.permute.xlu2 %249 }
  0x7d   : > { %270 = vst.msk [vmem:[#allocation2 + $0x50] sm:$0xff] %vm265_vm7, %v250_v43 }
  0x84   : > { %v242_v44 = vpop.permute.xlu0 %241  ;;  %v303_v58 = vpop.permute.xlu2 %302 }
  0x85   : > { %266 = vst.msk [vmem:[#allocation2 + $0x10] sm:$0xff] %vm265_vm7, %v242_v44 }
  0x87   : > { %v293_v47 = vpop.permute.xlu1 %292 }
  0x88   : > { %320 = vst.msk [vmem:[#allocation2 + $0x10] sm:$0xff] %vm319_vm8, %v293_v47 }
  0x8c   : > { %v244_v50 = vpop.permute.xlu0 %243  ;;  %v305_v63 = vpop.permute.xlu2 %304 }
  0x8d   : > { %267 = vst.msk [vmem:[#allocation2 + $0x20] sm:$0xff] %vm265_vm7, %v244_v50 }
  0x8f   : > { %v295_v51 = vpop.permute.xlu1 %294  ;;  %v331_v52 = vld [vmem:[#allocation2 + $0x10] sm:$0xff] }
  0x90   : > { %321 = vst.msk [vmem:[#allocation2 + $0x20] sm:$0xff] %vm319_vm8, %v295_v51 }
  0x91   : > { %469 = vst.msk [vmem:[#allocation2 + $0x10] sm:$0x1] %vm467_vm9, %v3850_v14 }
  0x94   : > { %v297_v53 = vpop.permute.xlu0 %296 }
  0x95   : > { %322 = vst.msk [vmem:[#allocation2 + $0x30] sm:$0xff] %vm319_vm8, %v297_v53 }
  0x97   : > { %v332_v54 = vld [vmem:[#allocation2 + $0x20] sm:$0xff]  ;;  %v299_v55 = vpop.permute.xlu1 %298 }
  0x98   : > { %v339_v56 = vpack.c.bf16 %v332_v54, %v331_v52  ;;  %323 = vst.msk [vmem:[#allocation2 + $0x40] sm:$0xff] %vm319_vm8, %v299_v55 }
  0x9a   : > { %2986 = vmatmul.msk.bf16.vlgmr.msra.gmra.mxu0 %vm352_vm10, %v339_v56 }
  0x9c   : > { %v252_v59 = vpop.permute.xlu0 %251  ;;  %v333_v61 = vld [vmem:[#allocation2 + $0x30] sm:$0xff] }
  0x9d   : > { %271 = vst.msk [vmem:[#allocation2 + $0x60] sm:$0xff] %vm265_vm7, %v252_v59 }
  0x9e   : > { %325 = vst.msk [vmem:[#allocation2 + $0x60] sm:$0xff] %vm319_vm8, %v303_v58 }
  0x9f   : > { %v301_v60 = vpop.permute.xlu1 %300  ;;  %v334_v62 = vld [vmem:[#allocation2 + $0x40] sm:$0xff] }
  0xa0   : > { %324 = vst.msk [vmem:[#allocation2 + $0x50] sm:$0xff] %vm319_vm8, %v301_v60  ;;  %v340_v5 = vpack.c.bf16 %v334_v62, %v333_v61 }
  0xa4   : > { %v254_v4 = vpop.permute.xlu0 %253 }
  0xa5   : > { %272 = vst.msk [vmem:[#allocation2 + $0x70] sm:$0xff] %vm265_vm7, %v254_v4  ;;  %v336_v11 = vld [vmem:[#allocation2 + $0x60] sm:$0xff] }
  0xa6   : > { %326 = vst.msk [vmem:[#allocation2 + $0x70] sm:$0xff] %vm319_vm8, %v305_v63 }
  0xa7   : > { %v256_v6 = vpop.permute.xlu1 %255  ;;  %v335_v10 = vld [vmem:[#allocation2 + $0x50] sm:$0xff] }
  0xa8   : > { %273 = vst.msk [vmem:[#allocation2 + $0x80] sm:$0xff] %vm265_vm7, %v256_v6  ;;  %v341_v12 = vpack.c.bf16 %v336_v11, %v335_v10 }
  0xa9   : > { %330 = vst.msk [vmem:[#allocation2 + $0x87] sm:$0x1] %vm329_vm11, %v3850_v14 }
  0xaa   : > { %2987 = vmatmul.msk.bf16.gmra.mxu0 %vm352_vm10, %v340_v5 }
  0xac   : > { %v307_v9 = vpop.permute.xlu0 %306 }
  0xad   : > { %328 = vst.msk [vmem:[#allocation2 + $0x80] sm:$0x7f] %vm327_vm12, %v307_v9  ;;  %v337_v15 = vld [vmem:[#allocation2 + $0x70] sm:$0xff]  ;;  %vm658_vm12 = vcmask 1041408  }
  0xb4   : > { %v338_v16 = vld [vmem:[#allocation2 + $0x80] sm:$0xff] }
  0xb5   : > { %v342_v17 = vpack.c.bf16 %v338_v16, %v337_v15 }
  0xba   : > { %2988 = vmatmul.msk.bf16.gmra.mxu0 %vm352_vm10, %v341_v12 }
  0xca   : > { %2989 = vmatmul.msk.bf16.gmra.mxu0 %vm352_vm10, %v342_v17 }
 0x117   : > { %v381_v21 = vpop.f32.mrf.mxu0 }
 0x118   : > { %v382_v22 = vadd.f32 %v4012_v20, %v381_v21 }
 0x11a   : > { %v409_v23 = vmul.f32 0.1, %v382_v22  ;;  %vm401_vm13 = vcmp.ge.f32.partialorder %v382_v22, 0.0 }
 0x11c   : > { %v4015_v24 = vsel %vm401_vm13, %v382_v22, %v409_v23  ;;  %vm494_vm13 = vcmask 261248  }
 0x11d   : > { %470 = vrot.lane.b32.xlu1 %v4015_v24, %s3852_s29  ;;  %v433_v25 = vrot.slane %v4015_v24, 7  ;;  %v503_v30 = vrot.slane %v4015_v24, 1  ;;  %v3745_v24 = vld [vmem:[#allocation3 + $0x468] sm:$0xff] }
 0x11f   : > { %v383_v26 = vpop.f32.mrf.mxu0  ;;  %458 = vst.msk [vmem:[#allocation2 + $0x10] sm:$0xfe] %vm457_vm14, %v433_v25 }
 0x120   : > { %v384_v27 = vadd.f32 %v4012_v20, %v383_v26 }
 0x122   : > { %v410_v28 = vmul.f32 0.1, %v384_v27  ;;  %vm402_vm15 = vcmp.ge.f32.partialorder %v384_v27, 0.0 }
 0x124   : > { %v418_v29 = vsel %vm402_vm15, %v384_v27, %v410_v28  ;;  %vm547_vm15 = vcmask 392448  }
 0x125   : > { %472 = vrot.lane.b32.xlu2 %v418_v29, %s3852_s29  ;;  %v434_v31 = vrot.slane %v418_v29, 7  ;;  %v504_v32 = vrot.slane %v418_v29, 1 }
 0x127   : > { %v435_v33 = vsel %vm203_vm3, %v433_v25, %v434_v31  ;;  %v386_v35 = vpop.f32.mrf.mxu0  ;;  %v505_v36 = vsel %vm274_vm0, %v503_v30, %v504_v32 }
 0x128   : > { %v387_v37 = vadd.f32 %v4012_v20, %v386_v35  ;;  %520 = vrot.lane.b32.xlu0 %v505_v36, %s3853_s30  ;;  %460 = vst.msk [vmem:[#allocation2 + $0x20] sm:$0xff] %vm459_vm1, %v435_v33  ;;  %v643_v33 = vld [vmem:[#allocation3 + $0x20] sm:$0x3] }
 0x12a   : > { %v411_v38 = vmul.f32 0.1, %v387_v37  ;;  %vm403_vm2 = vcmp.ge.f32.partialorder %v387_v37, 0.0 }
 0x12c   : > { %v419_v39 = vsel %vm403_vm2, %v387_v37, %v411_v38  ;;  %v639_v37 = vpack.c.bf16 %v3899_v1, %v3896_v0  ;;  %v3605_v38 = vld [vmem:[#allocation3 + $0x18] sm:$0xff]  ;;  %vm597_vm2 = vcmask 392192  }
 0x12d   : > { %v436_v40 = vrot.slane %v419_v39, 7  ;;  %v506_v41 = vrot.slane %v419_v39, 1  ;;  %474 = vrot.lane.b32.xlu2 %v419_v39, %s3852_s29  ;;  %615 = vmatpush.bf16.msra.mxu1 %v3605_v38 }
 0x12f   : > { %v437_v42 = vsel %vm203_vm3, %v434_v31, %v436_v40  ;;  %v388_v43 = vpop.f32.mrf.mxu0  ;;  %v507_v44 = vsel %vm274_vm0, %v504_v32, %v506_v41 }
 0x130   : > { %v389_v45 = vadd.f32 %v4012_v20, %v388_v43  ;;  %522 = vrot.lane.b32.xlu1 %v507_v44, %s3853_s30  ;;  %461 = vst.msk [vmem:[#allocation2 + $0x30] sm:$0xff] %vm459_vm1, %v437_v42  ;;  %v640_v42 = vpack.c.bf16 %v3919_v8, %v3902_v2 }
 0x132   : > { %v412_v46 = vmul.f32 0.1, %v389_v45  ;;  %vm404_vm6 = vcmp.ge.f32.partialorder %v389_v45, 0.0 }
 0x134   : > { %v420_v47 = vsel %vm404_vm6, %v389_v45, %v412_v46  ;;  %v641_v45 = vpack.c.bf16 %v3939_v18, %v3928_v13  ;;  %v642_v18 = vpack.c.bf16 %v3915_v7, %v3942_v19  ;;  %vm557_vm6 = vcmask 385280  }
 0x135   : > { %v438_v48 = vrot.slane %v420_v47, 7  ;;  %v508_v49 = vrot.slane %v420_v47, 1  ;;  %476 = vrot.lane.b32.xlu0 %v420_v47, %s3852_s29 }
 0x137   : > { %v439_v50 = vsel %vm203_vm3, %v436_v40, %v438_v48  ;;  %v391_v51 = vpop.f32.mrf.mxu0  ;;  %v509_v52 = vsel %vm274_vm0, %v506_v41, %v508_v49  ;;  %v3604_v40 = vld [vmem:[#allocation3 + $0x10] sm:$0xff] }
 0x138   : > { %v392_v53 = vadd.f32 %v4012_v20, %v391_v51  ;;  %524 = vrot.lane.b32.xlu1 %v509_v52, %s3853_s30  ;;  %462 = vst.msk [vmem:[#allocation2 + $0x40] sm:$0xff] %vm459_vm1, %v439_v50  ;;  %616 = vmatpush.bf16.msra.mxu1 %v3604_v40 }
 0x13a   : > { %v413_v54 = vmul.f32 0.1, %v392_v53  ;;  %vm405_vm7 = vcmp.ge.f32.partialorder %v392_v53, 0.0 }
 0x13c   : > { %v421_v55 = vsel %vm405_vm7, %v392_v53, %v413_v54  ;;  %vm719_vm7 = vcmask 523264  }
 0x13d   : > { %v440_v56 = vrot.slane %v421_v55, 7  ;;  %v510_v57 = vrot.slane %v421_v55, 1  ;;  %478 = vrot.lane.b32.xlu0 %v421_v55, %s3852_s29 }
 0x13f   : > { %v441_v58 = vsel %vm203_vm3, %v438_v48, %v440_v56  ;;  %v393_v59 = vpop.f32.mrf.mxu0  ;;  %v511_v60 = vsel %vm274_vm0, %v508_v49, %v510_v57 }
 0x140   : > { %v394_v61 = vadd.f32 %v4012_v20, %v393_v59  ;;  %526 = vrot.lane.b32.xlu2 %v511_v60, %s3853_s30  ;;  %463 = vst.msk [vmem:[#allocation2 + $0x50] sm:$0xff] %vm459_vm1, %v441_v58 }
 0x142   : > { %v414_v62 = vmul.f32 0.1, %v394_v61  ;;  %vm406_vm8 = vcmp.ge.f32.partialorder %v394_v61, 0.0 }
 0x144   : > { %v422_v63 = vsel %vm406_vm8, %v394_v61, %v414_v62 }
 0x145   : > { %v442_v4 = vrot.slane %v422_v63, 7  ;;  %v512_v5 = vrot.slane %v422_v63, 1  ;;  %480 = vrot.lane.b32.xlu1 %v422_v63, %s3852_s29 }
 0x147   : > { %v443_v6 = vsel %vm203_vm3, %v440_v56, %v442_v4  ;;  %v396_v9 = vpop.f32.mrf.mxu0  ;;  %v513_v10 = vsel %vm274_vm0, %v510_v57, %v512_v5 }
 0x148   : > { %v397_v11 = vadd.f32 %v4012_v20, %v396_v9  ;;  %528 = vrot.lane.b32.xlu2 %v513_v10, %s3853_s30  ;;  %464 = vst.msk [vmem:[#allocation2 + $0x60] sm:$0xff] %vm459_vm1, %v443_v6  ;;  %v3778_v6 = vld [vmem:[%s4446_s2 + $0x2] ss:$0 sm:$0xff]  ;;  %v3779_v9 = vld [vmem:[%s4446_s2 + $0x1] ss:$0 sm:$0xff] }
 0x14a   : > { %v415_v12 = vmul.f32 0.1, %v397_v11  ;;  %vm407_vm10 = vcmp.ge.f32.partialorder %v397_v11, 0.0 }
 0x14c   : > { %v423_v15 = vsel %vm407_vm10, %v397_v11, %v415_v12 }
 0x14d   : > { %v444_v16 = vrot.slane %v423_v15, 7  ;;  %v514_v17 = vrot.slane %v423_v15, 1  ;;  %482 = vrot.lane.b32.xlu1 %v423_v15, %s3852_s29 }
 0x14f   : > { %v445_v21 = vsel %vm203_vm3, %v442_v4, %v444_v16  ;;  %v398_v22 = vpop.f32.mrf.mxu0  ;;  %v515_v23 = vsel %vm274_vm0, %v512_v5, %v514_v17 }
 0x150   : > { %v399_v25 = vadd.f32 %v4012_v20, %v398_v22  ;;  %530 = vrot.lane.b32.xlu0 %v515_v23, %s3853_s30  ;;  %465 = vst.msk [vmem:[#allocation2 + $0x70] sm:$0xff] %vm459_vm1, %v445_v21  ;;  %v659_v20 = vsel %vm203_vm3, 4294967295, %v3851_v34  ;;  %v3603_v34 = vld [vmem:[#allocation3 + $0x8] sm:$0xff] }
 0x151   : > { %v660_v35 = vsel %vm658_vm12, %v659_v20, 0  ;;  %617 = vmatpush.bf16.msra.mxu1 %v3603_v34 }
 0x152   : > { %v416_v26 = vmul.f32 0.1, %v399_v25  ;;  %vm408_vm11 = vcmp.ge.f32.partialorder %v399_v25, 0.0  ;;  %v662_v36 = vand.u32 %v660_v35, %v643_v33 }
 0x154   : > { %v424_v27 = vsel %vm408_vm11, %v399_v25, %v416_v26  ;;  %671 = vmatpush.bf16.msra.mxu2 %v662_v36 }
 0x155   : > { %v446_v28 = vrot.slane %v424_v27, 7  ;;  %484 = vrot.lane.b32.xlu2 %v424_v27, %s3852_s29  ;;  %v516_v29 = vrot.slane %v424_v27, 1 }
 0x157   : > { %v447_v31 = vsel %vm203_vm3, %v444_v16, %v446_v28  ;;  %534 = vrot.lane.b32.xlu1 %v516_v29, %s3853_s30  ;;  %v517_v32 = vsel %vm274_vm0, %v514_v17, %v516_v29  ;;  %3006 = vmatmul.msk.bf16.vlgmr.msra.gmra.mxu2 %vm230_vm4, %v639_v37 }
 0x158   : > { %532 = vrot.lane.b32.xlu0 %v517_v32, %s3853_s30  ;;  %466 = vst.msk [vmem:[#allocation2 + $0x80] sm:$0xff] %vm459_vm1, %v447_v31 }
 0x167   : > { %3007 = vmatmul.msk.bf16.gmra.mxu2 %vm230_vm4, %v640_v42 }
 0x177   : > { %3008 = vmatmul.msk.bf16.gmra.mxu2 %vm230_vm4, %v641_v45 }
 0x17f   : > { %v473_v39 = vpop.permute.xlu2 %472 }
 0x180   : > { %496 = vst.msk [vmem:[#allocation2 + $0x20] sm:$0xff] %vm494_vm13, %v473_v39 }
 0x187   : > { %v475_v41 = vpop.permute.xlu2 %474  ;;  %3009 = vmatmul.msk.bf16.gmra.mxu2 %vm230_vm4, %v642_v18  ;;  %vm555_vm4 = vcmask 391424  }
 0x188   : > { %497 = vst.msk [vmem:[#allocation2 + $0x30] sm:$0xff] %vm494_vm13, %v475_v41 }
 0x18f   : > { %v471_v1 = vpop.permute.xlu1 %470 }
 0x190   : > { %495 = vst.msk [vmem:[#allocation2 + $0x10] sm:$0xff] %vm494_vm13, %v471_v1 }
 0x19a   : > { %v521_v43 = vpop.permute.xlu0 %520  ;;  %v527_v44 = vpop.permute.xlu2 %526 }
 0x19b   : > { %548 = vst.msk [vmem:[#allocation2 + $0x10] sm:$0xff] %vm547_vm15, %v521_v43 }
 0x1a2   : > { %v523_v46 = vpop.permute.xlu1 %522  ;;  %v559_v47 = vld [vmem:[#allocation2 + $0x10] sm:$0xff]  ;;  %v529_v2 = vpop.permute.xlu2 %528 }
 0x1a3   : > { %549 = vst.msk [vmem:[#allocation2 + $0x20] sm:$0xff] %vm547_vm15, %v523_v46 }
 0x1a4   : > { %778 = vst.msk [vmem:[#allocation2 + $0x10] sm:$0x1] %vm467_vm9, %v3850_v14 }
 0x1a7   : > { %v477_v8 = vpop.permute.xlu0 %476 }
 0x1a8   : > { %498 = vst.msk [vmem:[#allocation2 + $0x40] sm:$0xff] %vm494_vm13, %v477_v8 }
 0x1a9   : > { %551 = vst.msk [vmem:[#allocation2 + $0x40] sm:$0xff] %vm547_vm15, %v527_v44 }
 0x1aa   : > { %v525_v48 = vpop.permute.xlu1 %524  ;;  %v560_v49 = vld [vmem:[#allocation2 + $0x20] sm:$0xff] }
 0x1ab   : > { %550 = vst.msk [vmem:[#allocation2 + $0x30] sm:$0xff] %vm547_vm15, %v525_v48  ;;  %v567_v13 = vpack.c.bf16 %v560_v49, %v559_v47 }
 0x1ad   : > { %3002 = vmatmul.msk.bf16.vlgmr.msra.gmra.mxu1 %vm597_vm2, %v567_v13 }
 0x1af   : > { %v485_v50 = vpop.permute.xlu2 %484  ;;  %v479_v51 = vpop.permute.xlu0 %478 }
 0x1b0   : > { %502 = vst.msk [vmem:[#allocation2 + $0x80] sm:$0xff] %vm494_vm13, %v485_v50  ;;  %v562_v54 = vld [vmem:[#allocation2 + $0x40] sm:$0xff] }
 0x1b1   : > { %558 = vst.msk [vmem:[#allocation2 + $0x87] sm:$0x1] %vm557_vm6, %v3850_v14 }
 0x1b2   : > { %499 = vst.msk [vmem:[#allocation2 + $0x50] sm:$0xff] %vm494_vm13, %v479_v51  ;;  %v561_v53 = vld [vmem:[#allocation2 + $0x30] sm:$0xff] }
 0x1b3   : > { %552 = vst.msk [vmem:[#allocation2 + $0x50] sm:$0xff] %vm547_vm15, %v529_v2  ;;  %v568_v7 = vpack.c.bf16 %v562_v54, %v561_v53  ;;  %v3606_v53 = vld [vmem:[#allocation3 + $0x470] sm:$0xff]  ;;  %v3607_v54 = vld [vmem:[#allocation3 + $0x478] sm:$0xff] }
 0x1b7   : > { %v481_v52 = vpop.permute.xlu1 %480 }
 0x1b8   : > { %500 = vst.msk [vmem:[#allocation2 + $0x60] sm:$0xff] %vm494_vm13, %v481_v52 }
 0x1ba   : > { %v563_v58 = vld [vmem:[#allocation2 + $0x50] sm:$0xff] }
 0x1bd   : > { %3003 = vmatmul.msk.bf16.gmra.mxu1 %vm597_vm2, %v568_v7  ;;  %v3614_v7 = vld [vmem:[#allocation3 + $0x58] sm:$0xff] }
 0x1be   : > { %1040 = vmatpush.bf16.msrb.mxu2 %v3614_v7 }
 0x1bf   : > { %v483_v19 = vpop.permute.xlu1 %482 }
 0x1c0   : > { %501 = vst.msk [vmem:[#allocation2 + $0x70] sm:$0xff] %vm494_vm13, %v483_v19 }
 0x1c2   : > { %v531_v55 = vpop.permute.xlu0 %530 }
 0x1c3   : > { %553 = vst.msk [vmem:[#allocation2 + $0x60] sm:$0xff] %vm547_vm15, %v531_v55 }
 0x1c9   : > { %v535_v56 = vpop.permute.xlu1 %534 }
 0x1ca   : > { %556 = vst.msk [vmem:[#allocation2 + $0x80] sm:$0x7f] %vm555_vm4, %v535_v56  ;;  %v533_v57 = vpop.permute.xlu0 %532  ;;  %v564_v59 = vld [vmem:[#allocation2 + $0x60] sm:$0xff] }
 0x1cb   : > { %554 = vst.msk [vmem:[#allocation2 + $0x70] sm:$0xff] %vm547_vm15, %v533_v57  ;;  %v569_v60 = vpack.c.bf16 %v564_v59, %v563_v58 }
 0x1cd   : > { %3004 = vmatmul.msk.bf16.gmra.mxu1 %vm597_vm2, %v569_v60 }
 0x1d1   : > { %v566_v62 = vld [vmem:[#allocation2 + $0x80] sm:$0xff] }
 0x1d2   : > { %v565_v61 = vld [vmem:[#allocation2 + $0x70] sm:$0xff] }
 0x1d3   : > { %v570_v63 = vpack.c.bf16 %v566_v62, %v565_v61 }
 0x1da   : > { %v673_v4 = vpop.f32.mrf.mxu2 }
 0x1db   : > { %v674_v10 = vadd.f32 %v3778_v6, %v673_v4 }
 0x1dd   : > { %3005 = vmatmul.msk.bf16.gmra.mxu1 %vm597_vm2, %v570_v63 }
 0x1e2   : > { %v675_v5 = vpop.f32.mrf.mxu2 }
 0x1e3   : > { %v676_v13 = vadd.f32 %v3778_v6, %v675_v5 }
 0x1ea   : > { %v678_v16 = vpop.f32.mrf.mxu2 }
 0x1eb   : > { %v679_v45 = vadd.f32 %v3778_v6, %v678_v16 }
 0x1f2   : > { %v680_v21 = vpop.f32.mrf.mxu2 }
 0x1f3   : > { %v681_v47 = vadd.f32 %v3778_v6, %v680_v21 }
 0x1fa   : > { %v683_v25 = vpop.f32.mrf.mxu2 }
 0x1fb   : > { %v684_v39 = vadd.f32 %v3778_v6, %v683_v25 }
 0x202   : > { %v685_v27 = vpop.f32.mrf.mxu2 }
 0x203   : > { %v686_v41 = vadd.f32 %v3778_v6, %v685_v27 }
 0x20a   : > { %v688_v29 = vpop.f32.mrf.mxu2 }
 0x20b   : > { %v689_v20 = vadd.f32 %v3778_v6, %v688_v29 }
 0x212   : > { %v690_v32 = vpop.f32.mrf.mxu2 }
 0x213   : > { %v691_v37 = vadd.f32 %v3778_v6, %v690_v32  ;;  %v3610_v32 = vld [vmem:[#allocation3 + $0x38] sm:$0xff] }
 0x22a   : > { %v619_v11 = vpop.f32.mrf.mxu1 }
 0x22b   : > { %v620_v12 = vadd.f32 %v3779_v9, %v619_v11 }
 0x22d   : > { %v693_v15 = vadd.f32 %v674_v10, %v620_v12 }
 0x232   : > { %v621_v17 = vpop.f32.mrf.mxu1 }
 0x233   : > { %v622_v8 = vadd.f32 %v3779_v9, %v621_v17 }
 0x235   : > { %v694_v50 = vadd.f32 %v676_v13, %v622_v8 }
 0x237   : > { %v705_v52 = vpack.c.bf16 %v694_v50, %v693_v15 }
 0x23a   : > { %v624_v22 = vpop.f32.mrf.mxu1 }
 0x23b   : > { %v625_v46 = vadd.f32 %v3779_v9, %v624_v22 }
 0x23d   : > { %v695_v18 = vadd.f32 %v679_v45, %v625_v46  ;;  %v3781_v46 = vld [vmem:[%s4446_s2 + $0x3] ss:$0 sm:$0xff] }
 0x242   : > { %v626_v23 = vpop.f32.mrf.mxu1 }
 0x243   : > { %v627_v1 = vadd.f32 %v3779_v9, %v626_v23 }
 0x245   : > { %v696_v48 = vadd.f32 %v681_v47, %v627_v1 }
 0x247   : > { %v706_v51 = vpack.c.bf16 %v696_v48, %v695_v18 }
 0x24a   : > { %v629_v26 = vpop.f32.mrf.mxu1 }
 0x24b   : > { %v630_v40 = vadd.f32 %v3779_v9, %v629_v26 }
 0x24d   : > { %v697_v2 = vadd.f32 %v684_v39, %v630_v40 }
 0x252   : > { %v631_v28 = vpop.f32.mrf.mxu1 }
 0x253   : > { %v632_v36 = vadd.f32 %v3779_v9, %v631_v28 }
 0x255   : > { %v698_v43 = vadd.f32 %v686_v41, %v632_v36 }
 0x257   : > { %v707_v49 = vpack.c.bf16 %v698_v43, %v697_v2 }
 0x25a   : > { %v634_v31 = vpop.f32.mrf.mxu1 }
 0x25b   : > { %v635_v33 = vadd.f32 %v3779_v9, %v634_v31 }
 0x25d   : > { %v699_v34 = vadd.f32 %v689_v20, %v635_v33  ;;  %v3609_v20 = vld [vmem:[#allocation3 + $0x30] sm:$0xff]  ;;  %v3608_v33 = vld [vmem:[#allocation3 + $0x28] sm:$0xff] }
 0x262   : > { %v636_v35 = vpop.f32.mrf.mxu1 }
 0x263   : > { %v637_v38 = vadd.f32 %v3779_v9, %v636_v35 }
 0x265   : > { %v700_v42 = vadd.f32 %v691_v37, %v637_v38 }
 0x267   : > { %v708_v44 = vpack.c.bf16 %v700_v42, %v699_v34 }
 0x269   : > { %730 = vmatpush.bf16.msra.mxu3 %v708_v44 }
 0x26d   : > { %731 = vmatpush.bf16.msra.mxu3 %v707_v49 }
 0x271   : > { %732 = vmatpush.bf16.msra.mxu3 %v706_v51 }
 0x275   : > { %733 = vmatpush.bf16.msra.mxu3 %v705_v52 }
 0x278   : > { %3018 = vmatmul.msk.bf16.vlgmr.msra.gmra.mxu3 %vm719_vm7, %v3606_v53 }
 0x279   : > { %866 = vmatpush.bf16.msrb.mxu3 %v3610_v32 }
 0x27d   : > { %867 = vmatpush.bf16.msrb.mxu3 %v3609_v20 }
 0x281   : > { %868 = vmatpush.bf16.msrb.mxu3 %v3608_v33 }
 0x288   : > { %3019 = vmatmul.msk.bf16.gmra.mxu3 %vm719_vm7, %v3607_v54 }
 0x2fb   : > { %v735_v19 = vpop.f32.mrf.mxu3 }
 0x2fc   : > { %v749_v55 = vmul.f32 0.1, %v735_v19  ;;  %vm745_vm8 = vcmp.ge.f32.partialorder %v735_v19, 0.0 }
 0x2fe   : > { %v4113_v56 = vsel %vm745_vm8, %v735_v19, %v749_v55 }
 0x2ff   : > { %779 = vrot.lane.b32.xlu2 %v4113_v56, %s3852_s29  ;;  %v761_v57 = vrot.slane %v4113_v56, 7  ;;  %v795_v62 = vrot.slane %v4113_v56, 1 }
 0x301   : > { %773 = vst.msk [vmem:[#allocation2 + $0x10] sm:$0xfe] %vm457_vm14, %v761_v57 }
 0x303   : > { %v737_v58 = vpop.f32.mrf.mxu3 }
 0x304   : > { %v1015_v59 = vpack.c.bf16 %v737_v58, %v735_v19  ;;  %vm746_vm10 = vcmp.ge.f32.partialorder %v737_v58, 0.0  ;;  %v750_v60 = vmul.f32 0.1, %v737_v58 }
 0x306   : > { %3052 = vmatmul.msk.bf16.vlgmr.msrb.gmra.mxu2 %vm459_vm1, %v1015_v59  ;;  %v754_v61 = vsel %vm746_vm10, %v737_v58, %v750_v60 }
 0x307   : > { %781 = vrot.lane.b32.xlu0 %v754_v61, %s3852_s29  ;;  %v762_v63 = vrot.slane %v754_v61, 7  ;;  %v796_v4 = vrot.slane %v754_v61, 1 }
 0x309   : > { %v763_v5 = vsel %vm203_vm3, %v761_v57, %v762_v63  ;;  %v797_v6 = vsel %vm274_vm0, %v795_v62, %v796_v4 }
 0x30a   : > { %774 = vst.msk [vmem:[#allocation2 + $0x20] sm:$0xff] %vm459_vm1, %v763_v5  ;;  %804 = vrot.lane.b32.xlu1 %v797_v6, %s3853_s30 }
 0x30b   : > { %v740_v9 = vpop.f32.mrf.mxu3 }
 0x30c   : > { %v751_v10 = vmul.f32 0.1, %v740_v9  ;;  %vm747_vm11 = vcmp.ge.f32.partialorder %v740_v9, 0.0 }
 0x30e   : > { %v755_v11 = vsel %vm747_vm11, %v740_v9, %v751_v10 }
 0x30f   : > { %783 = vrot.lane.b32.xlu0 %v755_v11, %s3852_s29  ;;  %v764_v12 = vrot.slane %v755_v11, 7  ;;  %v798_v15 = vrot.slane %v755_v11, 1 }
 0x311   : > { %v765_v16 = vsel %vm203_vm3, %v762_v63, %v764_v12  ;;  %v799_v17 = vsel %vm274_vm0, %v796_v4, %v798_v15 }
 0x312   : > { %775 = vst.msk [vmem:[#allocation2 + $0x30] sm:$0xff] %vm459_vm1, %v765_v16  ;;  %806 = vrot.lane.b32.xlu2 %v799_v17, %s3853_s30 }
 0x313   : > { %v742_v21 = vpop.f32.mrf.mxu3 }
 0x314   : > { %v752_v22 = vmul.f32 0.1, %v742_v21  ;;  %v1016_v23 = vpack.c.bf16 %v742_v21, %v740_v9  ;;  %vm748_vm12 = vcmp.ge.f32.partialorder %v742_v21, 0.0 }
 0x316   : > { %3053 = vmatmul.msk.bf16.gmra.mxu2 %vm459_vm1, %v1016_v23  ;;  %v756_v25 = vsel %vm748_vm12, %v742_v21, %v752_v22  ;;  %v3613_v21 = vld [vmem:[#allocation3 + $0x50] sm:$0xff]  ;;  %v3612_v22 = vld [vmem:[#allocation3 + $0x48] sm:$0xff]  ;;  %vm1126_vm12 = vcmask 785920  }
 0x317   : > { %785 = vrot.lane.b32.xlu1 %v756_v25, %s3852_s29  ;;  %v766_v26 = vrot.slane %v756_v25, 7  ;;  %v800_v27 = vrot.slane %v756_v25, 1  ;;  %1001 = vmatpush.bf16.msrb.mxu0 %v3613_v21  ;;  %v3611_v25 = vld [vmem:[#allocation3 + $0x40] sm:$0xff] }
 0x319   : > { %v767_v28 = vsel %vm203_vm3, %v764_v12, %v766_v26  ;;  %777 = vst.msk [vmem:[#allocation2 + $0x50] sm:$0x1] %vm467_vm9, %v766_v26  ;;  %810 = vrot.lane.b32.xlu0 %v800_v27, %s3853_s30  ;;  %v801_v29 = vsel %vm274_vm0, %v798_v15, %v800_v27 }
 0x31a   : > { %776 = vst.msk [vmem:[#allocation2 + $0x40] sm:$0xff] %vm459_vm1, %v767_v28  ;;  %808 = vrot.lane.b32.xlu2 %v801_v29, %s3853_s30 }
 0x31b   : > { %1002 = vmatpush.bf16.msrb.mxu0 %v3612_v22 }
 0x31f   : > { %1003 = vmatpush.bf16.msrb.mxu0 %v3611_v25  ;;  %v3619_v25 = vld [vmem:[#allocation3 + $0x78] sm:$0xff] }
 0x359   : > { %v780_v31 = vpop.permute.xlu2 %779 }
 0x35a   : > { %791 = vst.msk [vmem:[#allocation2 + $0x10] sm:$0xff] %vm494_vm13, %v780_v31 }
 0x36c   : > { %v807_v35 = vpop.permute.xlu2 %806 }
 0x374   : > { %v809_v39 = vpop.permute.xlu2 %808 }
 0x379   : > { %v782_v36 = vpop.permute.xlu0 %781 }
 0x37a   : > { %792 = vst.msk [vmem:[#allocation2 + $0x20] sm:$0xff] %vm494_vm13, %v782_v36 }
 0x37b   : > { %819 = vst.msk [vmem:[#allocation2 + $0x20] sm:$0xff] %vm547_vm15, %v807_v35 }
 0x37c   : > { %v805_v37 = vpop.permute.xlu1 %804 }
 0x37d   : > { %818 = vst.msk [vmem:[#allocation2 + $0x10] sm:$0xff] %vm547_vm15, %v805_v37 }
 0x381   : > { %v784_v38 = vpop.permute.xlu0 %783 }
 0x382   : > { %793 = vst.msk [vmem:[#allocation2 + $0x30] sm:$0xff] %vm494_vm13, %v784_v38  ;;  %v824_v41 = vld [vmem:[#allocation2 + $0x20] sm:$0xff] }
 0x383   : > { %820 = vst.msk [vmem:[#allocation2 + $0x30] sm:$0xff] %vm547_vm15, %v809_v39 }
 0x384   : > { %v823_v40 = vld [vmem:[#allocation2 + $0x10] sm:$0xff] }
 0x385   : > { %913 = vst.msk [vmem:[#allocation2 + $0x10] sm:$0x1] %vm467_vm9, %v3850_v14  ;;  %v827_v34 = vpack.c.bf16 %v824_v41, %v823_v40 }
 0x387   : > { %3032 = vmatmul.msk.bf16.vlgmr.msrb.gmra.mxu3 %vm597_vm2, %v827_v34 }
 0x389   : > { %v786_v42 = vpop.permute.xlu1 %785  ;;  %v1042_v39 = vpop.f32.mrf.mxu2 }
 0x38a   : > { %794 = vst.msk [vmem:[#allocation2 + $0x40] sm:$0xff] %vm494_vm13, %v786_v42  ;;  %v825_v43 = vld [vmem:[#allocation2 + $0x30] sm:$0xff] }
 0x38b   : > { %822 = vst.msk [vmem:[#allocation2 + $0x47] sm:$0x1] %vm557_vm6, %v3850_v14  ;;  %v811_v1 = vpop.permute.xlu0 %810 }
 0x38c   : > { %821 = vst.msk [vmem:[#allocation2 + $0x40] sm:$0x7f] %vm555_vm4, %v811_v1 }
 0x391   : > { %v1044_v41 = vpop.f32.mrf.mxu2 }
 0x393   : > { %v826_v44 = vld [vmem:[#allocation2 + $0x40] sm:$0xff] }
 0x394   : > { %v828_v45 = vpack.c.bf16 %v826_v44, %v825_v43  ;;  %v3782_v43 = vld [vmem:[%s4446_s2 + $0x4] ss:$0 sm:$0xff] }
 0x397   : > { %3033 = vmatmul.msk.bf16.gmra.mxu3 %vm597_vm2, %v828_v45  ;;  %v3780_v45 = vld [vmem:[%s4446_s2 + $0x5] ss:$0 sm:$0xff] }
 0x399   : > { %v1047_v42 = vpop.f32.mrf.mxu2 }
 0x3a1   : > { %v1049_v44 = vpop.f32.mrf.mxu2 }
 0x40a   : > { %v870_v47 = vpop.f32.mrf.mxu3 }
 0x40b   : > { %v871_v2 = vadd.f32 %v3781_v46, %v870_v47 }
 0x40d   : > { %v884_v8 = vmul.f32 0.1, %v871_v2  ;;  %vm880_vm8 = vcmp.ge.f32.partialorder %v871_v2, 0.0 }
 0x40f   : > { %v4158_v48 = vsel %vm880_vm8, %v871_v2, %v884_v8  ;;  %v1048_v2 = vadd.f32 %v3780_v45, %v1047_v42  ;;  %v1050_v8 = vadd.f32 %v3780_v45, %v1049_v44  ;;  %vm1130_vm8 = vcmask 778752  }
 0x410   : > { %v896_v49 = vrot.slane %v4158_v48, 7  ;;  %914 = vrot.lane.b32.xlu1 %v4158_v48, %s3852_s29  ;;  %v930_v52 = vrot.slane %v4158_v48, 1  ;;  %v3740_v48 = vld [vmem:[#allocation3 + $0x440] sm:$0xff] }
 0x412   : > { %908 = vst.msk [vmem:[#allocation2 + $0x10] sm:$0xfe] %vm457_vm14, %v896_v49  ;;  %v872_v13 = vpop.f32.mrf.mxu3 }
 0x413   : > { %v873_v18 = vadd.f32 %v3781_v46, %v872_v13 }
 0x415   : > { %v885_v50 = vmul.f32 0.1, %v873_v18  ;;  %vm881_vm10 = vcmp.ge.f32.partialorder %v873_v18, 0.0 }
 0x417   : > { %v889_v51 = vsel %vm881_vm10, %v873_v18, %v885_v50  ;;  %v1045_v18 = vadd.f32 %v3780_v45, %v1044_v41  ;;  %vm1128_vm10 = vcmask 784896  }
 0x418   : > { %v897_v53 = vrot.slane %v889_v51, 7  ;;  %v931_v54 = vrot.slane %v889_v51, 1  ;;  %916 = vrot.lane.b32.xlu2 %v889_v51, %s3852_s29 }
 0x41a   : > { %v898_v7 = vsel %vm203_vm3, %v896_v49, %v897_v53  ;;  %v875_v19 = vpop.f32.mrf.mxu3  ;;  %v932_v55 = vsel %vm274_vm0, %v930_v52, %v931_v54 }
 0x41b   : > { %909 = vst.msk [vmem:[#allocation2 + $0x20] sm:$0xff] %vm459_vm1, %v898_v7  ;;  %v876_v57 = vadd.f32 %v3781_v46, %v875_v19  ;;  %939 = vrot.lane.b32.xlu0 %v932_v55, %s3853_s30 }
 0x41d   : > { %v886_v58 = vmul.f32 0.1, %v876_v57  ;;  %vm882_vm14 = vcmp.ge.f32.partialorder %v876_v57, 0.0 }
 0x41f   : > { %v890_v59 = vsel %vm882_vm14, %v876_v57, %v886_v58  ;;  %v3615_v58 = vld [vmem:[#allocation3 + $0x480] sm:$0xff]  ;;  %vm1185_vm14 = vcmask 785408  }
 0x420   : > { %918 = vrot.lane.b32.xlu2 %v890_v59, %s3852_s29  ;;  %v899_v60 = vrot.slane %v890_v59, 7  ;;  %v933_v61 = vrot.slane %v890_v59, 1  ;;  %v3629_v59 = vld [vmem:[#allocation3 + $0xc8] sm:$0xff] }
 0x422   : > { %v900_v63 = vsel %vm203_vm3, %v897_v53, %v899_v60  ;;  %v877_v4 = vpop.f32.mrf.mxu3  ;;  %v934_v5 = vsel %vm274_vm0, %v931_v54, %v933_v61  ;;  %v1043_v54 = vadd.f32 %v3780_v45, %v1042_v39 }
 0x423   : > { %910 = vst.msk [vmem:[#allocation2 + $0x30] sm:$0xff] %vm459_vm1, %v900_v63  ;;  %v878_v6 = vadd.f32 %v3781_v46, %v877_v4  ;;  %941 = vrot.lane.b32.xlu1 %v934_v5, %s3853_s30  ;;  %v3620_v63 = vld [vmem:[#allocation3 + $0x80] sm:$0xff] }
 0x425   : > { %v887_v9 = vmul.f32 0.1, %v878_v6  ;;  %vm883_vm11 = vcmp.ge.f32.partialorder %v878_v6, 0.0 }
 0x427   : > { %v891_v10 = vsel %vm883_vm11, %v878_v6, %v887_v9 }
 0x428   : > { %920 = vrot.lane.b32.xlu0 %v891_v10, %s3852_s29  ;;  %v901_v11 = vrot.slane %v891_v10, 7  ;;  %v935_v12 = vrot.slane %v891_v10, 1 }
 0x42a   : > { %v902_v15 = vsel %vm203_vm3, %v899_v60, %v901_v11  ;;  %912 = vst.msk [vmem:[#allocation2 + $0x50] sm:$0x1] %vm467_vm9, %v901_v11  ;;  %945 = vrot.lane.b32.xlu2 %v935_v12, %s3853_s30  ;;  %v936_v16 = vsel %vm274_vm0, %v933_v61, %v935_v12  ;;  %vm1100_vm9 = vcmask 253952   ;;  %v3628_v60 = vld [vmem:[#allocation3 + $0xc0] sm:$0xff]  ;;  %v3621_v61 = vld [vmem:[#allocation3 + $0x88] sm:$0xff] }
 0x42b   : > { %911 = vst.msk [vmem:[#allocation2 + $0x40] sm:$0xff] %vm459_vm1, %v902_v15  ;;  %943 = vrot.lane.b32.xlu1 %v936_v16, %s3853_s30  ;;  %1191 = vmatpush.bf16.msra.mxu3 %v3621_v61  ;;  %v3632_v61 = vld [vmem:[#allocation3 + $0xe0] sm:$0xff] }
 0x42f   : > { %1192 = vmatpush.bf16.msra.mxu3 %v3620_v63  ;;  %v3631_v63 = vld [vmem:[#allocation3 + $0xd8] sm:$0xff] }
 0x433   : > { %1193 = vmatpush.bf16.msra.mxu3 %v3619_v25 }
 0x472   : > { %v917_v17 = vpop.permute.xlu2 %916 }
 0x473   : > { %927 = vst.msk [vmem:[#allocation2 + $0x20] sm:$0xff] %vm494_vm13, %v917_v17 }
 0x47a   : > { %v919_v23 = vpop.permute.xlu2 %918 }
 0x47b   : > { %928 = vst.msk [vmem:[#allocation2 + $0x30] sm:$0xff] %vm494_vm13, %v919_v23 }
 0x482   : > { %v915_v26 = vpop.permute.xlu1 %914 }
 0x483   : > { %926 = vst.msk [vmem:[#allocation2 + $0x10] sm:$0xff] %vm494_vm13, %v915_v26  ;;  %v3618_v26 = vld [vmem:[#allocation3 + $0x70] sm:$0xff] }
 0x484   : > { %v946_v32 = vpop.permute.xlu2 %945  ;;  %1194 = vmatpush.bf16.msra.mxu3 %v3618_v26 }
 0x48d   : > { %v940_v27 = vpop.permute.xlu0 %939 }
 0x48e   : > { %953 = vst.msk [vmem:[#allocation2 + $0x10] sm:$0xff] %vm547_vm15, %v940_v27  ;;  %v3617_v27 = vld [vmem:[#allocation3 + $0x68] sm:$0xff] }
 0x48f   : > { %1195 = vmatpush.bf16.msra.mxu3 %v3617_v27  ;;  %v1353_v27 = vld [vmem:[#allocation3 + $0x488] sm:$0xf] }
 0x495   : > { %v958_v28 = vld [vmem:[#allocation2 + $0x10] sm:$0xff]  ;;  %v942_v29 = vpop.permute.xlu1 %941 }
 0x496   : > { %1102 = vst.msk [vmem:[#allocation2 + $0x10] sm:$0x1] %vm1100_vm9, %v3850_v14 }
 0x497   : > { %954 = vst.msk [vmem:[#allocation2 + $0x20] sm:$0xff] %vm547_vm15, %v942_v29 }
 0x49a   : > { %v921_v31 = vpop.permute.xlu0 %920 }
 0x49b   : > { %929 = vst.msk [vmem:[#allocation2 + $0x40] sm:$0xff] %vm494_vm13, %v921_v31  ;;  %vm1065_vm13 = vcmask 261120  }
 0x49c   : > { %956 = vst.msk [vmem:[#allocation2 + $0x40] sm:$0x7f] %vm555_vm4, %v946_v32  ;;  %vm1109_vm4 = vcmask 523520  }
 0x49d   : > { %957 = vst.msk [vmem:[#allocation2 + $0x47] sm:$0x1] %vm557_vm6, %v3850_v14  ;;  %v944_v20 = vpop.permute.xlu1 %943 }
 0x49e   : > { %955 = vst.msk [vmem:[#allocation2 + $0x30] sm:$0xff] %vm547_vm15, %v944_v20  ;;  %v959_v33 = vld [vmem:[#allocation2 + $0x20] sm:$0xff] }
 0x49f   : > { %v962_v35 = vpack.c.bf16 %v959_v33, %v958_v28  ;;  %v3616_v28 = vld [vmem:[#allocation3 + $0x60] sm:$0xff] }
 0x4a0   : > { %1196 = vmatpush.bf16.msra.mxu3 %v3616_v28  ;;  %v3630_v28 = vld [vmem:[#allocation3 + $0xd0] sm:$0xff] }
 0x4a1   : > { %3046 = vmatmul.msk.bf16.vlgmr.msrb.gmra.mxu0 %vm597_vm2, %v962_v35 }
 0x4a4   : > { %v961_v37 = vld [vmem:[#allocation2 + $0x40] sm:$0xff] }
 0x4a5   : > { %v960_v36 = vld [vmem:[#allocation2 + $0x30] sm:$0xff] }
 0x4a6   : > { %v963_v38 = vpack.c.bf16 %v961_v37, %v960_v36  ;;  %v3784_v37 = vld [vmem:[%s4446_s2 + $0x6] ss:$0 sm:$0xff] }
 0x4b1   : > { %3047 = vmatmul.msk.bf16.gmra.mxu0 %vm597_vm2, %v963_v38  ;;  %vm1097_vm2 = vcmask 261121  }
 0x51e   : > { %v1005_v40 = vpop.f32.mrf.mxu0 }
 0x51f   : > { %v1006_v50 = vadd.f32 %v3782_v43, %v1005_v40 }
 0x521   : > { %v1052_v55 = vadd.f32 %v1043_v54, %v1006_v50  ;;  %v3624_v50 = vld [vmem:[#allocation3 + $0xa0] sm:$0xff]  ;;  %v3622_v54 = vld [vmem:[#allocation3 + $0x90] sm:$0xff] }
 0x526   : > { %v1007_v34 = vpop.f32.mrf.mxu0 }
 0x527   : > { %v1008_v49 = vadd.f32 %v3782_v43, %v1007_v34 }
 0x529   : > { %v1053_v7 = vadd.f32 %v1045_v18, %v1008_v49  ;;  %v3627_v49 = vld [vmem:[#allocation3 + $0xb8] sm:$0xff]  ;;  %v3625_v18 = vld [vmem:[#allocation3 + $0xa8] sm:$0xff] }
 0x52a   : > { %1303 = vmatpush.bf16.msra.mxu0 %v3627_v49 }
 0x52b   : > { %v1058_v57 = vpack.c.bf16 %v1053_v7, %v1052_v55 }
 0x52e   : > { %v1010_v1 = vpop.f32.mrf.mxu0 }
 0x52f   : > { %v1011_v46 = vadd.f32 %v3782_v43, %v1010_v1 }
 0x531   : > { %v1054_v51 = vadd.f32 %v1048_v2, %v1011_v46 }
 0x536   : > { %v1012_v47 = vpop.f32.mrf.mxu0 }
 0x537   : > { %v1013_v13 = vadd.f32 %v3782_v43, %v1012_v47 }
 0x539   : > { %v1055_v53 = vadd.f32 %v1050_v8, %v1013_v13  ;;  %v3626_v13 = vld [vmem:[#allocation3 + $0xb0] sm:$0xff] }
 0x53a   : > { %1304 = vmatpush.bf16.msra.mxu0 %v3626_v13 }
 0x53b   : > { %v1059_v19 = vpack.c.bf16 %v1055_v53, %v1054_v51  ;;  %v3623_v51 = vld [vmem:[#allocation3 + $0x98] sm:$0xff] }
 0x53d   : > { %1075 = vmatpush.bf16.msrb.mxu1 %v1059_v19 }
 0x53e   : > { %1305 = vmatpush.bf16.msra.mxu0 %v3625_v18 }
 0x541   : > { %1076 = vmatpush.bf16.msrb.mxu1 %v1058_v57 }
 0x542   : > { %1306 = vmatpush.bf16.msra.mxu0 %v3624_v50 }
 0x544   : > { %3058 = vmatmul.msk.bf16.vlgmr.msrb.gmra.mxu1 %vm1065_vm13, %v3615_v58 }
 0x545   : > { %1343 = vmatpush.bf16.msra.mxu1 %v3629_v59 }
 0x546   : > { %1307 = vmatpush.bf16.msra.mxu0 %v3623_v51 }
 0x549   : > { %1344 = vmatpush.bf16.msra.mxu1 %v3628_v60  ;;  %v3633_v60 = vld [vmem:[#allocation3 + $0xe8] sm:$0xff] }
 0x54a   : > { %1308 = vmatpush.bf16.msra.mxu0 %v3622_v54  ;;  %1413 = vmatpush.bf16.msra.mxu2 %v3633_v60  ;;  %v3661_v60 = vld [vmem:[#allocation3 + $0x1c8] sm:$0xff] }
 0x54e   : > { %1414 = vmatpush.bf16.msra.mxu2 %v3632_v61  ;;  %v3660_v61 = vld [vmem:[#allocation3 + $0x1c0] sm:$0xff] }
 0x552   : > { %1415 = vmatpush.bf16.msra.mxu2 %v3631_v63  ;;  %v3659_v63 = vld [vmem:[#allocation3 + $0x1b8] sm:$0xff] }
 0x556   : > { %1416 = vmatpush.bf16.msra.mxu2 %v3630_v28 }
 0x5c1   : > { %v1078_v4 = vpop.f32.mrf.mxu1 }
 0x5c2   : > { %v1085_v5 = vmul.f32 0.1, %v1078_v4  ;;  %vm1083_vm15 = vcmp.ge.f32.partialorder %v1078_v4, 0.0 }
 0x5c4   : > { %v4205_v6 = vsel %vm1083_vm15, %v1078_v4, %v1085_v5 }
 0x5c5   : > { %1103 = vrot.lane.b32.xlu0 %v4205_v6, %s3853_s30  ;;  %v1091_v9 = vrot.slane %v4205_v6, 7  ;;  %v1112_v16 = vrot.slane %v4205_v6, 1 }
 0x5c7   : > { %1098 = vst.msk [vmem:[#allocation2 + $0x10] sm:$0xfe] %vm1097_vm2, %v1091_v9 }
 0x5c9   : > { %v1080_v10 = vpop.f32.mrf.mxu1 }
 0x5ca   : > { %v1086_v11 = vmul.f32 0.1, %v1080_v10  ;;  %v1315_v12 = vpack.c.bf16 %v1080_v10, %v1078_v4  ;;  %vm1084_vm6 = vcmp.ge.f32.partialorder %v1080_v10, 0.0 }
 0x5cc   : > { %v1088_v15 = vsel %vm1084_vm6, %v1080_v10, %v1086_v11  ;;  %3117 = vmatmul.msk.bf16.vlgmr.msra.gmra.mxu1 %vm1065_vm13, %v1315_v12  ;;  %v3783_v10 = vld [vmem:[%s4446_s2 + $0x8] ss:$0 sm:$0xff] }
 0x5cd   : > { %1105 = vrot.lane.b32.xlu1 %v1088_v15, %s3853_s30  ;;  %v1092_v17 = vrot.slane %v1088_v15, 7  ;;  %v1113_v21 = vrot.slane %v1088_v15, 1 }
 0x5cf   : > { %v1093_v22 = vsel %vm203_vm3, %v1091_v9, %v1092_v17  ;;  %1101 = vst.msk [vmem:[#allocation2 + $0x30] sm:$0x1] %vm1100_vm9, %v1092_v17  ;;  %1119 = vrot.lane.b32.xlu0 %v1113_v21, %s3854_s15  ;;  %v1114_v23 = vsel %vm274_vm0, %v1112_v16, %v1113_v21  ;;  %v3785_v9 = vld [vmem:[%s4446_s2 + $0x7] ss:$0 sm:$0xff] }
 0x5d0   : > { %1099 = vst.msk [vmem:[#allocation2 + $0x20] sm:$0xff] %vm1065_vm13, %v1093_v22  ;;  %1117 = vrot.lane.b32.xlu2 %v1114_v23, %s3854_s15 }
 0x62a   : > { %v1118_v31 = vpop.permute.xlu2 %1117 }
 0x637   : > { %v1104_v29 = vpop.permute.xlu0 %1103 }
 0x638   : > { %1110 = vst.msk [vmem:[#allocation2 + $0x10] sm:$0xff] %vm1109_vm4, %v1104_v29 }
 0x639   : > { %1127 = vst.msk [vmem:[#allocation2 + $0x10] sm:$0xff] %vm1126_vm12, %v1118_v31 }
 0x63f   : > { %v1106_v32 = vpop.permute.xlu1 %1105 }
 0x640   : > { %1111 = vst.msk [vmem:[#allocation2 + $0x20] sm:$0xff] %vm1109_vm4, %v1106_v32  ;;  %v1132_v33 = vld [vmem:[#allocation2 + $0x10] sm:$0xff] }
 0x641   : > { %1131 = vst.msk [vmem:[#allocation2 + $0x27] sm:$0x1] %vm1130_vm8, %v3850_v14  ;;  %v1120_v20 = vpop.permute.xlu0 %1119 }
 0x642   : > { %1129 = vst.msk [vmem:[#allocation2 + $0x20] sm:$0x7f] %vm1128_vm10, %v1120_v20 }
 0x643   : > { %1220 = vst.msk [vmem:[#allocation2 + $0x10] sm:$0x1] %vm1100_vm9, %v3850_v14 }
 0x649   : > { %v1133_v35 = vld [vmem:[#allocation2 + $0x20] sm:$0xff]  ;;  %v1346_v4 = vpop.f32.mrf.mxu1 }
 0x64a   : > { %v1134_v36 = vpack.c.bf16 %v1133_v35, %v1132_v33  ;;  %v1347_v17 = vadd.f32 %v3783_v10, %v1346_v4  ;;  %v3786_v33 = vld [vmem:[%s4446_s2 + $0x9] ss:$0 sm:$0xff] }
 0x64c   : > { %3083 = vmatmul.msk.bf16.vlgmr.msra.gmra.mxu3 %vm1185_vm14, %v1134_v36 }
 0x651   : > { %v1348_v11 = vpop.f32.mrf.mxu1 }
 0x652   : > { %v1349_v21 = vadd.f32 %v3783_v10, %v1348_v11 }
 0x6cf   : > { %v1198_v38 = vpop.f32.mrf.mxu3 }
 0x6d0   : > { %v1199_v39 = vadd.f32 %v3784_v37, %v1198_v38 }
 0x6d2   : > { %v1205_v40 = vmul.f32 0.1, %v1199_v39  ;;  %vm1203_vm11 = vcmp.ge.f32.partialorder %v1199_v39, 0.0 }
 0x6d4   : > { %v4234_v41 = vsel %vm1203_vm11, %v1199_v39, %v1205_v40  ;;  %vm1883_vm11 = vcmask 518144  }
 0x6d5   : > { %1221 = vrot.lane.b32.xlu1 %v4234_v41, %s3853_s30  ;;  %v1211_v34 = vrot.slane %v4234_v41, 7  ;;  %v1229_v45 = vrot.slane %v4234_v41, 1 }
 0x6d7   : > { %v1200_v42 = vpop.f32.mrf.mxu3  ;;  %1217 = vst.msk [vmem:[#allocation2 + $0x10] sm:$0xfe] %vm1097_vm2, %v1211_v34 }
 0x6d8   : > { %v1201_v1 = vadd.f32 %v3784_v37, %v1200_v42 }
 0x6da   : > { %v1206_v43 = vmul.f32 0.1, %v1201_v1  ;;  %vm1204_vm15 = vcmp.ge.f32.partialorder %v1201_v1, 0.0 }
 0x6dc   : > { %v1208_v44 = vsel %vm1204_vm15, %v1201_v1, %v1206_v43  ;;  %vm1878_vm15 = vcmask 1043968  }
 0x6dd   : > { %1223 = vrot.lane.b32.xlu2 %v1208_v44, %s3853_s30  ;;  %v1212_v46 = vrot.slane %v1208_v44, 7  ;;  %v1230_v47 = vrot.slane %v1208_v44, 1 }
 0x6df   : > { %v1213_v2 = vsel %vm203_vm3, %v1211_v34, %v1212_v46  ;;  %1219 = vst.msk [vmem:[#allocation2 + $0x30] sm:$0x1] %vm1100_vm9, %v1212_v46  ;;  %1236 = vrot.lane.b32.xlu1 %v1230_v47, %s3854_s15  ;;  %v1231_v8 = vsel %vm274_vm0, %v1229_v45, %v1230_v47  ;;  %vm1498_vm3 = vcmask 516096   ;;  %vm1439_vm0 = vcmask 64512  }
 0x6e0   : > { %1218 = vst.msk [vmem:[#allocation2 + $0x20] sm:$0xff] %vm1065_vm13, %v1213_v2  ;;  %1234 = vrot.lane.b32.xlu0 %v1231_v8, %s3854_s15  ;;  %v1483_v2 = vld [vmem:[%s4446_s2 + $0x16] sm:$0x1] }
 0x6e1   : > { %1512 = vst.msk [vmem:[#allocation2 + $0x1f] sm:$0x1] %vm1498_vm3, %v3850_v14 }
 0x6e2   : > { %3746 = vpush %v1483_v2  ;;  %v3652_v2 = vld [vmem:[#allocation3 + $0x180] sm:$0xff] }
 0x737   : > { %v1224_v53 = vpop.permute.xlu2 %1223 }
 0x738   : > { %1228 = vst.msk [vmem:[#allocation2 + $0x20] sm:$0xff] %vm1109_vm4, %v1224_v53 }
 0x739   : > { %1244 = vst.msk [vmem:[#allocation2 + $0x27] sm:$0x1] %vm1130_vm8, %v3850_v14  ;;  %vm1504_vm8 = vcmask 1048064  }
 0x747   : > { %v1222_v7 = vpop.permute.xlu1 %1221 }
 0x748   : > { %1227 = vst.msk [vmem:[#allocation2 + $0x10] sm:$0xff] %vm1109_vm4, %v1222_v7  ;;  %vm1496_vm4 = vcmask 523265  }
 0x751   : > { %v1237_v19 = vpop.permute.xlu1 %1236 }
 0x752   : > { %1243 = vst.msk [vmem:[#allocation2 + $0x20] sm:$0x7f] %vm1128_vm10, %v1237_v19  ;;  %v1235_v55 = vpop.permute.xlu0 %1234 }
 0x753   : > { %1242 = vst.msk [vmem:[#allocation2 + $0x10] sm:$0xff] %vm1126_vm12, %v1235_v55  ;;  %v3645_v55 = vld [vmem:[#allocation3 + $0x148] sm:$0xff]  ;;  %vm1510_vm12 = vcmask 522240  }
 0x754   : > { %1635 = vmatpush.bf16.msrb.mxu2 %v3645_v55 }
 0x759   : > { %v1246_v57 = vld [vmem:[#allocation2 + $0x20] sm:$0xff] }
 0x75a   : > { %v1245_v58 = vld [vmem:[#allocation2 + $0x10] sm:$0xff] }
 0x75b   : > { %1500 = vst.msk [vmem:[#allocation2 + $0x10] sm:$0x1] %vm1498_vm3, %v3850_v14  ;;  %v1247_v59 = vpack.c.bf16 %v1246_v57, %v1245_v58  ;;  %v3644_v57 = vld [vmem:[#allocation3 + $0x140] sm:$0xff]  ;;  %v3643_v58 = vld [vmem:[#allocation3 + $0x138] sm:$0xff] }
 0x75c   : > { %1636 = vmatpush.bf16.msrb.mxu2 %v3644_v57  ;;  %v3647_v57 = vld [vmem:[#allocation3 + $0x158] sm:$0xff] }
 0x75d   : > { %3108 = vmatmul.msk.bf16.vlgmr.msra.gmra.mxu0 %vm1185_vm14, %v1247_v59  ;;  %v3642_v59 = vld [vmem:[#allocation3 + $0x130] sm:$0xff]  ;;  %vm1872_vm14 = vcmask 520193  }
 0x760   : > { %1637 = vmatpush.bf16.msrb.mxu2 %v3643_v58  ;;  %v3646_v58 = vld [vmem:[#allocation3 + $0x150] sm:$0xff] }
 0x764   : > { %1638 = vmatpush.bf16.msrb.mxu2 %v3642_v59 }
 0x7da   : > { %v1310_v5 = vpop.f32.mrf.mxu0 }
 0x7db   : > { %v1311_v12 = vadd.f32 %v3785_v9, %v1310_v5 }
 0x7dd   : > { %v1351_v23 = vadd.f32 %v1347_v17, %v1311_v12  ;;  %v3641_v17 = vld [vmem:[#allocation3 + $0x128] sm:$0xff] }
 0x7de   : > { %1618 = vmatpush.bf16.msrb.mxu0 %v3641_v17 }
 0x7e2   : > { %v1312_v15 = vpop.f32.mrf.mxu0 }
 0x7e3   : > { %v1313_v22 = vadd.f32 %v3785_v9, %v1312_v15  ;;  %v3658_v9 = vld [vmem:[#allocation3 + $0x1b0] sm:$0xff] }
 0x7e5   : > { %v1352_v25 = vadd.f32 %v1349_v21, %v1313_v22 }
 0x7e7   : > { %v1354_v26 = vpack.c.bf16 %v1352_v25, %v1351_v23  ;;  %v3640_v25 = vld [vmem:[#allocation3 + $0x120] sm:$0xff] }
 0x7e8   : > { %1619 = vmatpush.bf16.msrb.mxu0 %v3640_v25  ;;  %v1845_v25 = vld [vmem:[#allocation3 + $0x490] sm:$0x3] }
 0x7e9   : > { %1365 = vmatpush.bf16.msrb.mxu3 %v1354_v26  ;;  %v3639_v26 = vld [vmem:[#allocation3 + $0x118] sm:$0xff] }
 0x7ec   : > { %3118 = vmatmul.msk.bf16.vlgmr.msrb.gmra.mxu3 %vm459_vm1, %v1353_v27  ;;  %1620 = vmatpush.bf16.msrb.mxu0 %v3639_v26  ;;  %v3638_v27 = vld [vmem:[#allocation3 + $0x110] sm:$0xff]  ;;  %v3673_v26 = vld [vmem:[#allocation3 + $0x228] sm:$0xff] }
 0x7f0   : > { %1621 = vmatpush.bf16.msrb.mxu0 %v3638_v27  ;;  %v3672_v27 = vld [vmem:[#allocation3 + $0x220] sm:$0xff] }
 0x86f   : > { %v4268_v29 = vpop.f32.mrf.mxu3 }
 0x870   : > { %v1371_v31 = vpack.c.bf16 %v4268_v29, %v4268_v29 }
 0x872   : > { %3135 = vmatmul.msk.bf16.vlgmr.msra.gmra.mxu2 %vm719_vm7, %v1371_v31  ;;  %v1468_v32 = vsel %vm365_vm5, %v1371_v31, 0  ;;  %v3637_v31 = vld [vmem:[#allocation3 + $0x108] sm:$0xff] }
 0x873   : > { %1477 = vmatpush.bf16.msra.mxu3 %v1468_v32  ;;  %1835 = vmatpush.bf16.msra.mxu2 %v3661_v60  ;;  %v3636_v32 = vld [vmem:[#allocation3 + $0x100] sm:$0xff] }
 0x874   : > { %1622 = vmatpush.bf16.msrb.mxu0 %v3637_v31  ;;  %v3689_v31 = vld [vmem:[#allocation3 + $0x2a8] sm:$0xff] }
 0x877   : > { %v1369_v20 = vpop.f32.mrf.mxu3  ;;  %1836 = vmatpush.bf16.msra.mxu2 %v3660_v61 }
 0x878   : > { %1623 = vmatpush.bf16.msrb.mxu0 %v3636_v32  ;;  %v3688_v32 = vld [vmem:[#allocation3 + $0x2a0] sm:$0xff] }
 0x87b   : > { %1837 = vmatpush.bf16.msra.mxu2 %v3659_v63 }
 0x87f   : > { %1838 = vmatpush.bf16.msra.mxu2 %v3658_v9  ;;  %v3787_v9 = vld [vmem:[%s4446_s2 + $0xc] ss:$0 sm:$0xff] }
 0x8f5   : > { %v1418_v35 = vpop.f32.mrf.mxu2 }
 0x8f6   : > { %v1419_v36 = vadd.f32 %v3786_v33, %v1418_v35  ;;  %v3635_v33 = vld [vmem:[#allocation3 + $0xf8] sm:$0xff]  ;;  %v3634_v35 = vld [vmem:[#allocation3 + $0xf0] sm:$0xff] }
 0x8f7   : > { %1624 = vmatpush.bf16.msrb.mxu0 %v3635_v33  ;;  %v3686_v33 = vld [vmem:[#allocation3 + $0x290] sm:$0xff] }
 0x8f8   : > { %v1422_v37 = vpack.c.bf16 %v1419_v36, %v1419_v36 }
 0x8fa   : > { %v1424_v38 = vsel %vm459_vm1, %v1422_v37, 0 }
 0x8fb   : > { %1433 = vmatpush.bf16.xpose.msrb.mxu1 %v1424_v38  ;;  %1625 = vmatpush.bf16.msrb.mxu0 %v3634_v35 }
 0x8fd   : > { %v1420_v39 = vpop.f32.mrf.mxu2 }
 0x902   : > { %3136 = vmatmul.msk.bf16.vlgmr.msrb.gmra.mxu1 %vm459_vm1, %v1422_v37 }
 0x97f   : > { %v1435_v40 = vpop.f32.mrf.mxu1 }
 0x980   : > { %v1440_v34 = vsel %vm1439_vm0, %v1435_v40, -inf }
 0x981   : > { %1441 = vmax.xlane.f32.xlu2 %v1440_v34 }
 0x987   : > { %v1437_v42 = vpop.f32.mrf.mxu1 }
 0x9f4   : > { %v1442_v1 = vpop.xlane.xlu2 %1441 }
 0x9f5   : > { %v1443_v43 = vsub.f32 %v1435_v40, %v1442_v1  ;;  %v3657_v1 = vld [vmem:[#allocation3 + $0x1a8] sm:$0xff] }
 0x9f6   : > { %1784 = vmatpush.bf16.msrb.mxu3 %v3657_v1  ;;  %v3667_v1 = vld [vmem:[#allocation3 + $0x1f8] sm:$0xff] }
 0x9f7   : > { %v1444_v44 = vmul.f32 1.442695, %v1443_v43  ;;  %v3656_v43 = vld [vmem:[#allocation3 + $0x1a0] sm:$0xff] }
 0x9f9   : > { %3799 = vpow2.f32 %v1444_v44  ;;  %v3655_v44 = vld [vmem:[#allocation3 + $0x198] sm:$0xff] }
 0x9fa   : > { %1785 = vmatpush.bf16.msrb.mxu3 %v3656_v43  ;;  %v3666_v43 = vld [vmem:[#allocation3 + $0x1f0] sm:$0xff] }
 0x9fe   : > { %1786 = vmatpush.bf16.msrb.mxu3 %v3655_v44 }
 0x9ff   : > { %v3800_v46 = vpop.eup %3799 }
 0xa00   : > { %v1446_v47 = vsel %vm1439_vm0, %v3800_v46, 0.0 }
 0xa01   : > { %1447 = vadd.xlane.f32.xlu0 %v1446_v47  ;;  %v3653_v47 = vld [vmem:[#allocation3 + $0x188] sm:$0xff] }
 0xa02   : > { %1767 = vmatpush.bf16.msra.mxu1 %v3653_v47  ;;  %v3665_v47 = vld [vmem:[#allocation3 + $0x1e8] sm:$0xff] }
 0xa06   : > { %1768 = vmatpush.bf16.msra.mxu1 %v3652_v2  ;;  %v3664_v2 = vld [vmem:[#allocation3 + $0x1e0] sm:$0xff] }
 0xa15   : > { %290 = vrot.lane.b32.xlu0 %v275_v3, %s3849_s26  ;;  %s3747_s26 = spop %3746 }
 0xa16   : > { %v1486_v4 = vstv %s3747_s26 }
 0xa1d   : > { %1115 = vrot.lane.b32.xlu0 %v1112_v16, %s3854_s15 }
 0xa74   : > { %v1448_v8 = vpop.xlane.xlu0 %1447 }
 0xa75   : > { %3801 = vrcp.f32 %v1448_v8  ;;  %v1460_v50 = vand.u32 2147483648, %v1448_v8  ;;  %v1458_v53 = vand.u32 2147483647, %v1448_v8  ;;  %vm1454_vm9 = vweird.f32 %v1448_v8 }
 0xa77   : > { %v1461_v3 = vor.u32 1.1754944e-38, %v1460_v50  ;;  %vm1459_vm2 = vcmp.eq.f32.partialorder %v1458_v53, 8.507059e+37  ;;  %v3650_v50 = vld [vmem:[#allocation3 + $0x170] sm:$0xff] }
 0xa7b   : > { %v3802_v49 = vpop.eup %3801 }
 0xa7c   : > { %v1450_v13 = vmul.f32 %v3802_v49, %v1448_v8  ;;  %vm1455_vm1 = vweird.f32 %v3802_v49  ;;  %v3788_v8 = vld [vmem:[%s4446_s2 + $0xa] ss:$0 sm:$0xff] }
 0xa7d   : > { %vm1456_vm13 = vmor %vm1454_vm9, %vm1455_vm1  ;;  %vm2220_vm9 = vcmask 519168  }
 0xa7e   : > { %v1451_v18 = vsub.f32 1.0, %v1450_v13 }
 0xa80   : > { %v1452_v51 = vmul.f32 %v3802_v49, %v1451_v18 }
 0xa82   : > { %v1453_v0 = vadd.f32 %v3802_v49, %v1452_v51 }
 0xa84   : > { %v1457_v6 = vsel %vm1456_vm13, %v3802_v49, %v1453_v0  ;;  %v3651_v49 = vld [vmem:[#allocation3 + $0x178] sm:$0xff]  ;;  %v3649_v0 = vld [vmem:[#allocation3 + $0x168] sm:$0xff]  ;;  %vm2235_vm13 = vcmask 517120  }
 0xa85   : > { %v1462_v16 = vsel %vm1459_vm2, %v1461_v3, %v1457_v6  ;;  %1769 = vmatpush.bf16.msra.mxu1 %v3651_v49  ;;  %v3663_v49 = vld [vmem:[#allocation3 + $0x1d8] sm:$0xff]  ;;  %vm2229_vm2 = vcmask 1042944  }
 0xa86   : > { %v1463_v54 = vmul.f32 %v3800_v46, %v1462_v16  ;;  %v3654_v46 = vld [vmem:[#allocation3 + $0x190] sm:$0xff] }
 0xa87   : > { %v291_v7 = vpop.permute.xlu0 %290  ;;  %1787 = vmatpush.bf16.msrb.mxu3 %v3654_v46 }
 0xa88   : > { %v1464_v19 = vpack.c.bf16 %v1463_v54, %v1463_v54  ;;  %v3648_v7 = vld [vmem:[#allocation3 + $0x160] sm:$0xff] }
 0xa89   : > { %1770 = vmatpush.bf16.msra.mxu1 %v3650_v50 }
 0xa8a   : > { %3137 = vmatmul.msk.bf16.vlgmr.msra.gmra.mxu3 %vm1439_vm0, %v1464_v19 }
 0xa8d   : > { %1771 = vmatpush.bf16.msra.mxu1 %v3649_v0 }
 0xa91   : > { %1772 = vmatpush.bf16.msra.mxu1 %v3648_v7  ;;  %v3683_v7 = vld [vmem:[#allocation3 + $0x278] sm:$0xff] }
 0xa95   : > { %1773 = vmatpush.bf16.msra.mxu1 %v3647_v57  ;;  %v3680_v57 = vld [vmem:[#allocation3 + $0x260] sm:$0xff] }
 0xa99   : > { %1774 = vmatpush.bf16.msra.mxu1 %v3646_v58  ;;  %v3679_v58 = vld [vmem:[#allocation3 + $0x258] sm:$0xff] }
 0xb0d   : > { %v1479_v5 = vpop.f32.mrf.mxu3 }
 0xb0e   : > { %v1488_v10 = vmul.f32 %v1486_v4, %v1479_v5  ;;  %v3789_v5 = vld [vmem:[%s4446_s2 + $0xb] ss:$0 sm:$0xff] }
 0xb10   : > { %v1489_v11 = vadd.f32 %v1488_v10, %v4268_v29 }
 0xb12   : > { %vm1490_vm6 = vcmp.ge.f32.partialorder %v1489_v11, 0.0  ;;  %v1491_v12 = vmul.f32 0.1, %v1489_v11  ;;  %v1793_v20 = vpack.c.bf16 %v1489_v11, %v1489_v11 }
 0xb14   : > { %v1492_v15 = vsel %vm1490_vm6, %v1489_v11, %v1491_v12 }
 0xb15   : > { %1501 = vrot.lane.b32.xlu1 %v1492_v15, %s3854_s15  ;;  %v1494_v21 = vrot.slane %v1492_v15, 7  ;;  %v1506_v22 = vrot.slane %v1492_v15, 1  ;;  %v1481_v23 = vpop.f32.mrf.mxu3 }
 0xb17   : > { %1497 = vst.msk [vmem:[#allocation2 + $0x10] sm:$0xfe] %vm1496_vm4, %v1494_v21 }
 0xb18   : > { %1499 = vst.msk [vmem:[#allocation2 + $0x20] sm:$0x1] %vm1498_vm3, %v1494_v21 }
 0xb19   : > { %1511 = vst.msk [vmem:[#allocation2 + $0x18] sm:$0x7f] %vm1510_vm12, %v1506_v22 }
 0xb20   : > { %v1514_v28 = vld [vmem:[#allocation2 + $0x18] sm:$0xff] }
 0xb21   : > { %1661 = vst.msk [vmem:[#allocation2 + $0x1f] sm:$0x1] %vm1498_vm3, %v3850_v14  ;;  %v1516_v29 = vpack.c.bf16 %v1514_v28, %v1514_v28  ;;  %v3671_v28 = vld [vmem:[#allocation3 + $0x218] sm:$0xff] }
 0xb23   : > { %3186 = vmatmul.msk.bf16.vlgmr.msrb.gmra.mxu2 %vm719_vm7, %v1516_v29  ;;  %v3670_v29 = vld [vmem:[#allocation3 + $0x210] sm:$0xff] }
 0xb24   : > { %2008 = vmatpush.bf16.msrb.mxu2 %v3673_v26 }
 0xb28   : > { %2009 = vmatpush.bf16.msrb.mxu2 %v3672_v27 }
 0xb2c   : > { %2010 = vmatpush.bf16.msrb.mxu2 %v3671_v28 }
 0xb30   : > { %2011 = vmatpush.bf16.msrb.mxu2 %v3670_v29 }
 0xb33   : > { %3252 = vmatmul.msk.bf16.vlgmr.msra.gmra.mxu2 %vm719_vm7, %v1793_v20  ;;  %v3687_v20 = vld [vmem:[#allocation3 + $0x298] sm:$0xff] }
 0xb34   : > { %2207 = vmatpush.bf16.msra.mxu2 %v3689_v31 }
 0xb38   : > { %2208 = vmatpush.bf16.msra.mxu2 %v3688_v32  ;;  %v3701_v32 = vld [vmem:[#allocation3 + $0x3e8] sm:$0xff] }
 0xb3c   : > { %2209 = vmatpush.bf16.msra.mxu2 %v3687_v20  ;;  %v3700_v20 = vld [vmem:[#allocation3 + $0x3e0] sm:$0xff] }
 0xb40   : > { %2210 = vmatpush.bf16.msra.mxu2 %v3686_v33  ;;  %v3699_v33 = vld [vmem:[#allocation3 + $0x3d8] sm:$0xff] }
 0xb87   : > { %v1502_v36 = vpop.permute.xlu1 %1501 }
 0xb88   : > { %1505 = vst.msk [vmem:[#allocation2 + $0x10] sm:$0xff] %vm1504_vm8, %v1502_v36 }
 0xb8f   : > { %v1513_v37 = vld [vmem:[#allocation2 + $0x10] sm:$0xff] }
 0xb90   : > { %v1515_v38 = vpack.c.bf16 %v1513_v37, %v1513_v37  ;;  %1652 = vst.msk [vmem:[#allocation2 + $0x10] sm:$0x1] %vm1498_vm3, %v3850_v14  ;;  %v3669_v37 = vld [vmem:[#allocation3 + $0x208] sm:$0xff] }
 0xb91   : > { %1991 = vmatpush.bf16.msra.mxu0 %v3669_v37  ;;  %v3698_v37 = vld [vmem:[#allocation3 + $0x3d0] sm:$0xff] }
 0xb92   : > { %1626 = vmatmul.bf16.vlgmr.msrb.gmra.mxu0 %v1515_v38 }
 0xba6   : > { %v1640_v39 = vpop.f32.mrf.mxu2 }
 0xbae   : > { %v1642_v40 = vpop.f32.mrf.mxu2 }
 0xbb6   : > { %v1840_v34 = vpop.f32.mrf.mxu2 }
 0xbb7   : > { %v1841_v12 = vadd.f32 %v3787_v9, %v1840_v34  ;;  %v3668_v34 = vld [vmem:[#allocation3 + $0x200] sm:$0xff] }
 0xbb8   : > { %1992 = vmatpush.bf16.msra.mxu0 %v3668_v34  ;;  %v3711_v34 = vld [vmem:[#allocation3 + $0x2f8] sm:$0xff] }
 0xbbc   : > { %1993 = vmatpush.bf16.msra.mxu0 %v3667_v1  ;;  %v3792_v1 = vld [vmem:[%s4446_s2 + $0xe] ss:$0 sm:$0xff] }
 0xbbe   : > { %v1842_v42 = vpop.f32.mrf.mxu2 }
 0xbc0   : > { %1994 = vmatpush.bf16.msra.mxu0 %v3666_v43  ;;  %v3790_v43 = vld [vmem:[%s4446_s2 + $0xf] ss:$0 sm:$0xff] }
 0xbc4   : > { %1995 = vmatpush.bf16.msra.mxu0 %v3665_v47  ;;  %v3709_v47 = vld [vmem:[#allocation3 + $0x2e8] sm:$0xff] }
 0xbc8   : > { %1996 = vmatpush.bf16.msra.mxu0 %v3664_v2 }
 0xbcc   : > { %1997 = vmatpush.bf16.msra.mxu0 %v3663_v49  ;;  %v3696_v49 = vld [vmem:[#allocation3 + $0x3c0] sm:$0xff] }
 0xc0f   : > { %v1627_v13 = vpop.f32.mrf.mxu0 }
 0xc10   : > { %v1628_v18 = vadd.f32 %v3788_v8, %v1627_v13  ;;  %v3662_v13 = vld [vmem:[#allocation3 + $0x1d0] sm:$0xff] }
 0xc11   : > { %1998 = vmatpush.bf16.msra.mxu0 %v3662_v13  ;;  %v3708_v13 = vld [vmem:[#allocation3 + $0x2e0] sm:$0xff] }
 0xc12   : > { %v1641_v51 = vadd.f32 %v1640_v39, %v1628_v18 }
 0xc14   : > { %vm1644_vm10 = vcmp.ge.f32.partialorder %v1641_v51, 0.0  ;;  %v1645_v53 = vmul.f32 0.1, %v1641_v51 }
 0xc15   : > { %2359 = vmatpush.bf16.msrb.mxu0 %v3701_v32  ;;  %v3724_v32 = vld [vmem:[#allocation3 + $0x360] sm:$0xff] }
 0xc16   : > { %v1646_v3 = vsel %vm1644_vm10, %v1641_v51, %v1645_v53 }
 0xc17   : > { %v1629_v6 = vpop.f32.mrf.mxu0  ;;  %1653 = vrot.lane.b32.xlu1 %v1646_v3, %s3854_s15  ;;  %v1648_v16 = vrot.slane %v1646_v3, 7  ;;  %v1657_v54 = vrot.slane %v1646_v3, 1 }
 0xc19   : > { %1650 = vst.msk [vmem:[#allocation2 + $0x10] sm:$0xfe] %vm1496_vm4, %v1648_v16  ;;  %2360 = vmatpush.bf16.msrb.mxu0 %v3700_v20  ;;  %v3723_v20 = vld [vmem:[#allocation3 + $0x358] sm:$0xff] }
 0xc1a   : > { %1651 = vst.msk [vmem:[#allocation2 + $0x20] sm:$0x1] %vm1498_vm3, %v1648_v16  ;;  %v3685_v16 = vld [vmem:[#allocation3 + $0x288] sm:$0xff] }
 0xc1b   : > { %1660 = vst.msk [vmem:[#allocation2 + $0x18] sm:$0x7f] %vm1510_vm12, %v1657_v54  ;;  %v3684_v54 = vld [vmem:[#allocation3 + $0x280] sm:$0xff]  ;;  %vm2905_vm12 = vcmask 41992  }
 0xc1d   : > { %2361 = vmatpush.bf16.msrb.mxu0 %v3699_v33  ;;  %v3722_v33 = vld [vmem:[#allocation3 + $0x350] sm:$0xff] }
 0xc21   : > { %2362 = vmatpush.bf16.msrb.mxu0 %v3698_v37 }
 0xc22   : > { %v1663_v19 = vld [vmem:[#allocation2 + $0x18] sm:$0xff] }
 0xc23   : > { %1885 = vst.msk [vmem:[#allocation2 + $0x1b] sm:$0x1] %vm1498_vm3, %v3850_v14  ;;  %v1665_v55 = vpack.c.bf16 %v1663_v19, %v1663_v19  ;;  %v3682_v19 = vld [vmem:[#allocation3 + $0x270] sm:$0xff] }
 0xc25   : > { %3235 = vmatmul.msk.bf16.vlgmr.msrb.gmra.mxu3 %vm719_vm7, %v1665_v55  ;;  %v3681_v55 = vld [vmem:[#allocation3 + $0x268] sm:$0xff] }
 0xc26   : > { %2139 = vmatpush.bf16.msrb.mxu1 %v3681_v55 }
 0xc2a   : > { %2140 = vmatpush.bf16.msrb.mxu1 %v3680_v57 }
 0xc2e   : > { %2141 = vmatpush.bf16.msrb.mxu1 %v3679_v58  ;;  %v3692_v58 = vld [vmem:[#allocation3 + $0x3a0] sm:$0xff] }
 0xc89   : > { %v1654_v59 = vpop.permute.xlu1 %1653 }
 0xc8a   : > { %1656 = vst.msk [vmem:[#allocation2 + $0x10] sm:$0xff] %vm1504_vm8, %v1654_v59  ;;  %v3791_v59 = vld [vmem:[%s4446_s2 + $0xd] ss:$0 sm:$0xff] }
 0xc91   : > { %v1662_v60 = vld [vmem:[#allocation2 + $0x10] sm:$0xff] }
 0xc92   : > { %1874 = vst.msk [vmem:[#allocation2 + $0x10] sm:$0x1] %vm1498_vm3, %v3850_v14  ;;  %v1664_v61 = vpack.c.bf16 %v1662_v60, %v1662_v60  ;;  %v3678_v60 = vld [vmem:[#allocation3 + $0x250] sm:$0xff] }
 0xc93   : > { %2142 = vmatpush.bf16.msrb.mxu1 %v3678_v60 }
 0xc94   : > { %1775 = vmatmul.bf16.vlgmr.msra.gmra.mxu1 %v1664_v61 }
 0xca8   : > { %v1789_v63 = vpop.f32.mrf.mxu3 }
 0xcb0   : > { %v1791_v4 = vpop.f32.mrf.mxu3 }
 0xd11   : > { %v1776_v10 = vpop.f32.mrf.mxu1 }
 0xd12   : > { %v1777_v11 = vadd.f32 %v3789_v5, %v1776_v10  ;;  %v3677_v5 = vld [vmem:[#allocation3 + $0x248] sm:$0xff] }
 0xd13   : > { %2143 = vmatpush.bf16.msrb.mxu1 %v3677_v5  ;;  %v3691_v5 = vld [vmem:[#allocation3 + $0x398] sm:$0xff] }
 0xd14   : > { %v1790_v15 = vadd.f32 %v1789_v63, %v1777_v11  ;;  %v3676_v11 = vld [vmem:[#allocation3 + $0x240] sm:$0xff] }
 0xd16   : > { %v1844_v17 = vadd.f32 %v1841_v12, %v1790_v15 }
 0xd17   : > { %2144 = vmatpush.bf16.msrb.mxu1 %v3676_v11  ;;  %v3704_v11 = vld [vmem:[#allocation3 + $0x2c0] sm:$0xff] }
 0xd18   : > { %v1846_v21 = vpack.c.bf16 %v1844_v17, %v1844_v17 }
 0xd19   : > { %v1778_v22 = vpop.f32.mrf.mxu1 }
 0xd1a   : > { %v1851_v23 = vsel %vm365_vm5, %v1846_v21, 0 }
 0xd1b   : > { %1860 = vmatpush.bf16.msra.mxu3 %v1851_v23  ;;  %v3675_v23 = vld [vmem:[#allocation3 + $0x238] sm:$0xff] }
 0xd1c   : > { %2145 = vmatpush.bf16.msrb.mxu1 %v3675_v23 }
 0xd1e   : > { %3253 = vmatmul.msk.bf16.vlgmr.msra.gmra.mxu3 %vm1439_vm0, %v1845_v25  ;;  %v3674_v25 = vld [vmem:[#allocation3 + $0x230] sm:$0xff] }
 0xd1f   : > { %2156 = vmatpush.bf16.msrb.mxu3 %v3685_v16 }
 0xd20   : > { %2146 = vmatpush.bf16.msrb.mxu1 %v3674_v25 }
 0xd23   : > { %2157 = vmatpush.bf16.msrb.mxu3 %v3684_v54 }
 0xd27   : > { %2158 = vmatpush.bf16.msrb.mxu3 %v3683_v7 }
 0xd2b   : > { %2159 = vmatpush.bf16.msrb.mxu3 %v3682_v19  ;;  %v3694_v19 = vld [vmem:[#allocation3 + $0x3b0] sm:$0xff] }
 0xda1   : > { %v1862_v35 = vpop.f32.mrf.mxu3 }
 0xda2   : > { %v1867_v36 = vmul.f32 0.1, %v1862_v35  ;;  %vm1866_vm5 = vcmp.ge.f32.partialorder %v1862_v35, 0.0  ;;  %v4339_v8 = vpack.c.bf16 %v1862_v35, %v1862_v35 }
 0xda4   : > { %v4324_v38 = vsel %vm1866_vm5, %v1862_v35, %v1867_v36  ;;  %v3713_v35 = vld [vmem:[#allocation3 + $0x308] sm:$0xff]  ;;  %v3712_v36 = vld [vmem:[#allocation3 + $0x300] sm:$0xff] }
 0xda5   : > { %1875 = vrot.lane.b32.xlu1 %v4324_v38, %s3854_s15  ;;  %v1870_v39 = vrot.slane %v4324_v38, 7  ;;  %v1880_v40 = vrot.slane %v4324_v38, 1  ;;  %2496 = vmatpush.bf16.msra.mxu1 %v3713_v35  ;;  %v3793_v35 = vld [vmem:[%s4446_s2 + $0x13] ss:$0 sm:$0xff] }
 0xda7   : > { %1873 = vst.msk [vmem:[#allocation2 + $0x10] sm:$0x1e] %vm1872_vm14, %v1870_v39 }
 0xda8   : > { %1884 = vst.msk [vmem:[#allocation2 + $0x18] sm:$0x7] %vm1883_vm11, %v1880_v40 }
 0xda9   : > { %v1864_v42 = vpop.f32.mrf.mxu3  ;;  %2497 = vmatpush.bf16.msra.mxu1 %v3712_v36  ;;  %v3721_v36 = vld [vmem:[#allocation3 + $0x348] sm:$0xff] }
 0xdaa   : > { %v3710_v42 = vld [vmem:[#allocation3 + $0x2f0] sm:$0xff] }
 0xdad   : > { %2498 = vmatpush.bf16.msra.mxu1 %v3711_v34 }
 0xdaf   : > { %v1887_v44 = vld [vmem:[#allocation2 + $0x18] sm:$0xf] }
 0xdb0   : > { %v1889_v46 = vpack.c.bf16 %v1887_v44, %v1887_v44  ;;  %2033 = vst.msk [vmem:[#allocation2 + $0x1b] sm:$0x1] %vm1498_vm3, %v3850_v14  ;;  %v3697_v44 = vld [vmem:[#allocation3 + $0x3c8] sm:$0xff] }
 0xdb1   : > { %2499 = vmatpush.bf16.msra.mxu1 %v3710_v42  ;;  %2342 = vmatpush.bf16.msra.mxu3 %v3697_v44  ;;  %v3719_v42 = vld [vmem:[#allocation3 + $0x338] sm:$0xff] }
 0xdb2   : > { %3302 = vmatmul.msk.bf16.vlgmr.msrb.gmra.mxu2 %vm719_vm7, %v1889_v46 }
 0xdb3   : > { %2479 = vmatpush.bf16.msrb.mxu2 %v3709_v47 }
 0xdb5   : > { %2343 = vmatpush.bf16.msra.mxu3 %v3696_v49  ;;  %v3717_v49 = vld [vmem:[#allocation3 + $0x328] sm:$0xff] }
 0xdb7   : > { %2480 = vmatpush.bf16.msrb.mxu2 %v3708_v13 }
 0xdc2   : > { %3368 = vmatmul.msk.bf16.vlgmr.msra.gmra.mxu2 %vm719_vm7, %v4339_v8 }
 0xe17   : > { %v4343_v18 = vpop.permute.xlu1 %1875 }
 0xe18   : > { %1879 = vst.msk [vmem:[#allocation2 + $0x10] sm:$0xf] %vm1878_vm15, %v4343_v18 }
 0xe1f   : > { %v1886_v50 = vld [vmem:[#allocation2 + $0x10] sm:$0xf] }
 0xe20   : > { %2024 = vst.msk [vmem:[#allocation2 + $0x10] sm:$0x1] %vm1498_vm3, %v3850_v14  ;;  %v1888_v51 = vpack.c.bf16 %v1886_v50, %v1886_v50 }
 0xe22   : > { %1999 = vmatmul.bf16.vlgmr.msra.gmra.mxu0 %v1888_v51 }
 0xe23   : > { %2627 = vmatpush.bf16.msra.mxu0 %v3721_v36 }
 0xe35   : > { %v2013_v53 = vpop.f32.mrf.mxu2 }
 0xe3d   : > { %v2015_v0 = vpop.f32.mrf.mxu2 }
 0xe3e   : > { %v3695_v0 = vld [vmem:[#allocation3 + $0x3b8] sm:$0xff] }
 0xe3f   : > { %2344 = vmatpush.bf16.msra.mxu3 %v3695_v0 }
 0xe43   : > { %2345 = vmatpush.bf16.msra.mxu3 %v3694_v19 }
 0xe45   : > { %v4349_v3 = vpop.f32.mrf.mxu2 }
 0xe46   : > { %v2213_v50 = vadd.f32 %v3790_v43, %v4349_v3  ;;  %v3693_v3 = vld [vmem:[#allocation3 + $0x3a8] sm:$0xff] }
 0xe47   : > { %2346 = vmatpush.bf16.msra.mxu3 %v3693_v3 }
 0xe4b   : > { %2347 = vmatpush.bf16.msra.mxu3 %v3692_v58 }
 0xe4d   : > { %v2214_v6 = vpop.f32.mrf.mxu2 }
 0xe4e   : > { %v3707_v6 = vld [vmem:[#allocation3 + $0x2d8] sm:$0xff] }
 0xe4f   : > { %2481 = vmatpush.bf16.msrb.mxu2 %v3707_v6  ;;  %2348 = vmatpush.bf16.msra.mxu3 %v3691_v5  ;;  %v3796_v5 = vld [vmem:[%s4446_s2 + $0x11] ss:$0 sm:$0xff] }
 0xe9f   : > { %v2000_v61 = vpop.f32.mrf.mxu0 }
 0xea0   : > { %v2001_v63 = vadd.f32 %v3791_v59, %v2000_v61 }
 0xea2   : > { %v2014_v4 = vadd.f32 %v2013_v53, %v2001_v63 }
 0xea4   : > { %vm2017_vm0 = vcmp.ge.f32.partialorder %v2014_v4, 0.0  ;;  %v2018_v9 = vmul.f32 0.1, %v2014_v4 }
 0xea6   : > { %v2019_v10 = vsel %vm2017_vm0, %v2014_v4, %v2018_v9  ;;  %v3706_v4 = vld [vmem:[#allocation3 + $0x2d0] sm:$0xff]  ;;  %v3705_v9 = vld [vmem:[#allocation3 + $0x2c8] sm:$0xff] }
 0xea7   : > { %2025 = vrot.lane.b32.xlu1 %v2019_v10, %s3854_s15  ;;  %v2021_v12 = vrot.slane %v2019_v10, 7  ;;  %v2029_v15 = vrot.slane %v2019_v10, 1  ;;  %v2002_v17 = vpop.f32.mrf.mxu0  ;;  %2482 = vmatpush.bf16.msrb.mxu2 %v3706_v4  ;;  %v3690_v10 = vld [vmem:[#allocation3 + $0x390] sm:$0xff] }
 0xea8   : > { %2349 = vmatpush.bf16.msra.mxu3 %v3690_v10  ;;  %v3702_v17 = vld [vmem:[#allocation3 + $0x2b0] sm:$0xff] }
 0xea9   : > { %2032 = vst.msk [vmem:[#allocation2 + $0x18] sm:$0x7] %vm1883_vm11, %v2029_v15  ;;  %v3728_v15 = vld [vmem:[#allocation3 + $0x380] sm:$0xff]  ;;  %v3738_v4 = vld [vmem:[#allocation3 + $0x430] sm:$0xff] }
 0xeaa   : > { %2023 = vst.msk [vmem:[#allocation2 + $0x10] sm:$0x1e] %vm1872_vm14, %v2021_v12  ;;  %v3703_v12 = vld [vmem:[#allocation3 + $0x2b8] sm:$0xff] }
 0xeab   : > { %2483 = vmatpush.bf16.msrb.mxu2 %v3705_v9  ;;  %v3795_v9 = vld [vmem:[%s4446_s2 + $0x12] ss:$0 sm:$0xff] }
 0xeaf   : > { %2484 = vmatpush.bf16.msrb.mxu2 %v3704_v11 }
 0xeb0   : > { %v2035_v21 = vld [vmem:[#allocation2 + $0x18] sm:$0xf] }
 0xeb1   : > { %v2037_v22 = vpack.c.bf16 %v2035_v21, %v2035_v21  ;;  %2373 = vst.msk [vmem:[#allocation2 + $0x1b] sm:$0x1] %vm1498_vm3, %v3850_v14  ;;  %v3727_v21 = vld [vmem:[#allocation3 + $0x378] sm:$0xff] }
 0xeb3   : > { %3351 = vmatmul.msk.bf16.vlgmr.msrb.gmra.mxu3 %vm719_vm7, %v2037_v22  ;;  %2485 = vmatpush.bf16.msrb.mxu2 %v3703_v12  ;;  %v3726_v22 = vld [vmem:[#allocation3 + $0x370] sm:$0xff] }
 0xeb7   : > { %2486 = vmatpush.bf16.msrb.mxu2 %v3702_v17 }
 0xf19   : > { %v2026_v26 = vpop.permute.xlu1 %2025 }
 0xf1a   : > { %2028 = vst.msk [vmem:[#allocation2 + $0x10] sm:$0xf] %vm1878_vm15, %v2026_v26 }
 0xf21   : > { %v2034_v27 = vld [vmem:[#allocation2 + $0x10] sm:$0xf] }
 0xf22   : > { %v2036_v28 = vpack.c.bf16 %v2034_v27, %v2034_v27 }
 0xf24   : > { %2147 = vmatmul.bf16.vlgmr.msrb.gmra.mxu1 %v2036_v28 }
 0xf36   : > { %v2161_v29 = vpop.f32.mrf.mxu3 }
 0xf3e   : > { %v2163_v31 = vpop.f32.mrf.mxu3 }
 0xf3f   : > { %v3725_v31 = vld [vmem:[#allocation3 + $0x368] sm:$0xff] }
 0xf40   : > { %2644 = vmatpush.bf16.msrb.mxu1 %v3725_v31  ;;  %v3732_v31 = vld [vmem:[#allocation3 + $0x400] sm:$0xff] }
 0xf44   : > { %2645 = vmatpush.bf16.msrb.mxu1 %v3724_v32  ;;  %v3731_v32 = vld [vmem:[#allocation3 + $0x3f8] sm:$0xff] }
 0xf48   : > { %2646 = vmatpush.bf16.msrb.mxu1 %v3723_v20  ;;  %v3730_v20 = vld [vmem:[#allocation3 + $0x3f0] sm:$0xff] }
 0xf4c   : > { %2647 = vmatpush.bf16.msrb.mxu1 %v3722_v33  ;;  %v3744_v33 = vld [vmem:[#allocation3 + $0x460] sm:$0xff] }
 0xfa1   : > { %v2148_v46 = vpop.f32.mrf.mxu1 }
 0xfa2   : > { %v2149_v2 = vadd.f32 %v3792_v1, %v2148_v46  ;;  %v3794_v1 = vld [vmem:[%s4446_s2 + $0x10] ss:$0 sm:$0xff] }
 0xfa3   : > { %v3718_v46 = vld [vmem:[#allocation3 + $0x330] sm:$0xff] }
 0xfa4   : > { %v2162_v51 = vadd.f32 %v2161_v29, %v2149_v2 }
 0xfa6   : > { %v2216_v53 = vadd.f32 %v2213_v50, %v2162_v51 }
 0xfa8   : > { %v2218_v16 = vmul.f32 0.1, %v2216_v53  ;;  %vm2217_vm1 = vcmp.ge.f32.partialorder %v2216_v53, 0.0 }
 0xfa9   : > { %v2150_v54 = vpop.f32.mrf.mxu1 }
 0xfaa   : > { %v2219_v7 = vsel %vm2217_vm1, %v2216_v53, %v2218_v16  ;;  %v3716_v16 = vld [vmem:[#allocation3 + $0x320] sm:$0xff] }
 0xfab   : > { %v2223_v55 = vrot.slane %v2219_v7, 1  ;;  %v2231_v57 = vrot.slane %v2219_v7, 2  ;;  %2221 = vst.msk [vmem:[#allocation2 + $0x10] sm:$0xf] %vm2220_vm9, %v2219_v7 }
 0xfad   : > { %2224 = vrot.lane.b32.xlu1 %v2223_v55, %s3854_s15  ;;  %2236 = vst.msk [vmem:[#allocation2 + $0x18] sm:$0x3] %vm2235_vm13, %v2231_v57  ;;  %v3715_v55 = vld [vmem:[#allocation3 + $0x318] sm:$0xff]  ;;  %v3714_v57 = vld [vmem:[#allocation3 + $0x310] sm:$0xff] }
 0xfb4   : > { %v2238_v59 = vld [vmem:[#allocation2 + $0x18] sm:$0x3] }
 0xfb5   : > { %v2240_v60 = vpack.c.bf16 %v2238_v59, %v2238_v59  ;;  %2372 = vst.msk [vmem:[#allocation2 + $0x18] sm:$0x7] %vm1883_vm11, %v1880_v40  ;;  %v3729_v40 = vld [vmem:[#allocation3 + $0x388] sm:$0xff] }
 0xfb6   : > { %2691 = vmatpush.bf16.msrb.mxu3 %v3729_v40 }
 0xfb7   : > { %3417 = vmatmul.msk.bf16.vlgmr.msrb.gmra.mxu0 %vm719_vm7, %v2240_v60 }
 0xfba   : > { %2692 = vmatpush.bf16.msrb.mxu3 %v3728_v15  ;;  %v3737_v15 = vld [vmem:[#allocation3 + $0x428] sm:$0xff] }
 0xfbb   : > { %2821 = vmatpush.bf16.msra.mxu2 %v3737_v15 }
 0xfbc   : > { %v2375_v61 = vld [vmem:[#allocation2 + $0x18] sm:$0xf] }
 0xfbd   : > { %v2377_v63 = vpack.c.bf16 %v2375_v61, %v2375_v61  ;;  %2521 = vst.msk [vmem:[#allocation2 + $0x1b] sm:$0x1] %vm1498_vm3, %v3850_v14 }
 0xfbe   : > { %2693 = vmatpush.bf16.msrb.mxu3 %v3727_v21  ;;  %v3736_v21 = vld [vmem:[#allocation3 + $0x420] sm:$0xff] }
 0xfbf   : > { %3466 = vmatmul.msk.bf16.vlgmr.msra.gmra.mxu1 %vm719_vm7, %v2377_v63  ;;  %v3741_v63 = vld [vmem:[#allocation3 + $0x448] sm:$0xff]  ;;  %2822 = vmatpush.bf16.msra.mxu2 %v3736_v21 }
 0xfc0   : > { %2838 = vmatpush.bf16.msra.mxu1 %v3741_v63 }
 0xfc2   : > { %2694 = vmatpush.bf16.msrb.mxu3 %v3726_v22 }
 0xfc4   : > { %2839 = vmatpush.bf16.msra.mxu1 %v3740_v48 }
0x101f   : > { %v2225_v23 = vpop.permute.xlu1 %2224 }
0x1020   : > { %2230 = vst.msk [vmem:[#allocation2 + $0x10] sm:$0x7] %vm2229_vm2, %v2225_v23 }
0x1027   : > { %v2237_v25 = vld [vmem:[#allocation2 + $0x10] sm:$0x3] }
0x1028   : > { %2368 = vst.msk [vmem:[#allocation2 + $0x10] sm:$0x1e] %vm1872_vm14, %v1870_v39  ;;  %v2239_v26 = vpack.c.bf16 %v2237_v25, %v2237_v25 }
0x1029   : > { %2369 = vst.msk [vmem:[#allocation2 + $0x10] sm:$0x1] %vm1498_vm3, %v3850_v14 }
0x102a   : > { %2370 = vst.msk [vmem:[#allocation2 + $0x10] sm:$0xf] %vm1878_vm15, %v4343_v18  ;;  %2350 = vmatmul.bf16.vlgmr.msra.gmra.mxu3 %v2239_v26 }
0x102b   : > { %2889 = vmatpush.bf16.msra.mxu3 %v3745_v24 }
0x102f   : > { %2890 = vmatpush.bf16.msra.mxu3 %v3744_v33 }
0x1031   : > { %v2374_v27 = vld [vmem:[#allocation2 + $0x10] sm:$0xf] }
0x1032   : > { %v2376_v28 = vpack.c.bf16 %v2374_v27, %v2374_v27  ;;  %2512 = vst.msk [vmem:[#allocation2 + $0x10] sm:$0x1] %vm1498_vm3, %v3850_v14  ;;  %vm2899_vm3 = vcmask 1024  }
0x1034   : > { %2487 = vmatmul.bf16.vlgmr.msrb.gmra.mxu2 %v2376_v28  ;;  %v2364_v38 = vpop.f32.mrf.mxu0  ;;  %v3735_v28 = vld [vmem:[#allocation3 + $0x418] sm:$0xff] }
0x1035   : > { %2823 = vmatpush.bf16.msra.mxu2 %v3735_v28 }
0x103a   : > { %3532 = vmatmul.msk.bf16.vlgmr.msrb.gmra.mxu3 %vm719_vm7, %v4339_v8  ;;  %v3720_v8 = vld [vmem:[#allocation3 + $0x340] sm:$0xff] }
0x103b   : > { %2628 = vmatpush.bf16.msra.mxu0 %v3720_v8 }
0x103c   : > { %v2366_v39 = vpop.f32.mrf.mxu0  ;;  %v2501_v18 = vpop.f32.mrf.mxu1 }
0x103d   : > { %v3733_v39 = vld [vmem:[#allocation3 + $0x408] sm:$0xff] }
0x103f   : > { %2629 = vmatpush.bf16.msra.mxu0 %v3719_v42  ;;  %v3742_v42 = vld [vmem:[#allocation3 + $0x450] sm:$0xff] }
0x1043   : > { %2630 = vmatpush.bf16.msra.mxu0 %v3718_v46 }
0x1044   : > { %v2503_v29 = vpop.f32.mrf.mxu1 }
0x1047   : > { %2631 = vmatpush.bf16.msra.mxu0 %v3717_v49  ;;  %v3798_v49 = vld [vmem:[%s4446_s2 + $0x15] ss:$0 sm:$0xff] }
0x104b   : > { %2632 = vmatpush.bf16.msra.mxu0 %v3716_v16 }
0x104f   : > { %2633 = vmatpush.bf16.msra.mxu0 %v3715_v55 }
0x1053   : > { %2634 = vmatpush.bf16.msra.mxu0 %v3714_v57 }
0x10ad   : > { %v2351_v14 = vpop.f32.mrf.mxu3 }
0x10ae   : > { %v2352_v37 = vadd.f32 %v3793_v35, %v2351_v14 }
0x10b0   : > { %v2365_v34 = vadd.f32 %v2364_v38, %v2352_v37  ;;  %v3734_v38 = vld [vmem:[#allocation3 + $0x410] sm:$0xff]  ;;  %v1116_v37 = vpop.permute.xlu0 %1115 }
0x10b1   : > { %2824 = vmatpush.bf16.msra.mxu2 %v3734_v38 }
0x10b2   : > { %2900 = vst.msk [vmem:[%s4392_s20] sm:$0x3] %vm2899_vm3, %v2365_v34  ;;  %v3743_v34 = vld [vmem:[#allocation3 + $0x458] sm:$0xff] }
0x10b3   : > { %2891 = vmatpush.bf16.msra.mxu3 %v3743_v34 }
0x10b5   : > { %v2353_v43 = vpop.f32.mrf.mxu3  ;;  %2825 = vmatpush.bf16.msra.mxu2 %v3733_v39 }
0x10b7   : > { %v2488_v44 = vpop.f32.mrf.mxu2  ;;  %2892 = vmatpush.bf16.msra.mxu3 %v3742_v42 }
0x10b8   : > { %v2489_v47 = vadd.f32 %v3794_v1, %v2488_v44  ;;  %v3797_v1 = vld [vmem:[%s4446_s2 + $0x14] ss:$0 sm:$0xff] }
0x10b9   : > { %2826 = vmatpush.bf16.msra.mxu2 %v3732_v31 }
0x10ba   : > { %v2502_v2 = vadd.f32 %v2501_v18, %v2489_v47 }
0x10bc   : > { %vm2505_vm6 = vcmp.ge.f32.partialorder %v2502_v2, 0.0  ;;  %v2506_v13 = vmul.f32 0.1, %v2502_v2 }
0x10bd   : > { %v2696_v50 = vpop.f32.mrf.mxu3  ;;  %2827 = vmatpush.bf16.msra.mxu2 %v3731_v32 }
0x10be   : > { %v2507_v51 = vsel %vm2505_vm6, %v2502_v2, %v2506_v13  ;;  %v2697_v40 = vadd.f32 %v3795_v9, %v2696_v50 }
0x10bf   : > { %v2490_v53 = vpop.f32.mrf.mxu2  ;;  %2513 = vrot.lane.b32.xlu2 %v2507_v51, %s3854_s15  ;;  %v2509_v0 = vrot.slane %v2507_v51, 7  ;;  %v2517_v6 = vrot.slane %v2507_v51, 1 }
0x10c1   : > { %2511 = vst.msk [vmem:[#allocation2 + $0x10] sm:$0x1e] %vm1872_vm14, %v2509_v0  ;;  %2828 = vmatpush.bf16.msra.mxu2 %v3730_v20 }
0x10c2   : > { %2520 = vst.msk [vmem:[#allocation2 + $0x18] sm:$0x7] %vm1883_vm11, %v2517_v6 }
0x10c5   : > { %v2698_v54 = vpop.f32.mrf.mxu3 }
0x10c7   : > { %937 = vrot.lane.b32.xlu2 %v930_v52, %s3853_s30  ;;  %v3739_v52 = vld [vmem:[#allocation3 + $0x438] sm:$0xff] }
0x10c8   : > { %2840 = vmatpush.bf16.msra.mxu1 %v3739_v52 }
0x10c9   : > { %v2523_v7 = vld [vmem:[#allocation2 + $0x18] sm:$0xf] }
0x10ca   : > { %v2525_v19 = vpack.c.bf16 %v2523_v7, %v2523_v7 }
0x10cc   : > { %3515 = vmatmul.msk.bf16.vlgmr.msrb.gmra.mxu1 %vm719_vm7, %v2525_v19 }
0x10cd   : > { %2841 = vmatpush.bf16.msra.mxu1 %v3738_v4 }
0x1119   : > { %v2514_v3 = vpop.permute.xlu2 %2513 }
0x111a   : > { %2516 = vst.msk [vmem:[#allocation2 + $0x10] sm:$0xf] %vm1878_vm15, %v2514_v3 }
0x1121   : > { %v2522_v58 = vld [vmem:[#allocation2 + $0x10] sm:$0xf] }
0x1122   : > { %v2524_v59 = vpack.c.bf16 %v2522_v58, %v2522_v58 }
0x1124   : > { %2635 = vmatmul.bf16.vlgmr.msra.gmra.mxu0 %v2524_v59 }
0x1149   : > { %v2649_v60 = vpop.f32.mrf.mxu1 }
0x1151   : > { %v2651_v61 = vpop.f32.mrf.mxu1 }
0x11a1   : > { %v2636_v10 = vpop.f32.mrf.mxu0 }
0x11a2   : > { %v2637_v11 = vadd.f32 %v3796_v5, %v2636_v10 }
0x11a4   : > { %v2650_v12 = vadd.f32 %v2649_v60, %v2637_v11 }
0x11a6   : > { %v2700_v17 = vadd.f32 %v2697_v40, %v2650_v12 }
0x11a8   : > { %v2702_v22 = vmul.f32 0.1, %v2700_v17  ;;  %vm2701_vm4 = vcmp.ge.f32.partialorder %v2700_v17, 0.0 }
0x11a9   : > { %v2638_v23 = vpop.f32.mrf.mxu0 }
0x11aa   : > { %v2703_v25 = vsel %vm2701_vm4, %v2700_v17, %v2702_v22 }
0x11ab   : > { %v2706_v26 = vrot.slane %v2703_v25, 1  ;;  %v2712_v27 = vrot.slane %v2703_v25, 2  ;;  %2704 = vst.msk [vmem:[#allocation2 + $0x10] sm:$0xf] %vm2220_vm9, %v2703_v25 }
0x11ad   : > { %2707 = vrot.lane.b32.xlu1 %v2706_v26, %s3854_s15  ;;  %2715 = vst.msk [vmem:[#allocation2 + $0x18] sm:$0x3] %vm2235_vm13, %v2712_v27 }
0x11b4   : > { %v2717_v18 = vld [vmem:[#allocation2 + $0x18] sm:$0x3] }
0x11b5   : > { %518 = vrot.lane.b32.xlu1 %v503_v30, %s3853_s30  ;;  %v2719_v29 = vpack.c.bf16 %v2717_v18, %v2717_v18 }
0x11b7   : > { %3581 = vmatmul.msk.bf16.vlgmr.msra.gmra.mxu1 %vm719_vm7, %v2719_v29 }
0x11bd   : > { %802 = vrot.lane.b32.xlu1 %v795_v62, %s3853_s30  ;;  %v938_v62 = vpop.permute.xlu2 %937 }
0x11c5   : > { %1232 = vrot.lane.b32.xlu1 %v1229_v45, %s3854_s15 }
0x121f   : > { %v2708_v30 = vpop.permute.xlu1 %2707 }
0x1220   : > { %2711 = vst.msk [vmem:[#allocation2 + $0x10] sm:$0x7] %vm2229_vm2, %v2708_v30 }
0x1227   : > { %v519_v35 = vpop.permute.xlu1 %518  ;;  %v2716_v14 = vld [vmem:[#allocation2 + $0x10] sm:$0x3] }
0x1228   : > { %v2718_v36 = vpack.c.bf16 %v2716_v14, %v2716_v14 }
0x122a   : > { %2829 = vmatmul.bf16.vlgmr.msra.gmra.mxu2 %v2718_v36 }
0x122f   : > { %v803_v56 = vpop.permute.xlu1 %802 }
0x1234   : > { %v2843_v41 = vpop.f32.mrf.mxu1 }
0x1237   : > { %v1233_v45 = vpop.permute.xlu1 %1232 }
0x123c   : > { %v2845_v8 = vpop.f32.mrf.mxu1 }
0x12ad   : > { %v2830_v43 = vpop.f32.mrf.mxu2 }
0x12ae   : > { %v2831_v44 = vadd.f32 %v3797_v1, %v2830_v43 }
0x12b0   : > { %v2844_v46 = vadd.f32 %v2843_v41, %v2831_v44 }
0x12b2   : > { %v2847_v47 = vpack.c.bf16 %v2844_v46, %v2844_v46 }
0x12b4   : > { %3598 = vmatmul.msk.bf16.vlgmr.msra.gmra.mxu3 %vm719_vm7, %v2847_v47 }
0x12b5   : > { %v2832_v2 = vpop.f32.mrf.mxu2 }
0x1337   : > { %v2894_v13 = vpop.f32.mrf.mxu3 }
0x1338   : > { %v2895_v50 = vadd.f32 %v3798_v49, %v2894_v13 }
0x133a   : > { %2902 = vrot.lane.b32.xlu2 %v2895_v50, %s3855_s4 }
0x133f   : > { %v2896_v51 = vpop.f32.mrf.mxu3 }
0x1394   : > { %v2903_v53 = vpop.permute.xlu2 %2902 }
0x1395   : > { %2906 = vst.msk [vmem:[%s4392_s20] sm:$0x3] %vm2905_vm12, %v2903_v53 }
0x1396 PF: > { %s14_s12 = sadd.s32 1, %s3843_s12  }
0x1397   : > { %p11_p7 = scmp.ge.s32.totalorder %s14_s12, 4  }
0x1399   :  { %13 = sbr.rel (!%p11_p7) target bundleno = 1 (0x1), region = 67 }
0x139e   :  { %2926 = vsyncpa [#allocation4], 1 }
0x139f   :  { %2928 = vsyncpa [#allocation4 + $0x1], 1 }

</bundles_post_ra>
